<compile_context>
chip_gen: v7x
topology: tpu7x:2x2x1
jax: 0.10.0
libtpu: 0.0.40
codegen_flags: <defaults>
</compile_context>

<pallas_src>
import jax
import jax.numpy as jnp
import numpy as np
from jax.experimental import pallas as pl
from jax.experimental.pallas import tpu as pltpu

IN_DIM = 80 * 80   # 6400
HID = 256
OUT = 2
OUT_PAD = 128      # lane-dense padded output width (full vst, no masked store)


def policy_kernel(x_ref, w1_ref, b1_ref, w2_ref, b2_ref, o_ref):
    # In-kernel f32 -> bf16 cast of the streamed activation tile (VPU work,
    # hidden under the MXU; avoids a separate HBM pass for a wrapper cast).
    x_bf = x_ref[...].astype(jnp.bfloat16)

    # ---- Linear 1 (bf16 x bf16 -> f32 accumulate) + identity dropout + ReLU -
    h = jnp.dot(x_bf, w1_ref[...], preferred_element_type=jnp.float32)
    h = jnp.maximum(h + b1_ref[...], 0.0)                       # (TM, 256) f32

    # ---- Linear 2, lane-dense padded to 128 output columns (cols >= 2 are 0)
    logits = jnp.dot(h, w2_ref[...], preferred_element_type=jnp.float32)
    logits = logits + b2_ref[...]                               # (TM, 128)

    # ---- Exact 2-class softmax: p1 = sigmoid(l1 - l0), p0 = 1 - p1 ----------
    lane = jax.lax.broadcasted_iota(jnp.int32, logits.shape, 1)
    l0 = jnp.sum(jnp.where(lane == 0, logits, 0.0), axis=-1, keepdims=True)
    l1 = jnp.sum(jnp.where(lane == 1, logits, 0.0), axis=-1, keepdims=True)
    p1 = 1.0 / (1.0 + jnp.exp(l0 - l1))                         # (TM, 1)
    p0 = 1.0 - p1
    out = jnp.where(lane == 0, p0, jnp.where(lane == 1, p1, 0.0))
    o_ref[...] = out.astype(o_ref.dtype)


def _preferred_tm():
    """MXU-matched batch tile: 256 on v6e/v7x (256-wide MXU), 128 on <= v5."""
    try:
        kind = jax.devices()[0].device_kind.lower()
    except Exception:
        return 256
    for old in ("v2", "v3", "v4", "v5"):
        if old in kind:
            return 128
    return 256


def _choose_tm(batch):
    tm = _preferred_tm()
    # Shrink for small batches: don't DMA/compute a mostly-empty tile.
    while tm > 8 and tm >= 2 * batch:
        tm //= 2
    # Keep >= 2 grid steps when the batch is large enough that halving the
    # tile still keeps the MXU M-dim well filled (lets v7x's 2 TCs both work).
    if batch > 128 and pl.cdiv(batch, tm) < 2:
        tm //= 2
    return tm


def policy_forward(x, w1, b1, w2, b2, tm=None):
    """x: (B, 6400) f32; w1: (6400, 256); b1: (1, 256); w2: (256, 2); b2: (1, 2)."""
    B = x.shape[0]
    TM = tm if tm is not None else _choose_tm(B)
    n_tiles = pl.cdiv(B, TM)

    # One-time tiny weight prep (W1 -> bf16, W2/b2 zero-padded to 128 lanes).
    w1_bf = w1.astype(jnp.bfloat16)
    w2_p = jnp.pad(w2, ((0, 0), (0, OUT_PAD - OUT)))
    b2_p = jnp.pad(b2, ((0, 0), (0, OUT_PAD - OUT)))

    cost = pl.CostEstimate(
        flops=2 * n_tiles * TM * (IN_DIM * HID + HID * OUT_PAD),
        transcendentals=n_tiles * TM,                 # one exp per row
        bytes_accessed=(B * IN_DIM * 4                # x (f32, single pass)
                        + IN_DIM * HID * 2            # W1 (bf16)
                        + HID * OUT_PAD * 4           # W2 padded
                        + (HID + OUT_PAD) * 4         # biases
                        + B * OUT_PAD * 4),           # output
    )

    # VMEM budget (double-buffered streamed/resident operands + in-kernel temps).
    vmem_est = (2 * TM * IN_DIM * 4        # x f32 tiles (double-buffered)
                + 2 * IN_DIM * HID * 2     # W1 bf16
                + 2 * HID * OUT_PAD * 4    # W2 padded
                + 2 * (HID + OUT_PAD) * 4  # biases
                + 2 * TM * OUT_PAD * 4     # output tiles
                + TM * IN_DIM * 2          # in-kernel bf16 copy of x tile
                + 2 * TM * HID * 4         # h
                + 4 * TM * OUT_PAD * 4)    # logits / masks / selects slack
    vmem_limit = max(16 << 20, min(int(vmem_est * 3 // 2), 56 << 20))

    out = pl.pallas_call(
        policy_kernel,
        out_shape=jax.ShapeDtypeStruct((B, OUT_PAD), jnp.float32),
        grid_spec=pltpu.PrefetchScalarGridSpec(
            num_scalar_prefetch=0,
            grid=(n_tiles,),
            in_specs=[
                pl.BlockSpec((TM, IN_DIM), lambda i: (i, 0)),    # x tile (f32)
                pl.BlockSpec((IN_DIM, HID), lambda i: (0, 0)),   # W1 (resident, bf16)
                pl.BlockSpec((1, HID), lambda i: (0, 0)),        # b1
                pl.BlockSpec((HID, OUT_PAD), lambda i: (0, 0)),  # W2 (padded)
                pl.BlockSpec((1, OUT_PAD), lambda i: (0, 0)),    # b2 (padded)
            ],
            out_specs=pl.BlockSpec((TM, OUT_PAD), lambda i: (i, 0)),
        ),
        compiler_params=pltpu.CompilerParams(
            dimension_semantics=("parallel",),
            vmem_limit_bytes=vmem_limit,
        ),
        cost_estimate=cost,
    )(x, w1_bf, b1, w2_p, b2_p)

    return out[:, :OUT]


def init_params(key):
    """Deterministic init mimicking torch.nn.Linear default U(-1/sqrt(fan_in), ...)."""
    k1, k2, k3, k4 = jax.random.split(key, 4)
    bound1 = 1.0 / np.sqrt(IN_DIM)
    bound2 = 1.0 / np.sqrt(HID)
    w1 = jax.random.uniform(k1, (IN_DIM, HID), jnp.float32, -bound1, bound1)
    b1 = jax.random.uniform(k2, (1, HID),      jnp.float32, -bound1, bound1)
    w2 = jax.random.uniform(k3, (HID, OUT),    jnp.float32, -bound2, bound2)
    b2 = jax.random.uniform(k4, (1, OUT),      jnp.float32, -bound2, bound2)
    return w1, b1, w2, b2


def reference_forward(x, w1, b1, w2, b2):
    h = jnp.maximum(x @ w1 + b1, 0.0)
    logits = h @ w2 + b2
    return jax.nn.softmax(logits, axis=1)


if __name__ == "__main__":
    key = jax.random.PRNGKey(0)
    kx, kp, kx2 = jax.random.split(key, 3)
    w1, b1, w2, b2 = init_params(kp)

    # Case 1: tiny batch (single partial block, auto-picked tile).
    B1 = 4
    x1 = jax.random.normal(kx, (B1, IN_DIM), jnp.float32)
    out1 = jax.block_until_ready(policy_forward(x1, w1, b1, w2, b2))
    ref1 = jax.block_until_ready(reference_forward(x1, w1, b1, w2, b2))
    assert out1.shape == (B1, OUT)
    np.testing.assert_allclose(np.asarray(out1), np.asarray(ref1), rtol=2e-2, atol=1e-2)
    np.testing.assert_allclose(np.asarray(out1).sum(axis=1), np.ones(B1), rtol=1e-6, atol=1e-6)

    # Case 2: multi-tile grid with a partial last block (forced small tile).
    B2 = 40
    x2 = jax.random.normal(kx2, (B2, IN_DIM), jnp.float32)
    out2 = jax.block_until_ready(policy_forward(x2, w1, b1, w2, b2, tm=16))
    ref2 = jax.block_until_ready(reference_forward(x2, w1, b1, w2, b2))
    assert out2.shape == (B2, OUT)
    np.testing.assert_allclose(np.asarray(out2), np.asarray(ref2), rtol=2e-2, atol=1e-2)
    np.testing.assert_allclose(np.asarray(out2).sum(axis=1), np.ones(B2), rtol=1e-6, atol=1e-6)

    print("KERNEL_OK")
</pallas_src>

<mosaic_0001>
module attributes {stable_mosaic.version = 11 : i64} {
  func.func @policy_kernel(%arg0: i32, %arg1: memref<8x6400xf32, #tpu.memory_space<vmem>>, %arg2: memref<6400x256xbf16, #tpu.memory_space<vmem>>, %arg3: memref<1x256xf32, #tpu.memory_space<vmem>>, %arg4: memref<256x128xf32, #tpu.memory_space<vmem>>, %arg5: memref<1x128xf32, #tpu.memory_space<vmem>>, %arg6: memref<8x128xf32, #tpu.memory_space<vmem>>) attributes {dimension_semantics = [#tpu.dimension_semantics<parallel>], iteration_bounds = array<i64: 1>, scalar_prefetch = 0 : i64, scratch_operands = 0 : i64, tpu.core_type = #tpu.core_type<tc>, window_params = [{transform_indices = @transform_0, window_bounds = array<i64: 8, 6400>}, {pipeline_mode = #tpu.pipeline_mode<synchronous>, transform_indices = @transform_1, window_bounds = array<i64: 6400, 256>}, {pipeline_mode = #tpu.pipeline_mode<synchronous>, transform_indices = @transform_2, window_bounds = array<i64: 1, 256>}, {pipeline_mode = #tpu.pipeline_mode<synchronous>, transform_indices = @transform_3, window_bounds = array<i64: 256, 128>}, {pipeline_mode = #tpu.pipeline_mode<synchronous>, transform_indices = @transform_4, window_bounds = array<i64: 1, 128>}, {transform_indices = @transform_5, window_bounds = array<i64: 8, 128>}]} {
    %c0 = arith.constant 0 : index
    %c0_0 = arith.constant 0 : index
    %0 = vector.load %arg1[%c0, %c0_0] : memref<8x6400xf32, #tpu.memory_space<vmem>>, vector<8x6400xf32>
    %1 = arith.truncf %0 : vector<8x6400xf32> to vector<8x6400xbf16>
    %c0_1 = arith.constant 0 : index
    %c0_2 = arith.constant 0 : index
    %2 = vector.load %arg2[%c0_1, %c0_2] : memref<6400x256xbf16, #tpu.memory_space<vmem>>, vector<6400x256xbf16>
    %cst = arith.constant dense<0.000000e+00> : vector<8x256xf32>
    %3 = tpu.matmul %1, %2, %cst {dimension_numbers = #tpu.dot_dimension_numbers<[1], [0], [0], [1], [0, 0, 1, 1], [], []>} : vector<8x6400xbf16>, vector<6400x256xbf16>, vector<8x256xf32> -> vector<8x256xf32>
    %c0_3 = arith.constant 0 : index
    %c0_4 = arith.constant 0 : index
    %4 = vector.load %arg3[%c0_3, %c0_4] : memref<1x256xf32, #tpu.memory_space<vmem>>, vector<1x256xf32>
    %5 = vector.broadcast %4 : vector<1x256xf32> to vector<8x256xf32>
    %6 = arith.addf %3, %5 : vector<8x256xf32>
    %cst_5 = arith.constant 0.000000e+00 : f32
    %7 = vector.broadcast %cst_5 : f32 to vector<8x256xf32>
    %8 = arith.maximumf %6, %7 : vector<8x256xf32>
    %c0_6 = arith.constant 0 : index
    %c0_7 = arith.constant 0 : index
    %9 = vector.load %arg4[%c0_6, %c0_7] : memref<256x128xf32, #tpu.memory_space<vmem>>, vector<256x128xf32>
    %cst_8 = arith.constant dense<0.000000e+00> : vector<8x128xf32>
    %10 = tpu.matmul %8, %9, %cst_8 {dimension_numbers = #tpu.dot_dimension_numbers<[1], [0], [0], [1], [0, 0, 1, 1], [], []>} : vector<8x256xf32>, vector<256x128xf32>, vector<8x128xf32> -> vector<8x128xf32>
    %c0_9 = arith.constant 0 : index
    %c0_10 = arith.constant 0 : index
    %11 = vector.load %arg5[%c0_9, %c0_10] : memref<1x128xf32, #tpu.memory_space<vmem>>, vector<1x128xf32>
    %12 = vector.broadcast %11 : vector<1x128xf32> to vector<8x128xf32>
    %13 = arith.addf %10, %12 : vector<8x128xf32>
    %14 = tpu.iota {dimensions = array<i32: 1>} : vector<8x128xi32>
    %c0_i32 = arith.constant 0 : i32
    %15 = vector.broadcast %c0_i32 : i32 to vector<8x128xi32>
    %16 = arith.cmpi eq, %14, %15 : vector<8x128xi32>
    %cst_11 = arith.constant 0.000000e+00 : f32
    %17 = vector.broadcast %cst_11 : f32 to vector<8x128xf32>
    %18 = arith.select %16, %13, %17 : vector<8x128xi1>, vector<8x128xf32>
    %cst_12 = arith.constant dense<0.000000e+00> : vector<8xf32>
    %19 = vector.multi_reduction <add>, %18, %cst_12 [1] : vector<8x128xf32> to vector<8xf32>
    %20 = vector.shape_cast %19 : vector<8xf32> to vector<8x1xf32>
    %c1_i32 = arith.constant 1 : i32
    %21 = vector.broadcast %c1_i32 : i32 to vector<8x128xi32>
    %22 = arith.cmpi eq, %14, %21 : vector<8x128xi32>
    %cst_13 = arith.constant 0.000000e+00 : f32
    %23 = vector.broadcast %cst_13 : f32 to vector<8x128xf32>
    %24 = arith.select %22, %13, %23 : vector<8x128xi1>, vector<8x128xf32>
    %cst_14 = arith.constant dense<0.000000e+00> : vector<8xf32>
    %25 = vector.multi_reduction <add>, %24, %cst_14 [1] : vector<8x128xf32> to vector<8xf32>
    %26 = vector.shape_cast %25 : vector<8xf32> to vector<8x1xf32>
    %27 = arith.subf %20, %26 : vector<8x1xf32>
    %28 = math.exp %27 : vector<8x1xf32>
    %cst_15 = arith.constant 1.000000e+00 : f32
    %29 = vector.broadcast %cst_15 : f32 to vector<8x1xf32>
    %30 = arith.addf %29, %28 : vector<8x1xf32>
    %cst_16 = arith.constant 1.000000e+00 : f32
    %31 = vector.broadcast %cst_16 : f32 to vector<8x1xf32>
    %32 = arith.divf %31, %30 : vector<8x1xf32>
    %cst_17 = arith.constant 1.000000e+00 : f32
    %33 = vector.broadcast %cst_17 : f32 to vector<8x1xf32>
    %34 = arith.subf %33, %32 : vector<8x1xf32>
    %c0_i32_18 = arith.constant 0 : i32
    %35 = vector.broadcast %c0_i32_18 : i32 to vector<8x128xi32>
    %36 = arith.cmpi eq, %14, %35 : vector<8x128xi32>
    %c1_i32_19 = arith.constant 1 : i32
    %37 = vector.broadcast %c1_i32_19 : i32 to vector<8x128xi32>
    %38 = arith.cmpi eq, %14, %37 : vector<8x128xi32>
    %cst_20 = arith.constant 0.000000e+00 : f32
    %39 = vector.shape_cast %32 : vector<8x1xf32> to vector<8x1xf32>
    %40 = vector.broadcast %39 : vector<8x1xf32> to vector<8x128xf32>
    %41 = vector.broadcast %cst_20 : f32 to vector<8x128xf32>
    %42 = arith.select %38, %40, %41 : vector<8x128xi1>, vector<8x128xf32>
    %43 = vector.shape_cast %34 : vector<8x1xf32> to vector<8x1xf32>
    %44 = vector.broadcast %43 : vector<8x1xf32> to vector<8x128xf32>
    %45 = arith.select %36, %44, %42 : vector<8x128xi1>, vector<8x128xf32>
    %c0_21 = arith.constant 0 : index
    %c0_22 = arith.constant 0 : index
    %46 = vector.load %arg6[%c0_21, %c0_22] : memref<8x128xf32, #tpu.memory_space<vmem>>, vector<8x128xf32>
    tpu.vector_store %arg6[%c0_21, %c0_22], %45 {strides = array<i32>} : memref<8x128xf32, #tpu.memory_space<vmem>>, vector<8x128xf32>,
    return
  }
  func.func @transform_0(%arg0: i32) -> (i32, i32) {
    %c0_i32 = arith.constant 0 : i32
    %c0_i32_0 = arith.constant 0 : i32
    return %arg0, %c0_i32 : i32, i32
  }
  func.func @transform_1(%arg0: i32) -> (i32, i32) {
    %c0_i32 = arith.constant 0 : i32
    %c0_i32_0 = arith.constant 0 : i32
    %c0_i32_1 = arith.constant 0 : i32
    return %c0_i32, %c0_i32_0 : i32, i32
  }
  func.func @transform_2(%arg0: i32) -> (i32, i32) {
    %c0_i32 = arith.constant 0 : i32
    %c0_i32_0 = arith.constant 0 : i32
    %c0_i32_1 = arith.constant 0 : i32
    return %c0_i32, %c0_i32_0 : i32, i32
  }
  func.func @transform_3(%arg0: i32) -> (i32, i32) {
    %c0_i32 = arith.constant 0 : i32
    %c0_i32_0 = arith.constant 0 : i32
    %c0_i32_1 = arith.constant 0 : i32
    return %c0_i32, %c0_i32_0 : i32, i32
  }
  func.func @transform_4(%arg0: i32) -> (i32, i32) {
    %c0_i32 = arith.constant 0 : i32
    %c0_i32_0 = arith.constant 0 : i32
    %c0_i32_1 = arith.constant 0 : i32
    return %c0_i32, %c0_i32_0 : i32, i32
  }
  func.func @transform_5(%arg0: i32) -> (i32, i32) {
    %c0_i32 = arith.constant 0 : i32
    %c0_i32_0 = arith.constant 0 : i32
    return %arg0, %c0_i32 : i32, i32
  }
}

</mosaic_0001>

<bundles_post_ra>
// kernel: tpu_custom_call.1
= control target key start
LH: loop header
LB: loop body
LE: loop exit
PB: predicated region body
PF: predicated region fallthrough
CT: control target
= control target key end

     0   :  { %10 = vsyncpa [#allocation3], 0  ;;  %s8833_s0 = inlined_call_operand.hbm [shape: f32[4,6400], index: 0, kind: input, shape index: {}]   ;;  %s8834_s1 = inlined_call_operand.hbm [shape: bf16[6400,256], index: 1, kind: input, shape index: {}]   ;;  %s8835_s2 = inlined_call_operand.hbm [shape: f32[1,256], index: 2, kind: input, shape index: {}]   ;;  %s8836_s3 = inlined_call_operand.hbm [shape: f32[256,128], index: 3, kind: input, shape index: {}]   ;;  %s8837_s4 = inlined_call_operand.hbm [shape: f32[1,128], index: 4, kind: input, shape index: {}]   ;;  %s8838_s5 = inlined_call_operand.hbm [shape: f32[4,128], index: 5, kind: output, shape index: {}]  }
   0x1   :  { %11 = vsyncpa [#allocation6], 0 }
   0x2   :  { %12 = vsyncpa [#allocation9], 0 }
   0x3   :  { %13 = vsyncpa [#allocation4], 0 }
   0x4   :  { %18 = vsyncadd [#allocation3], 3200  ;;  %s8717_s18 = smov [#allocation5]   ;;  %s8577_s22 = scalar_lea.hbm %s8834_s1, 102400 }
   0x5   :  { %s31_s19 = sshll.u32 %s8717_s18, 4  ;;  %p8578_p0 = scmp.ne.s32.totalorder %s8834_s1, %s8577_s22  ;;  %s32_s19 = int_to_ptr.vmem [resolvable:$true] %s31_s19 }
   0x6   :  { %p8581_p1 = scmp.lt.u32.totalorder %s8577_s22, %s8834_s1 }
   0x8   :  { %p8583_p2 = pnand %p8581_p1, %p8578_p0 }
   0xa   :  { %8586 = shalt.err (!%p8583_p2)
}
   0xb   :  { %s8587_s27 = scalar_lea.vmem %s32_s19, 102400  ;;  %p8592_p4 = scmp.lt.s32.totalorder %s32_s19, %s32_s19 }
   0xc   :  { %p8588_p3 = scmp.ne.s32.totalorder %s32_s19, %s8587_s27  ;;  %p8593_p5 = scmp.lt.s32.totalorder %s8587_s27, %s8587_s27 }
   0xe   :  { %p8594_p6 = por %p8593_p5, %p8592_p4 }
  0x10   :  { %p8595_p7 = pnand %p8594_p6, %p8588_p3 }
  0x12   :  { %8598 = shalt.err (!%p8595_p7)
}
  0x13   :  { %s8718_s28 = smov 128   ;;  %s8719_s29 = smov 8  }
  0x14   :  { %37 = dma.hbm_to_vmem [thread:$0]  %s8834_s1, 102400, %s32_s19, [#allocation6], %s8718_s28, %s8718_s28, %s8719_s29  }
  0x15   :  { %s8720_s7 = smov [#allocation8]   ;;  %s8721_s9 = smov [#allocation2]  }
  0x16   :  { %s53_s8 = sshll.u32 %s8720_s7, 4  ;;  %s19_s10 = sshll.u32 %s8721_s9, 4  ;;  %s54_s8 = int_to_ptr.vmem [resolvable:$true] %s53_s8  ;;  %s20_s10 = int_to_ptr.vmem [resolvable:$true] %s19_s10 }
  0x17   :  { %s8599_s13 = scalar_lea.hbm %s8836_s3, 4096 }
  0x18   :  { %p8600_p8 = scmp.ne.s32.totalorder %s8836_s3, %s8599_s13  ;;  %p8603_p9 = scmp.lt.u32.totalorder %s8599_s13, %s8836_s3 }
  0x1a   :  { %p8605_p10 = pnand %p8603_p9, %p8600_p8 }
  0x1c   :  { %8608 = shalt.err (!%p8605_p10)
}
  0x1d   :  { %s8609_s1 = scalar_lea.vmem %s54_s8, 4096  ;;  %p8614_p12 = scmp.lt.s32.totalorder %s54_s8, %s54_s8 }
  0x1e   :  { %p8610_p11 = scmp.ne.s32.totalorder %s54_s8, %s8609_s1  ;;  %p8615_p13 = scmp.lt.s32.totalorder %s8609_s1, %s8609_s1 }
  0x20   :  { %p8616_p0 = por %p8615_p13, %p8614_p12 }
  0x22   :  { %p8617_p1 = pnand %p8616_p0, %p8610_p11 }
  0x24   :  { %8620 = shalt.err (!%p8617_p1)
}
  0x25   :  { %59 = dma.hbm_to_vmem [thread:$0]  %s8836_s3, 4096, %s54_s8, [#allocation9], %s8718_s28, %s8718_s28, %s8719_s29  }
  0x26   :  { %s8621_s22 = scalar_lea.hbm %s8833_s0, 3200 }
  0x27   :  { %p8622_p2 = scmp.ne.s32.totalorder %s8833_s0, %s8621_s22  ;;  %p8625_p3 = scmp.lt.u32.totalorder %s8621_s22, %s8833_s0 }
  0x29   :  { %p8627_p4 = pnand %p8625_p3, %p8622_p2 }
  0x2b   :  { %8630 = shalt.err (!%p8627_p4)
}
  0x2c   :  { %s8631_s27 = scalar_lea.vmem %s20_s10, 3200  ;;  %s8635_s30 = scalar_lea.vmem %s20_s10, 6400 }
  0x2d   :  { %p8632_p5 = scmp.ne.s32.totalorder %s20_s10, %s8631_s27  ;;  %p8636_p6 = scmp.lt.s32.totalorder %s20_s10, %s20_s10 }
  0x2e   :  { %p8637_p7 = scmp.lt.s32.totalorder %s8635_s30, %s8631_s27 }
  0x30   :  { %p8638_p8 = por %p8637_p7, %p8636_p6 }
  0x32   :  { %p8639_p9 = pnand %p8638_p8, %p8632_p5 }
  0x34   :  { %8642 = shalt.err (!%p8639_p9)
}
  0x35   :  { %s8722_s3 = smov 3200   ;;  %s8723_s28 = smov 200  }
  0x36   :  { %25 = dma.hbm_to_vmem [thread:$0]  %s8833_s0, 3200, %s20_s10, [#allocation3], %s8722_s3, %s8722_s3, %s8723_s28  }
  0x37   :  { %s8724_s7 = smov [#allocation7]   ;;  %s8725_s9 = smov [#allocation10]  }
  0x38   :  { %s44_s8 = sshll.u32 %s8724_s7, 4  ;;  %s66_s11 = sshll.u32 %s8725_s9, 4  ;;  %s45_s8 = int_to_ptr.vmem [resolvable:$true] %s44_s8  ;;  %s67_s11 = int_to_ptr.vmem [resolvable:$true] %s66_s11 }
  0x39   :  { %s8643_s14 = scalar_lea.hbm %s8835_s2, 32 }
  0x3a   :  { %p8644_p10 = scmp.ne.s32.totalorder %s8835_s2, %s8643_s14  ;;  %p8647_p11 = scmp.lt.u32.totalorder %s8643_s14, %s8835_s2 }
  0x3c   :  { %p8649_p12 = pnand %p8647_p11, %p8644_p10 }
  0x3e   :  { %8652 = shalt.err (!%p8649_p12)
}
  0x3f   :  { %s8653_s0 = scalar_lea.vmem %s45_s8, 32  ;;  %p8658_p0 = scmp.lt.s32.totalorder %s45_s8, %s45_s8 }
  0x40   :  { %p8654_p13 = scmp.ne.s32.totalorder %s45_s8, %s8653_s0  ;;  %p8659_p1 = scmp.lt.s32.totalorder %s8653_s0, %s8653_s0 }
  0x42   :  { %p8660_p2 = por %p8659_p1, %p8658_p0 }
  0x44   :  { %p8661_p3 = pnand %p8660_p2, %p8654_p13 }
  0x46   :  { %8664 = shalt.err (!%p8661_p3)
}
  0x47   :  { %47 = dma.hbm_to_vmem [thread:$0]  %s8835_s2, 32, %s45_s8, [#allocation6]  }
  0x48   :  { %s8665_s21 = scalar_lea.hbm %s8837_s4, 16 }
  0x49   :  { %p8666_p4 = scmp.ne.s32.totalorder %s8837_s4, %s8665_s21  ;;  %p8669_p5 = scmp.lt.u32.totalorder %s8665_s21, %s8837_s4 }
  0x4b   :  { %p8671_p6 = pnand %p8669_p5, %p8666_p4 }
  0x4d   :  { %8674 = shalt.err (!%p8671_p6)
}
  0x4e   :  { %s8675_s26 = scalar_lea.vmem %s67_s11, 16  ;;  %s8679_s27 = scalar_lea.vmem %s67_s11, 32 }
  0x4f   :  { %p8676_p7 = scmp.ne.s32.totalorder %s67_s11, %s8675_s26  ;;  %p8680_p8 = scmp.lt.s32.totalorder %s67_s11, %s67_s11 }
  0x50   :  { %p8681_p9 = scmp.lt.s32.totalorder %s8679_s27, %s8675_s26 }
  0x52   :  { %p8682_p10 = por %p8681_p9, %p8680_p8 }
  0x54   :  { %p8683_p11 = pnand %p8682_p10, %p8676_p7 }
  0x56   :  { %8686 = shalt.err (!%p8683_p11)
}
  0x57   :  { %69 = dma.hbm_to_vmem [thread:$0]  %s8837_s4, 16, %s67_s11, [#allocation9]  }
  0x58   :  { %8709 = dma.done.wait [#allocation3], 6400  }
  0x59   :  { %8710 = vsyncadd [#allocation3], 4294960896 }
  0x5a   :  { %8711 = dma.done.wait [#allocation6], 102432  }
  0x5b   :  { %8712 = vsyncadd [#allocation6], 4294864864 }
  0x5c   :  { %8713 = dma.done.wait [#allocation9], 4112  }
  0x5d   :  { %8714 = vsyncadd [#allocation9], 4294963184  ;;  %v7298_v0 = vld [vmem:[#allocation5 + $0x4] ss:$8 sps:$4 sm:$0xff]   ;;  %v7302_v2 = vld [vmem:[#allocation5] ss:$8 sps:$4 sm:$0xff]  }
  0x5e   :  { %v7300_v1 = vld [vmem:[#allocation5 + $0xc04] ss:$8 sps:$4 sm:$0xff]   ;;  %5147 = vmatprep.subr.bf16.mxu1 %v7298_v0  ;;  %v7303_v3 = vld [vmem:[#allocation5 + $0xc00] ss:$8 sps:$4 sm:$0xff]   ;;  %v7304_v4 = vld [vmem:[#allocation5 + $0x14] ss:$8 sps:$4 sm:$0xff]  }
  0x5f   :  { %5639 = vmatprep.subr.bf16.mxu0 %v7300_v1  ;;  %5148 = vmatpush1.bf16.msra.mxu1 %v7302_v2  ;;  %v7306_v5 = vld [vmem:[#allocation5 + $0xc14] ss:$8 sps:$4 sm:$0xff]   ;;  %v7308_v6 = vld [vmem:[#allocation5 + $0x10] ss:$8 sps:$4 sm:$0xff]   ;;  %v7310_v8 = vld [vmem:[#allocation5 + $0x24] ss:$8 sps:$4 sm:$0xff]  }
  0x60   :  { %5640 = vmatpush1.bf16.msra.mxu0 %v7303_v3  ;;  %5149 = vmatprep.subr.bf16.mxu1 %v7304_v4  ;;  %v7309_v7 = vld [vmem:[#allocation5 + $0xc10] ss:$8 sps:$4 sm:$0xff]   ;;  %v7312_v9 = vld [vmem:[#allocation5 + $0xc24] ss:$8 sps:$4 sm:$0xff]   ;;  %v7314_v10 = vld [vmem:[#allocation5 + $0x20] ss:$8 sps:$4 sm:$0xff]  }
  0x61   :  { %5641 = vmatprep.subr.bf16.mxu0 %v7306_v5  ;;  %v7315_v11 = vld [vmem:[#allocation5 + $0xc20] ss:$8 sps:$4 sm:$0xff]   ;;  %v7316_v12 = vld [vmem:[#allocation5 + $0x34] ss:$8 sps:$4 sm:$0xff]   ;;  %v7320_v14 = vld [vmem:[#allocation5 + $0x30] ss:$8 sps:$4 sm:$0xff]  }
  0x62   :  { %v7318_v13 = vld [vmem:[#allocation5 + $0xc34] ss:$8 sps:$4 sm:$0xff]   ;;  %v7321_v15 = vld [vmem:[#allocation5 + $0xc30] ss:$8 sps:$4 sm:$0xff]   ;;  %v7322_v16 = vld [vmem:[#allocation5 + $0x44] ss:$8 sps:$4 sm:$0xff]  }
  0x63   :  { %5150 = vmatpush1.bf16.msra.mxu1 %v7308_v6  ;;  %v7324_v17 = vld [vmem:[#allocation5 + $0xc44] ss:$8 sps:$4 sm:$0xff]   ;;  %v7326_v18 = vld [vmem:[#allocation5 + $0x40] ss:$8 sps:$4 sm:$0xff]   ;;  %v7328_v20 = vld [vmem:[#allocation5 + $0x54] ss:$8 sps:$4 sm:$0xff]  }
  0x64   :  { %5642 = vmatpush1.bf16.msra.mxu0 %v7309_v7  ;;  %5151 = vmatprep.subr.bf16.mxu1 %v7310_v8  ;;  %v7327_v19 = vld [vmem:[#allocation5 + $0xc40] ss:$8 sps:$4 sm:$0xff]   ;;  %v7330_v21 = vld [vmem:[#allocation5 + $0xc54] ss:$8 sps:$4 sm:$0xff]   ;;  %v7332_v22 = vld [vmem:[#allocation5 + $0x50] ss:$8 sps:$4 sm:$0xff]  }
  0x65   :  { %5643 = vmatprep.subr.bf16.mxu0 %v7312_v9  ;;  %v7333_v23 = vld [vmem:[#allocation5 + $0xc50] ss:$8 sps:$4 sm:$0xff]   ;;  %v7334_v24 = vld [vmem:[#allocation5 + $0x64] ss:$8 sps:$4 sm:$0xff]   ;;  %v7338_v26 = vld [vmem:[#allocation5 + $0x60] ss:$8 sps:$4 sm:$0xff]  }
  0x66   :  { %v7336_v25 = vld [vmem:[#allocation5 + $0xc64] ss:$8 sps:$4 sm:$0xff]   ;;  %v7339_v27 = vld [vmem:[#allocation5 + $0xc60] ss:$8 sps:$4 sm:$0xff]   ;;  %v7340_v28 = vld [vmem:[#allocation5 + $0x74] ss:$8 sps:$4 sm:$0xff]  }
  0x67   :  { %5152 = vmatpush1.bf16.msra.mxu1 %v7314_v10  ;;  %v7342_v29 = vld [vmem:[#allocation5 + $0xc74] ss:$8 sps:$4 sm:$0xff]   ;;  %v7344_v30 = vld [vmem:[#allocation5 + $0x70] ss:$8 sps:$4 sm:$0xff]   ;;  %v7346_v32 = vld [vmem:[#allocation5 + $0x84] ss:$8 sps:$4 sm:$0xff]  }
  0x68   :  { %5644 = vmatpush1.bf16.msra.mxu0 %v7315_v11  ;;  %5153 = vmatprep.subr.bf16.mxu1 %v7316_v12  ;;  %v7345_v31 = vld [vmem:[#allocation5 + $0xc70] ss:$8 sps:$4 sm:$0xff]   ;;  %v7348_v33 = vld [vmem:[#allocation5 + $0xc84] ss:$8 sps:$4 sm:$0xff]   ;;  %v7350_v34 = vld [vmem:[#allocation5 + $0x80] ss:$8 sps:$4 sm:$0xff]  }
  0x69   :  { %5645 = vmatprep.subr.bf16.mxu0 %v7318_v13  ;;  %v7351_v35 = vld [vmem:[#allocation5 + $0xc80] ss:$8 sps:$4 sm:$0xff]   ;;  %v7352_v36 = vld [vmem:[#allocation5 + $0x94] ss:$8 sps:$4 sm:$0xff]   ;;  %v7356_v38 = vld [vmem:[#allocation5 + $0x90] ss:$8 sps:$4 sm:$0xff]  }
  0x6a   :  { %v7354_v37 = vld [vmem:[#allocation5 + $0xc94] ss:$8 sps:$4 sm:$0xff]   ;;  %v7357_v39 = vld [vmem:[#allocation5 + $0xc90] ss:$8 sps:$4 sm:$0xff]   ;;  %v7358_v40 = vld [vmem:[#allocation5 + $0xa4] ss:$8 sps:$4 sm:$0xff]  }
  0x6b   :  { %5154 = vmatpush1.bf16.msra.mxu1 %v7320_v14  ;;  %v7360_v41 = vld [vmem:[#allocation5 + $0xca4] ss:$8 sps:$4 sm:$0xff]   ;;  %v7362_v42 = vld [vmem:[#allocation5 + $0xa0] ss:$8 sps:$4 sm:$0xff]   ;;  %v7364_v44 = vld [vmem:[#allocation5 + $0xb4] ss:$8 sps:$4 sm:$0xff]  }
  0x6c   :  { %5646 = vmatpush1.bf16.msra.mxu0 %v7321_v15  ;;  %5155 = vmatprep.subr.bf16.mxu1 %v7322_v16  ;;  %v7363_v43 = vld [vmem:[#allocation5 + $0xca0] ss:$8 sps:$4 sm:$0xff]   ;;  %v7366_v45 = vld [vmem:[#allocation5 + $0xcb4] ss:$8 sps:$4 sm:$0xff]   ;;  %v7368_v46 = vld [vmem:[#allocation5 + $0xb0] ss:$8 sps:$4 sm:$0xff]  }
  0x6d   :  { %5647 = vmatprep.subr.bf16.mxu0 %v7324_v17  ;;  %v7369_v47 = vld [vmem:[#allocation5 + $0xcb0] ss:$8 sps:$4 sm:$0xff]   ;;  %v7396_v48 = vld [vmem:[#allocation2 + $0x4] ss:$200 sps:$4 sm:$0xff]   ;;  %v7370_v49 = vld [vmem:[#allocation5 + $0xc4] ss:$8 sps:$4 sm:$0xff]  }
  0x6e   :  { %v7372_v50 = vld [vmem:[#allocation5 + $0xcc4] ss:$8 sps:$4 sm:$0xff]   ;;  %v286_v51 = vpack.c.bf16 %v7396_v48, %v7396_v48  ;;  %v7402_v52 = vld [vmem:[#allocation2 + $0x64] ss:$200 sps:$4 sm:$0xff]   ;;  %v7374_v53 = vld [vmem:[#allocation5 + $0xc0] ss:$8 sps:$4 sm:$0xff]  }
  0x6f   :  { %5156 = vmatpush1.bf16.msra.mxu1 %v7326_v18  ;;  %v7375_v54 = vld [vmem:[#allocation5 + $0xcc0] ss:$8 sps:$4 sm:$0xff]   ;;  %v7376_v55 = vld [vmem:[#allocation5 + $0xd4] ss:$8 sps:$4 sm:$0xff]   ;;  %v310_v56 = vpack.c.bf16 %v7402_v52, %v7402_v52  ;;  %v7380_v58 = vld [vmem:[#allocation5 + $0xd0] ss:$8 sps:$4 sm:$0xff]  }
  0x70   :  { %5648 = vmatpush1.bf16.msra.mxu0 %v7327_v19  ;;  %5157 = vmatprep.subr.bf16.mxu1 %v7328_v20  ;;  %v7378_v57 = vld [vmem:[#allocation5 + $0xcd4] ss:$8 sps:$4 sm:$0xff]   ;;  %v7381_v59 = vld [vmem:[#allocation5 + $0xcd0] ss:$8 sps:$4 sm:$0xff]   ;;  %v7382_v60 = vld [vmem:[#allocation5 + $0xe4] ss:$8 sps:$4 sm:$0xff]  }
  0x71   :  { %5649 = vmatprep.subr.bf16.mxu0 %v7330_v21  ;;  %5179 = vmatprep.mubr.bf16.mxu1 %v286_v51  ;;  %v7384_v61 = vld [vmem:[#allocation5 + $0xce4] ss:$8 sps:$4 sm:$0xff]   ;;  %v7386_v62 = vld [vmem:[#allocation5 + $0xe0] ss:$8 sps:$4 sm:$0xff]   ;;  %v7388_v0 = vld [vmem:[#allocation5 + $0xf4] ss:$8 sps:$4 sm:$0xff]  }
  0x72   :  { %5671 = vmatprep.mubr.bf16.mxu0 %v310_v56  ;;  %v7387_v63 = vld [vmem:[#allocation5 + $0xce0] ss:$8 sps:$4 sm:$0xff]   ;;  %v7390_v1 = vld [vmem:[#allocation5 + $0xcf4] ss:$8 sps:$4 sm:$0xff]   ;;  %v7392_v2 = vld [vmem:[#allocation5 + $0xf0] ss:$8 sps:$4 sm:$0xff]  }
  0x73   :  { %5158 = vmatpush1.bf16.msra.mxu1 %v7332_v22  ;;  %v7393_v3 = vld [vmem:[#allocation5 + $0xcf0] ss:$8 sps:$4 sm:$0xff]   ;;  %v7399_v6 = vld [vmem:[#allocation5 + $0x104] ss:$8 sps:$4 sm:$0xff]   ;;  %v7397_v9 = vld [vmem:[#allocation5 + $0x100] ss:$8 sps:$4 sm:$0xff]  }
  0x74   :  { %5650 = vmatpush1.bf16.msra.mxu0 %v7333_v23  ;;  %5159 = vmatprep.subr.bf16.mxu1 %v7334_v24  ;;  %v7394_v4 = vld [vmem:[#allocation2] ss:$200 sps:$4 sm:$0xff]   ;;  %v7405_v7 = vld [vmem:[#allocation5 + $0xd04] ss:$8 sps:$4 sm:$0xff]   ;;  %v7403_v11 = vld [vmem:[#allocation5 + $0xd00] ss:$8 sps:$4 sm:$0xff]  }
  0x75   :  { %5651 = vmatprep.subr.bf16.mxu0 %v7336_v25  ;;  %v7400_v5 = vld [vmem:[#allocation2 + $0x60] ss:$200 sps:$4 sm:$0xff]   ;;  %v285_v8 = vpack.c.bf16 %v7394_v4, %v7394_v4  ;;  %v7408_v12 = vld [vmem:[#allocation5 + $0x114] ss:$8 sps:$4 sm:$0xff]   ;;  %v7414_v16 = vld [vmem:[#allocation5 + $0x124] ss:$8 sps:$4 sm:$0xff]  }
  0x76   :  { %v309_v10 = vpack.c.bf16 %v7400_v5, %v7400_v5  ;;  %v7411_v13 = vld [vmem:[#allocation5 + $0xd14] ss:$8 sps:$4 sm:$0xff]   ;;  %v7406_v14 = vld [vmem:[#allocation5 + $0x110] ss:$8 sps:$4 sm:$0xff]   ;;  %v7417_v17 = vld [vmem:[#allocation5 + $0xd24] ss:$8 sps:$4 sm:$0xff]  }
  0x77   :  { %5160 = vmatpush1.bf16.msra.mxu1 %v7338_v26  ;;  %v7409_v15 = vld [vmem:[#allocation5 + $0xd10] ss:$8 sps:$4 sm:$0xff]   ;;  %v7412_v18 = vld [vmem:[#allocation5 + $0x120] ss:$8 sps:$4 sm:$0xff]   ;;  %v7420_v20 = vld [vmem:[#allocation5 + $0x134] ss:$8 sps:$4 sm:$0xff]  }
  0x78   :  { %5652 = vmatpush1.bf16.msra.mxu0 %v7339_v27  ;;  %5161 = vmatprep.subr.bf16.mxu1 %v7340_v28  ;;  %v7415_v19 = vld [vmem:[#allocation5 + $0xd20] ss:$8 sps:$4 sm:$0xff]   ;;  %v7423_v21 = vld [vmem:[#allocation5 + $0xd34] ss:$8 sps:$4 sm:$0xff]   ;;  %v7418_v22 = vld [vmem:[#allocation5 + $0x130] ss:$8 sps:$4 sm:$0xff]  }
  0x79   :  { %5653 = vmatprep.subr.bf16.mxu0 %v7342_v29  ;;  %v7421_v23 = vld [vmem:[#allocation5 + $0xd30] ss:$8 sps:$4 sm:$0xff]   ;;  %v7426_v24 = vld [vmem:[#allocation5 + $0x144] ss:$8 sps:$4 sm:$0xff]   ;;  %v7424_v26 = vld [vmem:[#allocation5 + $0x140] ss:$8 sps:$4 sm:$0xff]  }
  0x7a   :  { %v7429_v25 = vld [vmem:[#allocation5 + $0xd44] ss:$8 sps:$4 sm:$0xff]   ;;  %v7427_v27 = vld [vmem:[#allocation5 + $0xd40] ss:$8 sps:$4 sm:$0xff]   ;;  %v7432_v28 = vld [vmem:[#allocation5 + $0x154] ss:$8 sps:$4 sm:$0xff]  }
  0x7b   :  { %5162 = vmatpush1.bf16.msra.mxu1 %v7344_v30  ;;  %v7435_v29 = vld [vmem:[#allocation5 + $0xd54] ss:$8 sps:$4 sm:$0xff]   ;;  %v7430_v30 = vld [vmem:[#allocation5 + $0x150] ss:$8 sps:$4 sm:$0xff]   ;;  %v7462_v52 = vld [vmem:[#allocation5 + $0x1a4] ss:$8 sps:$4 sm:$0xff]  }
  0x7c   :  { %5654 = vmatpush1.bf16.msra.mxu0 %v7345_v31  ;;  %5163 = vmatprep.subr.bf16.mxu1 %v7346_v32  ;;  %v7433_v31 = vld [vmem:[#allocation5 + $0xd50] ss:$8 sps:$4 sm:$0xff]   ;;  %v7438_v32 = vld [vmem:[#allocation5 + $0x164] ss:$8 sps:$4 sm:$0xff]   ;;  %v7456_v48 = vld [vmem:[#allocation5 + $0x194] ss:$8 sps:$4 sm:$0xff]  }
  0x7d   :  { %5655 = vmatprep.subr.bf16.mxu0 %v7348_v33  ;;  %v7441_v33 = vld [vmem:[#allocation5 + $0xd64] ss:$8 sps:$4 sm:$0xff]   ;;  %v7457_v51 = vld [vmem:[#allocation5 + $0xd90] ss:$8 sps:$4 sm:$0xff]   ;;  %v7468_v56 = vld [vmem:[#allocation5 + $0x1b4] ss:$8 sps:$4 sm:$0xff]  }
  0x7e   :  { %v7486_v4 = vld [vmem:[#allocation5 + $0x1e4] ss:$8 sps:$4 sm:$0xff]  }
  0x7f   :  { %5164 = vmatpush1.bf16.msra.mxu1 %v7350_v34  ;;  %v7436_v34 = vld [vmem:[#allocation5 + $0x160] ss:$8 sps:$4 sm:$0xff]   ;;  %v7489_v5 = vld [vmem:[#allocation5 + $0xde4] ss:$8 sps:$4 sm:$0xff]  }
  0x80   :  { %5656 = vmatpush1.bf16.msra.mxu0 %v7351_v35  ;;  %5165 = vmatprep.subr.bf16.mxu1 %v7352_v36  ;;  %v7439_v35 = vld [vmem:[#allocation5 + $0xd60] ss:$8 sps:$4 sm:$0xff]   ;;  %v7444_v36 = vld [vmem:[#allocation5 + $0x174] ss:$8 sps:$4 sm:$0xff]  }
  0x81   :  { %5657 = vmatprep.subr.bf16.mxu0 %v7354_v37  ;;  %v7447_v37 = vld [vmem:[#allocation5 + $0xd74] ss:$8 sps:$4 sm:$0xff]  }
  0x83   :  { %5166 = vmatpush1.bf16.msra.mxu1 %v7356_v38  ;;  %v7498_v38 = vld [vmem:[#allocation2 + $0xc] ss:$200 sps:$4 sm:$0xff]  }
  0x84   :  { %5658 = vmatpush1.bf16.msra.mxu0 %v7357_v39  ;;  %5167 = vmatprep.subr.bf16.mxu1 %v7358_v40  ;;  %v7442_v39 = vld [vmem:[#allocation5 + $0x170] ss:$8 sps:$4 sm:$0xff]  }
  0x85   :  { %5659 = vmatprep.subr.bf16.mxu0 %v7360_v41  ;;  %v7445_v40 = vld [vmem:[#allocation5 + $0xd70] ss:$8 sps:$4 sm:$0xff]   ;;  %v288_v41 = vpack.c.bf16 %v7498_v38, %v7498_v38  ;;  %v7526_v38 = vld [vmem:[#allocation5 + $0x240] ss:$8 sps:$4 sm:$0xff]  }
  0x87   :  { %5168 = vmatpush1.bf16.msra.mxu1 %v7362_v42  ;;  %v7504_v42 = vld [vmem:[#allocation2 + $0x6c] ss:$200 sps:$4 sm:$0xff]  }
  0x88   :  { %5660 = vmatpush1.bf16.msra.mxu0 %v7363_v43  ;;  %5169 = vmatprep.subr.bf16.mxu1 %v7364_v44  ;;  %v7450_v43 = vld [vmem:[#allocation5 + $0x184] ss:$8 sps:$4 sm:$0xff]  }
  0x89   :  { %5661 = vmatprep.subr.bf16.mxu0 %v7366_v45  ;;  %v7453_v44 = vld [vmem:[#allocation5 + $0xd84] ss:$8 sps:$4 sm:$0xff]   ;;  %v312_v45 = vpack.c.bf16 %v7504_v42, %v7504_v42  ;;  %v7532_v42 = vld [vmem:[#allocation5 + $0x250] ss:$8 sps:$4 sm:$0xff]  }
  0x8b   :  { %5170 = vmatpush1.bf16.msra.mxu1 %v7368_v46  ;;  %v7448_v46 = vld [vmem:[#allocation5 + $0x180] ss:$8 sps:$4 sm:$0xff]  }
  0x8c   :  { %5662 = vmatpush1.bf16.msra.mxu0 %v7369_v47  ;;  %5171 = vmatprep.subr.bf16.mxu1 %v7370_v49  ;;  %v7451_v47 = vld [vmem:[#allocation5 + $0xd80] ss:$8 sps:$4 sm:$0xff]   ;;  %v7459_v49 = vld [vmem:[#allocation5 + $0xd94] ss:$8 sps:$4 sm:$0xff]  }
  0x8d   :  { %5663 = vmatprep.subr.bf16.mxu0 %v7372_v50  ;;  %v7454_v50 = vld [vmem:[#allocation5 + $0x190] ss:$8 sps:$4 sm:$0xff]  }
  0x8f   :  { %5172 = vmatpush1.bf16.msra.mxu1 %v7374_v53  ;;  %v7465_v53 = vld [vmem:[#allocation5 + $0xda4] ss:$8 sps:$4 sm:$0xff]  }
  0x90   :  { %5664 = vmatpush1.bf16.msra.mxu0 %v7375_v54  ;;  %5173 = vmatprep.subr.bf16.mxu1 %v7376_v55  ;;  %v7460_v54 = vld [vmem:[#allocation5 + $0x1a0] ss:$8 sps:$4 sm:$0xff]  }
  0x91   :  { %5665 = vmatprep.subr.bf16.mxu0 %v7378_v57  ;;  %v7463_v55 = vld [vmem:[#allocation5 + $0xda0] ss:$8 sps:$4 sm:$0xff]   ;;  %v7471_v57 = vld [vmem:[#allocation5 + $0xdb4] ss:$8 sps:$4 sm:$0xff]  }
  0x93   :  { %5174 = vmatpush1.bf16.msra.mxu1 %v7380_v58  ;;  %v7466_v58 = vld [vmem:[#allocation5 + $0x1b0] ss:$8 sps:$4 sm:$0xff]  }
  0x94   :  { %5666 = vmatpush1.bf16.msra.mxu0 %v7381_v59  ;;  %5175 = vmatprep.subr.bf16.mxu1 %v7382_v60  ;;  %v7469_v59 = vld [vmem:[#allocation5 + $0xdb0] ss:$8 sps:$4 sm:$0xff]   ;;  %v7474_v60 = vld [vmem:[#allocation5 + $0x1c4] ss:$8 sps:$4 sm:$0xff]  }
  0x95   :  { %5667 = vmatprep.subr.bf16.mxu0 %v7384_v61  ;;  %v7477_v61 = vld [vmem:[#allocation5 + $0xdc4] ss:$8 sps:$4 sm:$0xff]  }
  0x97   :  { %5176 = vmatpush1.bf16.msra.mxu1 %v7386_v62  ;;  %v7472_v62 = vld [vmem:[#allocation5 + $0x1c0] ss:$8 sps:$4 sm:$0xff]  }
  0x98   :  { %5668 = vmatpush1.bf16.msra.mxu0 %v7387_v63  ;;  %5177 = vmatprep.subr.bf16.mxu1 %v7388_v0  ;;  %v7475_v63 = vld [vmem:[#allocation5 + $0xdc0] ss:$8 sps:$4 sm:$0xff]   ;;  %v7480_v0 = vld [vmem:[#allocation5 + $0x1d4] ss:$8 sps:$4 sm:$0xff]  }
  0x99   :  { %5669 = vmatprep.subr.bf16.mxu0 %v7390_v1  ;;  %v7483_v1 = vld [vmem:[#allocation5 + $0xdd4] ss:$8 sps:$4 sm:$0xff]  }
  0x9b   :  { %5178 = vmatpush1.bf16.msra.mxu1 %v7392_v2  ;;  %v7478_v2 = vld [vmem:[#allocation5 + $0x1d0] ss:$8 sps:$4 sm:$0xff]  }
  0x9c   :  { %5670 = vmatpush1.bf16.msra.mxu0 %v7393_v3  ;;  %5188 = vmatprep.subr.bf16.mxu1 %v7399_v6  ;;  %v7481_v3 = vld [vmem:[#allocation5 + $0xdd0] ss:$8 sps:$4 sm:$0xff]   ;;  %v7484_v6 = vld [vmem:[#allocation5 + $0x1e0] ss:$8 sps:$4 sm:$0xff]  }
  0x9d   :  { %5680 = vmatprep.subr.bf16.mxu0 %v7405_v7  ;;  %v7487_v7 = vld [vmem:[#allocation5 + $0xde0] ss:$8 sps:$4 sm:$0xff]  }
  0x9e   :  { %5180 = vmatmul.mubr.bf16.vlgmr.msra.gmra.mrb[0].mxu1 %v285_v8  ;;  %v7492_v8 = vld [vmem:[#allocation5 + $0x1f4] ss:$8 sps:$4 sm:$0xff]  }
  0x9f   :  { %5672 = vmatmul.mubr.bf16.vlgmr.msra.gmra.mrb[0].mxu0 %v309_v10  ;;  %5189 = vmatpush1.bf16.msra.mxu1 %v7397_v9  ;;  %v7495_v9 = vld [vmem:[#allocation5 + $0xdf4] ss:$8 sps:$4 sm:$0xff]   ;;  %v7490_v10 = vld [vmem:[#allocation5 + $0x1f0] ss:$8 sps:$4 sm:$0xff]  }
  0xa0   :  { %5681 = vmatpush1.bf16.msra.mxu0 %v7403_v11  ;;  %5190 = vmatprep.subr.bf16.mxu1 %v7408_v12  ;;  %v7493_v11 = vld [vmem:[#allocation5 + $0xdf0] ss:$8 sps:$4 sm:$0xff]  }
  0xa1   :  { %5682 = vmatprep.subr.bf16.mxu0 %v7411_v13  ;;  %5220 = vmatprep.mubr.bf16.mxu1 %v288_v41  ;;  %v7496_v12 = vld [vmem:[#allocation2 + $0x8] ss:$200 sps:$4 sm:$0xff]   ;;  %v7537_v41 = vld [vmem:[#allocation5 + $0xe54] ss:$8 sps:$4 sm:$0xff]  }
  0xa2   :  { %5712 = vmatprep.mubr.bf16.mxu0 %v312_v45  ;;  %v7502_v13 = vld [vmem:[#allocation2 + $0x68] ss:$200 sps:$4 sm:$0xff]   ;;  %v7543_v45 = vld [vmem:[#allocation5 + $0xe64] ss:$8 sps:$4 sm:$0xff]  }
  0xa3   :  { %5191 = vmatpush1.bf16.msra.mxu1 %v7406_v14  ;;  %v7501_v14 = vld [vmem:[#allocation5 + $0x204] ss:$8 sps:$4 sm:$0xff]  }
  0xa4   :  { %5683 = vmatpush1.bf16.msra.mxu0 %v7409_v15  ;;  %5192 = vmatprep.subr.bf16.mxu1 %v7414_v16  ;;  %v7507_v15 = vld [vmem:[#allocation5 + $0xe04] ss:$8 sps:$4 sm:$0xff]   ;;  %v287_v16 = vpack.c.bf16 %v7496_v12, %v7496_v12 }
  0xa5   :  { %5684 = vmatprep.subr.bf16.mxu0 %v7417_v17  ;;  %v7499_v17 = vld [vmem:[#allocation5 + $0x200] ss:$8 sps:$4 sm:$0xff]   ;;  %v7588_v12 = vld [vmem:[#allocation5 + $0x2e4] ss:$8 sps:$4 sm:$0xff]  }
  0xa7   :  { %5193 = vmatpush1.bf16.msra.mxu1 %v7412_v18  ;;  %v311_v18 = vpack.c.bf16 %v7502_v13, %v7502_v13  ;;  %v7591_v13 = vld [vmem:[#allocation5 + $0xee4] ss:$8 sps:$4 sm:$0xff]  }
  0xa8   :  { %5685 = vmatpush1.bf16.msra.mxu0 %v7415_v19  ;;  %5194 = vmatprep.subr.bf16.mxu1 %v7420_v20  ;;  %v7505_v19 = vld [vmem:[#allocation5 + $0xe00] ss:$8 sps:$4 sm:$0xff]   ;;  %v7510_v20 = vld [vmem:[#allocation5 + $0x214] ss:$8 sps:$4 sm:$0xff]  }
  0xa9   :  { %5686 = vmatprep.subr.bf16.mxu0 %v7423_v21  ;;  %v7513_v21 = vld [vmem:[#allocation5 + $0xe14] ss:$8 sps:$4 sm:$0xff]  }
  0xab   :  { %5195 = vmatpush1.bf16.msra.mxu1 %v7418_v22  ;;  %v7508_v22 = vld [vmem:[#allocation5 + $0x210] ss:$8 sps:$4 sm:$0xff]  }
  0xac   :  { %5687 = vmatpush1.bf16.msra.mxu0 %v7421_v23  ;;  %5196 = vmatprep.subr.bf16.mxu1 %v7426_v24  ;;  %v7511_v23 = vld [vmem:[#allocation5 + $0xe10] ss:$8 sps:$4 sm:$0xff]   ;;  %v7516_v24 = vld [vmem:[#allocation5 + $0x224] ss:$8 sps:$4 sm:$0xff]  }
  0xad   :  { %5688 = vmatprep.subr.bf16.mxu0 %v7429_v25  ;;  %v7519_v25 = vld [vmem:[#allocation5 + $0xe24] ss:$8 sps:$4 sm:$0xff]  }
  0xaf   :  { %5197 = vmatpush1.bf16.msra.mxu1 %v7424_v26  ;;  %v7514_v26 = vld [vmem:[#allocation5 + $0x220] ss:$8 sps:$4 sm:$0xff]  }
  0xb0   :  { %5689 = vmatpush1.bf16.msra.mxu0 %v7427_v27  ;;  %5198 = vmatprep.subr.bf16.mxu1 %v7432_v28  ;;  %v7600_v27 = vld [vmem:[#allocation2 + $0x14] ss:$200 sps:$4 sm:$0xff]   ;;  %v7517_v28 = vld [vmem:[#allocation5 + $0xe20] ss:$8 sps:$4 sm:$0xff]  }
  0xb1   :  { %5690 = vmatprep.subr.bf16.mxu0 %v7435_v29  ;;  %v7522_v29 = vld [vmem:[#allocation5 + $0x234] ss:$8 sps:$4 sm:$0xff]  }
  0xb3   :  { %5199 = vmatpush1.bf16.msra.mxu1 %v7430_v30  ;;  %v7525_v30 = vld [vmem:[#allocation5 + $0xe34] ss:$8 sps:$4 sm:$0xff]  }
  0xb4   :  { %5691 = vmatpush1.bf16.msra.mxu0 %v7433_v31  ;;  %5200 = vmatprep.subr.bf16.mxu1 %v7438_v32  ;;  %v290_v31 = vpack.c.bf16 %v7600_v27, %v7600_v27  ;;  %v7606_v32 = vld [vmem:[#allocation2 + $0x74] ss:$200 sps:$4 sm:$0xff]   ;;  %v7601_v27 = vld [vmem:[#allocation5 + $0x300] ss:$8 sps:$4 sm:$0xff]  }
  0xb5   :  { %5692 = vmatprep.subr.bf16.mxu0 %v7441_v33  ;;  %v7520_v33 = vld [vmem:[#allocation5 + $0x230] ss:$8 sps:$4 sm:$0xff]  }
  0xb7   :  { %5201 = vmatpush1.bf16.msra.mxu1 %v7436_v34  ;;  %v7523_v34 = vld [vmem:[#allocation5 + $0xe30] ss:$8 sps:$4 sm:$0xff]  }
  0xb8   :  { %5693 = vmatpush1.bf16.msra.mxu0 %v7439_v35  ;;  %5202 = vmatprep.subr.bf16.mxu1 %v7444_v36  ;;  %v314_v35 = vpack.c.bf16 %v7606_v32, %v7606_v32  ;;  %v7528_v36 = vld [vmem:[#allocation5 + $0x244] ss:$8 sps:$4 sm:$0xff]  }
  0xb9   :  { %5694 = vmatprep.subr.bf16.mxu0 %v7447_v37  ;;  %v7531_v37 = vld [vmem:[#allocation5 + $0xe44] ss:$8 sps:$4 sm:$0xff]  }
  0xbb   :  { %5203 = vmatpush1.bf16.msra.mxu1 %v7442_v39  ;;  %v7529_v39 = vld [vmem:[#allocation5 + $0xe40] ss:$8 sps:$4 sm:$0xff]  }
  0xbc   :  { %5695 = vmatpush1.bf16.msra.mxu0 %v7445_v40  ;;  %5204 = vmatprep.subr.bf16.mxu1 %v7450_v43  ;;  %v7534_v40 = vld [vmem:[#allocation5 + $0x254] ss:$8 sps:$4 sm:$0xff]   ;;  %v7535_v43 = vld [vmem:[#allocation5 + $0xe50] ss:$8 sps:$4 sm:$0xff]  }
  0xbd   :  { %5696 = vmatprep.subr.bf16.mxu0 %v7453_v44  ;;  %v7540_v44 = vld [vmem:[#allocation5 + $0x264] ss:$8 sps:$4 sm:$0xff]  }
  0xbf   :  { %5205 = vmatpush1.bf16.msra.mxu1 %v7448_v46  ;;  %v7538_v46 = vld [vmem:[#allocation5 + $0x260] ss:$8 sps:$4 sm:$0xff]  }
  0xc0   :  { %5697 = vmatpush1.bf16.msra.mxu0 %v7451_v47  ;;  %5206 = vmatprep.subr.bf16.mxu1 %v7456_v48  ;;  %v7541_v47 = vld [vmem:[#allocation5 + $0xe60] ss:$8 sps:$4 sm:$0xff]   ;;  %v7546_v48 = vld [vmem:[#allocation5 + $0x274] ss:$8 sps:$4 sm:$0xff]  }
  0xc1   :  { %5698 = vmatprep.subr.bf16.mxu0 %v7459_v49  ;;  %v7549_v49 = vld [vmem:[#allocation5 + $0xe74] ss:$8 sps:$4 sm:$0xff]  }
  0xc3   :  { %5207 = vmatpush1.bf16.msra.mxu1 %v7454_v50  ;;  %v7544_v50 = vld [vmem:[#allocation5 + $0x270] ss:$8 sps:$4 sm:$0xff]  }
  0xc4   :  { %5699 = vmatpush1.bf16.msra.mxu0 %v7457_v51  ;;  %5208 = vmatprep.subr.bf16.mxu1 %v7462_v52  ;;  %v7547_v51 = vld [vmem:[#allocation5 + $0xe70] ss:$8 sps:$4 sm:$0xff]   ;;  %v7552_v52 = vld [vmem:[#allocation5 + $0x284] ss:$8 sps:$4 sm:$0xff]  }
  0xc5   :  { %5700 = vmatprep.subr.bf16.mxu0 %v7465_v53  ;;  %v7555_v53 = vld [vmem:[#allocation5 + $0xe84] ss:$8 sps:$4 sm:$0xff]  }
  0xc7   :  { %5209 = vmatpush1.bf16.msra.mxu1 %v7460_v54  ;;  %v7550_v54 = vld [vmem:[#allocation5 + $0x280] ss:$8 sps:$4 sm:$0xff]  }
  0xc8   :  { %5701 = vmatpush1.bf16.msra.mxu0 %v7463_v55  ;;  %5210 = vmatprep.subr.bf16.mxu1 %v7468_v56  ;;  %v7553_v55 = vld [vmem:[#allocation5 + $0xe80] ss:$8 sps:$4 sm:$0xff]   ;;  %v7558_v56 = vld [vmem:[#allocation5 + $0x294] ss:$8 sps:$4 sm:$0xff]  }
  0xc9   :  { %5702 = vmatprep.subr.bf16.mxu0 %v7471_v57  ;;  %v7561_v57 = vld [vmem:[#allocation5 + $0xe94] ss:$8 sps:$4 sm:$0xff]  }
  0xcb   :  { %5211 = vmatpush1.bf16.msra.mxu1 %v7466_v58  ;;  %v7556_v58 = vld [vmem:[#allocation5 + $0x290] ss:$8 sps:$4 sm:$0xff]  }
  0xcc   :  { %5703 = vmatpush1.bf16.msra.mxu0 %v7469_v59  ;;  %5212 = vmatprep.subr.bf16.mxu1 %v7474_v60  ;;  %v7559_v59 = vld [vmem:[#allocation5 + $0xe90] ss:$8 sps:$4 sm:$0xff]   ;;  %v7564_v60 = vld [vmem:[#allocation5 + $0x2a4] ss:$8 sps:$4 sm:$0xff]  }
  0xcd   :  { %5704 = vmatprep.subr.bf16.mxu0 %v7477_v61  ;;  %v7567_v61 = vld [vmem:[#allocation5 + $0xea4] ss:$8 sps:$4 sm:$0xff]  }
  0xcf   :  { %5213 = vmatpush1.bf16.msra.mxu1 %v7472_v62  ;;  %v7562_v62 = vld [vmem:[#allocation5 + $0x2a0] ss:$8 sps:$4 sm:$0xff]  }
  0xd0   :  { %5705 = vmatpush1.bf16.msra.mxu0 %v7475_v63  ;;  %5214 = vmatprep.subr.bf16.mxu1 %v7480_v0  ;;  %v7565_v63 = vld [vmem:[#allocation5 + $0xea0] ss:$8 sps:$4 sm:$0xff]   ;;  %v7570_v0 = vld [vmem:[#allocation5 + $0x2b4] ss:$8 sps:$4 sm:$0xff]  }
  0xd1   :  { %5706 = vmatprep.subr.bf16.mxu0 %v7483_v1  ;;  %v7573_v1 = vld [vmem:[#allocation5 + $0xeb4] ss:$8 sps:$4 sm:$0xff]  }
  0xd3   :  { %5215 = vmatpush1.bf16.msra.mxu1 %v7478_v2  ;;  %v7568_v2 = vld [vmem:[#allocation5 + $0x2b0] ss:$8 sps:$4 sm:$0xff]  }
  0xd4   :  { %5707 = vmatpush1.bf16.msra.mxu0 %v7481_v3  ;;  %5216 = vmatprep.subr.bf16.mxu1 %v7486_v4  ;;  %v7571_v3 = vld [vmem:[#allocation5 + $0xeb0] ss:$8 sps:$4 sm:$0xff]   ;;  %v7576_v4 = vld [vmem:[#allocation5 + $0x2c4] ss:$8 sps:$4 sm:$0xff]  }
  0xd5   :  { %5708 = vmatprep.subr.bf16.mxu0 %v7489_v5  ;;  %v7579_v5 = vld [vmem:[#allocation5 + $0xec4] ss:$8 sps:$4 sm:$0xff]  }
  0xd7   :  { %5217 = vmatpush1.bf16.msra.mxu1 %v7484_v6  ;;  %v7574_v6 = vld [vmem:[#allocation5 + $0x2c0] ss:$8 sps:$4 sm:$0xff]  }
  0xd8   :  { %5709 = vmatpush1.bf16.msra.mxu0 %v7487_v7  ;;  %5218 = vmatprep.subr.bf16.mxu1 %v7492_v8  ;;  %v7577_v7 = vld [vmem:[#allocation5 + $0xec0] ss:$8 sps:$4 sm:$0xff]   ;;  %v7582_v8 = vld [vmem:[#allocation5 + $0x2d4] ss:$8 sps:$4 sm:$0xff]  }
  0xd9   :  { %5710 = vmatprep.subr.bf16.mxu0 %v7495_v9  ;;  %v7585_v9 = vld [vmem:[#allocation5 + $0xed4] ss:$8 sps:$4 sm:$0xff]  }
  0xdb   :  { %5219 = vmatpush1.bf16.msra.mxu1 %v7490_v10  ;;  %v7580_v10 = vld [vmem:[#allocation5 + $0x2d0] ss:$8 sps:$4 sm:$0xff]  }
  0xdc   :  { %5711 = vmatpush1.bf16.msra.mxu0 %v7493_v11  ;;  %5229 = vmatprep.subr.bf16.mxu1 %v7501_v14  ;;  %v7583_v11 = vld [vmem:[#allocation5 + $0xed0] ss:$8 sps:$4 sm:$0xff]   ;;  %v7586_v14 = vld [vmem:[#allocation5 + $0x2e0] ss:$8 sps:$4 sm:$0xff]  }
  0xdd   :  { %5721 = vmatprep.subr.bf16.mxu0 %v7507_v15  ;;  %v7589_v15 = vld [vmem:[#allocation5 + $0xee0] ss:$8 sps:$4 sm:$0xff]  }
  0xde   :  { %5221 = vmatmul.mubr.bf16.vlgmr.msra.gmra.mrb[0].mxu1 %v287_v16  ;;  %v7594_v16 = vld [vmem:[#allocation5 + $0x2f4] ss:$8 sps:$4 sm:$0xff]  }
  0xdf   :  { %5713 = vmatmul.mubr.bf16.vlgmr.msra.gmra.mrb[0].mxu0 %v311_v18  ;;  %5230 = vmatpush1.bf16.msra.mxu1 %v7499_v17  ;;  %v7597_v17 = vld [vmem:[#allocation5 + $0xef4] ss:$8 sps:$4 sm:$0xff]   ;;  %v7592_v18 = vld [vmem:[#allocation5 + $0x2f0] ss:$8 sps:$4 sm:$0xff]  }
  0xe0   :  { %5722 = vmatpush1.bf16.msra.mxu0 %v7505_v19  ;;  %5231 = vmatprep.subr.bf16.mxu1 %v7510_v20  ;;  %v7595_v19 = vld [vmem:[#allocation5 + $0xef0] ss:$8 sps:$4 sm:$0xff]   ;;  %v7598_v20 = vld [vmem:[#allocation2 + $0x10] ss:$200 sps:$4 sm:$0xff]  }
  0xe1   :  { %5723 = vmatprep.subr.bf16.mxu0 %v7513_v21  ;;  %5261 = vmatprep.mubr.bf16.mxu1 %v290_v31  ;;  %v7604_v21 = vld [vmem:[#allocation2 + $0x70] ss:$200 sps:$4 sm:$0xff]   ;;  %v7615_v31 = vld [vmem:[#allocation5 + $0xf14] ss:$8 sps:$4 sm:$0xff]  }
  0xe2   :  { %5753 = vmatprep.mubr.bf16.mxu0 %v314_v35  ;;  %v7613_v35 = vld [vmem:[#allocation5 + $0xf10] ss:$8 sps:$4 sm:$0xff]  }
  0xe3   :  { %5232 = vmatpush1.bf16.msra.mxu1 %v7508_v22  ;;  %v7603_v22 = vld [vmem:[#allocation5 + $0x304] ss:$8 sps:$4 sm:$0xff]  }
  0xe4   :  { %5724 = vmatpush1.bf16.msra.mxu0 %v7511_v23  ;;  %5233 = vmatprep.subr.bf16.mxu1 %v7516_v24  ;;  %v7609_v23 = vld [vmem:[#allocation5 + $0xf04] ss:$8 sps:$4 sm:$0xff]  }
  0xe5   :  { %5725 = vmatprep.subr.bf16.mxu0 %v7519_v25  ;;  %v7702_v24 = vld [vmem:[#allocation2 + $0x1c] ss:$200 sps:$4 sm:$0xff]  }
  0xe6   :  { %v7708_v25 = vld [vmem:[#allocation2 + $0x7c] ss:$200 sps:$4 sm:$0xff]   ;;  %v292_v32 = vpack.c.bf16 %v7702_v24, %v7702_v24 }
  0xe7   :  { %5234 = vmatpush1.bf16.msra.mxu1 %v7514_v26  ;;  %v289_v26 = vpack.c.bf16 %v7598_v20, %v7598_v20  ;;  %v7690_v20 = vld [vmem:[#allocation5 + $0x3e4] ss:$8 sps:$4 sm:$0xff]   ;;  %v7696_v24 = vld [vmem:[#allocation5 + $0x3f4] ss:$8 sps:$4 sm:$0xff]  }
  0xe8   :  { %5726 = vmatpush1.bf16.msra.mxu0 %v7517_v28  ;;  %5235 = vmatprep.subr.bf16.mxu1 %v7522_v29  ;;  %v313_v28 = vpack.c.bf16 %v7604_v21, %v7604_v21  ;;  %v7607_v29 = vld [vmem:[#allocation5 + $0xf00] ss:$8 sps:$4 sm:$0xff]   ;;  %v7693_v21 = vld [vmem:[#allocation5 + $0xfe4] ss:$8 sps:$4 sm:$0xff]  }
  0xe9   :  { %5727 = vmatprep.subr.bf16.mxu0 %v7525_v30  ;;  %v7612_v30 = vld [vmem:[#allocation5 + $0x314] ss:$8 sps:$4 sm:$0xff]  }
  0xeb   :  { %5236 = vmatpush1.bf16.msra.mxu1 %v7520_v33  ;;  %v316_v33 = vpack.c.bf16 %v7708_v25, %v7708_v25  ;;  %v7699_v25 = vld [vmem:[#allocation5 + $0xff4] ss:$8 sps:$4 sm:$0xff]  }
  0xec   :  { %5728 = vmatpush1.bf16.msra.mxu0 %v7523_v34  ;;  %5237 = vmatprep.subr.bf16.mxu1 %v7528_v36  ;;  %v7610_v34 = vld [vmem:[#allocation5 + $0x310] ss:$8 sps:$4 sm:$0xff]   ;;  %v7618_v36 = vld [vmem:[#allocation5 + $0x324] ss:$8 sps:$4 sm:$0xff]  }
  0xed   :  { %5729 = vmatprep.subr.bf16.mxu0 %v7531_v37  ;;  %v7621_v37 = vld [vmem:[#allocation5 + $0xf24] ss:$8 sps:$4 sm:$0xff]  }
  0xef   :  { %5238 = vmatpush1.bf16.msra.mxu1 %v7526_v38  ;;  %v7616_v38 = vld [vmem:[#allocation5 + $0x320] ss:$8 sps:$4 sm:$0xff]  }
  0xf0   :  { %5730 = vmatpush1.bf16.msra.mxu0 %v7529_v39  ;;  %5239 = vmatprep.subr.bf16.mxu1 %v7534_v40  ;;  %v7619_v39 = vld [vmem:[#allocation5 + $0xf20] ss:$8 sps:$4 sm:$0xff]   ;;  %v7624_v40 = vld [vmem:[#allocation5 + $0x334] ss:$8 sps:$4 sm:$0xff]  }
  0xf1   :  { %5731 = vmatprep.subr.bf16.mxu0 %v7537_v41  ;;  %v7627_v41 = vld [vmem:[#allocation5 + $0xf34] ss:$8 sps:$4 sm:$0xff]  }
  0xf3   :  { %5240 = vmatpush1.bf16.msra.mxu1 %v7532_v42  ;;  %v7622_v42 = vld [vmem:[#allocation5 + $0x330] ss:$8 sps:$4 sm:$0xff]  }
  0xf4   :  { %5732 = vmatpush1.bf16.msra.mxu0 %v7535_v43  ;;  %5241 = vmatprep.subr.bf16.mxu1 %v7540_v44  ;;  %v7625_v43 = vld [vmem:[#allocation5 + $0xf30] ss:$8 sps:$4 sm:$0xff]   ;;  %v7630_v44 = vld [vmem:[#allocation5 + $0x344] ss:$8 sps:$4 sm:$0xff]  }
  0xf5   :  { %5733 = vmatprep.subr.bf16.mxu0 %v7543_v45  ;;  %v7633_v45 = vld [vmem:[#allocation5 + $0xf44] ss:$8 sps:$4 sm:$0xff]  }
  0xf7   :  { %5242 = vmatpush1.bf16.msra.mxu1 %v7538_v46  ;;  %v7628_v46 = vld [vmem:[#allocation5 + $0x340] ss:$8 sps:$4 sm:$0xff]  }
  0xf8   :  { %5734 = vmatpush1.bf16.msra.mxu0 %v7541_v47  ;;  %5243 = vmatprep.subr.bf16.mxu1 %v7546_v48  ;;  %v7631_v47 = vld [vmem:[#allocation5 + $0xf40] ss:$8 sps:$4 sm:$0xff]   ;;  %v7636_v48 = vld [vmem:[#allocation5 + $0x354] ss:$8 sps:$4 sm:$0xff]  }
  0xf9   :  { %5735 = vmatprep.subr.bf16.mxu0 %v7549_v49  ;;  %v7639_v49 = vld [vmem:[#allocation5 + $0xf54] ss:$8 sps:$4 sm:$0xff]  }
  0xfb   :  { %5244 = vmatpush1.bf16.msra.mxu1 %v7544_v50  ;;  %v7634_v50 = vld [vmem:[#allocation5 + $0x350] ss:$8 sps:$4 sm:$0xff]  }
  0xfc   :  { %5736 = vmatpush1.bf16.msra.mxu0 %v7547_v51  ;;  %5245 = vmatprep.subr.bf16.mxu1 %v7552_v52  ;;  %v7637_v51 = vld [vmem:[#allocation5 + $0xf50] ss:$8 sps:$4 sm:$0xff]   ;;  %v7642_v52 = vld [vmem:[#allocation5 + $0x364] ss:$8 sps:$4 sm:$0xff]  }
  0xfd   :  { %5737 = vmatprep.subr.bf16.mxu0 %v7555_v53  ;;  %v7645_v53 = vld [vmem:[#allocation5 + $0xf64] ss:$8 sps:$4 sm:$0xff]  }
  0xff   :  { %5246 = vmatpush1.bf16.msra.mxu1 %v7550_v54  ;;  %v7640_v54 = vld [vmem:[#allocation5 + $0x360] ss:$8 sps:$4 sm:$0xff]  }
 0x100   :  { %5738 = vmatpush1.bf16.msra.mxu0 %v7553_v55  ;;  %5247 = vmatprep.subr.bf16.mxu1 %v7558_v56  ;;  %v7643_v55 = vld [vmem:[#allocation5 + $0xf60] ss:$8 sps:$4 sm:$0xff]   ;;  %v7648_v56 = vld [vmem:[#allocation5 + $0x374] ss:$8 sps:$4 sm:$0xff]  }
 0x101   :  { %5739 = vmatprep.subr.bf16.mxu0 %v7561_v57  ;;  %v7651_v57 = vld [vmem:[#allocation5 + $0xf74] ss:$8 sps:$4 sm:$0xff]  }
 0x103   :  { %5248 = vmatpush1.bf16.msra.mxu1 %v7556_v58  ;;  %v7646_v58 = vld [vmem:[#allocation5 + $0x370] ss:$8 sps:$4 sm:$0xff]  }
 0x104   :  { %5740 = vmatpush1.bf16.msra.mxu0 %v7559_v59  ;;  %5249 = vmatprep.subr.bf16.mxu1 %v7564_v60  ;;  %v7649_v59 = vld [vmem:[#allocation5 + $0xf70] ss:$8 sps:$4 sm:$0xff]   ;;  %v7654_v60 = vld [vmem:[#allocation5 + $0x384] ss:$8 sps:$4 sm:$0xff]  }
 0x105   :  { %5741 = vmatprep.subr.bf16.mxu0 %v7567_v61  ;;  %v7657_v61 = vld [vmem:[#allocation5 + $0xf84] ss:$8 sps:$4 sm:$0xff]  }
 0x107   :  { %5250 = vmatpush1.bf16.msra.mxu1 %v7562_v62  ;;  %v7652_v62 = vld [vmem:[#allocation5 + $0x380] ss:$8 sps:$4 sm:$0xff]  }
 0x108   :  { %5742 = vmatpush1.bf16.msra.mxu0 %v7565_v63  ;;  %5251 = vmatprep.subr.bf16.mxu1 %v7570_v0  ;;  %v7655_v63 = vld [vmem:[#allocation5 + $0xf80] ss:$8 sps:$4 sm:$0xff]   ;;  %v7660_v0 = vld [vmem:[#allocation5 + $0x394] ss:$8 sps:$4 sm:$0xff]  }
 0x109   :  { %5743 = vmatprep.subr.bf16.mxu0 %v7573_v1  ;;  %v7663_v1 = vld [vmem:[#allocation5 + $0xf94] ss:$8 sps:$4 sm:$0xff]  }
 0x10b   :  { %5252 = vmatpush1.bf16.msra.mxu1 %v7568_v2  ;;  %v7658_v2 = vld [vmem:[#allocation5 + $0x390] ss:$8 sps:$4 sm:$0xff]  }
 0x10c   :  { %5744 = vmatpush1.bf16.msra.mxu0 %v7571_v3  ;;  %5253 = vmatprep.subr.bf16.mxu1 %v7576_v4  ;;  %v7661_v3 = vld [vmem:[#allocation5 + $0xf90] ss:$8 sps:$4 sm:$0xff]   ;;  %v7666_v4 = vld [vmem:[#allocation5 + $0x3a4] ss:$8 sps:$4 sm:$0xff]  }
 0x10d   :  { %5745 = vmatprep.subr.bf16.mxu0 %v7579_v5  ;;  %v7669_v5 = vld [vmem:[#allocation5 + $0xfa4] ss:$8 sps:$4 sm:$0xff]  }
 0x10f   :  { %5254 = vmatpush1.bf16.msra.mxu1 %v7574_v6  ;;  %v7664_v6 = vld [vmem:[#allocation5 + $0x3a0] ss:$8 sps:$4 sm:$0xff]  }
 0x110   :  { %5746 = vmatpush1.bf16.msra.mxu0 %v7577_v7  ;;  %5255 = vmatprep.subr.bf16.mxu1 %v7582_v8  ;;  %v7667_v7 = vld [vmem:[#allocation5 + $0xfa0] ss:$8 sps:$4 sm:$0xff]   ;;  %v7672_v8 = vld [vmem:[#allocation5 + $0x3b4] ss:$8 sps:$4 sm:$0xff]  }
 0x111   :  { %5747 = vmatprep.subr.bf16.mxu0 %v7585_v9  ;;  %v7675_v9 = vld [vmem:[#allocation5 + $0xfb4] ss:$8 sps:$4 sm:$0xff]  }
 0x113   :  { %5256 = vmatpush1.bf16.msra.mxu1 %v7580_v10  ;;  %v7670_v10 = vld [vmem:[#allocation5 + $0x3b0] ss:$8 sps:$4 sm:$0xff]  }
 0x114   :  { %5748 = vmatpush1.bf16.msra.mxu0 %v7583_v11  ;;  %5257 = vmatprep.subr.bf16.mxu1 %v7588_v12  ;;  %v7673_v11 = vld [vmem:[#allocation5 + $0xfb0] ss:$8 sps:$4 sm:$0xff]   ;;  %v7678_v12 = vld [vmem:[#allocation5 + $0x3c4] ss:$8 sps:$4 sm:$0xff]  }
 0x115   :  { %5749 = vmatprep.subr.bf16.mxu0 %v7591_v13  ;;  %v7681_v13 = vld [vmem:[#allocation5 + $0xfc4] ss:$8 sps:$4 sm:$0xff]  }
 0x117   :  { %5258 = vmatpush1.bf16.msra.mxu1 %v7586_v14  ;;  %v7676_v14 = vld [vmem:[#allocation5 + $0x3c0] ss:$8 sps:$4 sm:$0xff]  }
 0x118   :  { %5750 = vmatpush1.bf16.msra.mxu0 %v7589_v15  ;;  %5259 = vmatprep.subr.bf16.mxu1 %v7594_v16  ;;  %v7679_v15 = vld [vmem:[#allocation5 + $0xfc0] ss:$8 sps:$4 sm:$0xff]   ;;  %v7684_v16 = vld [vmem:[#allocation5 + $0x3d4] ss:$8 sps:$4 sm:$0xff]  }
 0x119   :  { %5751 = vmatprep.subr.bf16.mxu0 %v7597_v17  ;;  %v7687_v17 = vld [vmem:[#allocation5 + $0xfd4] ss:$8 sps:$4 sm:$0xff]  }
 0x11b   :  { %5260 = vmatpush1.bf16.msra.mxu1 %v7592_v18  ;;  %v7682_v18 = vld [vmem:[#allocation5 + $0x3d0] ss:$8 sps:$4 sm:$0xff]  }
 0x11c   :  { %5752 = vmatpush1.bf16.msra.mxu0 %v7595_v19  ;;  %5270 = vmatprep.subr.bf16.mxu1 %v7603_v22  ;;  %v7685_v19 = vld [vmem:[#allocation5 + $0xfd0] ss:$8 sps:$4 sm:$0xff]   ;;  %v7688_v22 = vld [vmem:[#allocation5 + $0x3e0] ss:$8 sps:$4 sm:$0xff]  }
 0x11d   :  { %5762 = vmatprep.subr.bf16.mxu0 %v7609_v23  ;;  %v7691_v23 = vld [vmem:[#allocation5 + $0xfe0] ss:$8 sps:$4 sm:$0xff]  }
 0x11e   :  { %5262 = vmatmul.mubr.bf16.vlgmr.msra.gmra.mrb[0].mxu1 %v289_v26  ;;  %v7694_v26 = vld [vmem:[#allocation5 + $0x3f0] ss:$8 sps:$4 sm:$0xff]  }
 0x11f   :  { %5754 = vmatmul.mubr.bf16.vlgmr.msra.gmra.mrb[0].mxu0 %v313_v28  ;;  %5271 = vmatpush1.bf16.msra.mxu1 %v7601_v27  ;;  %v7697_v27 = vld [vmem:[#allocation5 + $0xff0] ss:$8 sps:$4 sm:$0xff]  }
 0x120   :  { %5763 = vmatpush1.bf16.msra.mxu0 %v7607_v29  ;;  %5272 = vmatprep.subr.bf16.mxu1 %v7612_v30  ;;  %v7700_v28 = vld [vmem:[#allocation2 + $0x18] ss:$200 sps:$4 sm:$0xff]   ;;  %v7705_v30 = vld [vmem:[#allocation5 + $0x404] ss:$8 sps:$4 sm:$0xff]  }
 0x121   :  { %5764 = vmatprep.subr.bf16.mxu0 %v7615_v31  ;;  %5302 = vmatprep.mubr.bf16.mxu1 %v292_v32  ;;  %v7706_v29 = vld [vmem:[#allocation2 + $0x78] ss:$200 sps:$4 sm:$0xff]   ;;  %v7711_v31 = vld [vmem:[#allocation5 + $0x1004] ss:$8 sps:$4 sm:$0xff]   ;;  %v7804_v32 = vld [vmem:[#allocation2 + $0x24] ss:$200 sps:$4 sm:$0xff]  }
 0x122   :  { %5794 = vmatprep.mubr.bf16.mxu0 %v316_v33  ;;  %v7810_v33 = vld [vmem:[#allocation2 + $0x84] ss:$200 sps:$4 sm:$0xff]  }
 0x123   :  { %5273 = vmatpush1.bf16.msra.mxu1 %v7610_v34  ;;  %v291_v34 = vpack.c.bf16 %v7700_v28, %v7700_v28  ;;  %v7792_v28 = vld [vmem:[#allocation5 + $0x4e4] ss:$8 sps:$4 sm:$0xff]  }
 0x124   :  { %5765 = vmatpush1.bf16.msra.mxu0 %v7613_v35  ;;  %5274 = vmatprep.subr.bf16.mxu1 %v7618_v36  ;;  %v7703_v35 = vld [vmem:[#allocation5 + $0x400] ss:$8 sps:$4 sm:$0xff]   ;;  %v315_v36 = vpack.c.bf16 %v7706_v29, %v7706_v29  ;;  %v7795_v29 = vld [vmem:[#allocation5 + $0x10e4] ss:$8 sps:$4 sm:$0xff]  }
 0x125   :  { %5766 = vmatprep.subr.bf16.mxu0 %v7621_v37  ;;  %v7709_v37 = vld [vmem:[#allocation5 + $0x1000] ss:$8 sps:$4 sm:$0xff]  }
 0x127   :  { %5275 = vmatpush1.bf16.msra.mxu1 %v7616_v38  ;;  %v7714_v38 = vld [vmem:[#allocation5 + $0x414] ss:$8 sps:$4 sm:$0xff]  }
 0x128   :  { %5767 = vmatpush1.bf16.msra.mxu0 %v7619_v39  ;;  %5276 = vmatprep.subr.bf16.mxu1 %v7624_v40  ;;  %v7717_v39 = vld [vmem:[#allocation5 + $0x1014] ss:$8 sps:$4 sm:$0xff]   ;;  %v294_v40 = vpack.c.bf16 %v7804_v32, %v7804_v32 }
 0x129   :  { %5768 = vmatprep.subr.bf16.mxu0 %v7627_v41  ;;  %v318_v41 = vpack.c.bf16 %v7810_v33, %v7810_v33  ;;  %v7798_v32 = vld [vmem:[#allocation5 + $0x4f4] ss:$8 sps:$4 sm:$0xff]  }
 0x12a   :  { %v7801_v33 = vld [vmem:[#allocation5 + $0x10f4] ss:$8 sps:$4 sm:$0xff]  }
 0x12b   :  { %5277 = vmatpush1.bf16.msra.mxu1 %v7622_v42  ;;  %v7712_v42 = vld [vmem:[#allocation5 + $0x410] ss:$8 sps:$4 sm:$0xff]  }
 0x12c   :  { %5769 = vmatpush1.bf16.msra.mxu0 %v7625_v43  ;;  %5278 = vmatprep.subr.bf16.mxu1 %v7630_v44  ;;  %v7715_v43 = vld [vmem:[#allocation5 + $0x1010] ss:$8 sps:$4 sm:$0xff]   ;;  %v7720_v44 = vld [vmem:[#allocation5 + $0x424] ss:$8 sps:$4 sm:$0xff]  }
 0x12d   :  { %5770 = vmatprep.subr.bf16.mxu0 %v7633_v45  ;;  %v7723_v45 = vld [vmem:[#allocation5 + $0x1024] ss:$8 sps:$4 sm:$0xff]  }
 0x12f   :  { %5279 = vmatpush1.bf16.msra.mxu1 %v7628_v46  ;;  %v7718_v46 = vld [vmem:[#allocation5 + $0x420] ss:$8 sps:$4 sm:$0xff]  }
 0x130   :  { %5771 = vmatpush1.bf16.msra.mxu0 %v7631_v47  ;;  %5280 = vmatprep.subr.bf16.mxu1 %v7636_v48  ;;  %v7721_v47 = vld [vmem:[#allocation5 + $0x1020] ss:$8 sps:$4 sm:$0xff]   ;;  %v7726_v48 = vld [vmem:[#allocation5 + $0x434] ss:$8 sps:$4 sm:$0xff]  }
 0x131   :  { %5772 = vmatprep.subr.bf16.mxu0 %v7639_v49  ;;  %v7729_v49 = vld [vmem:[#allocation5 + $0x1034] ss:$8 sps:$4 sm:$0xff]  }
 0x133   :  { %5281 = vmatpush1.bf16.msra.mxu1 %v7634_v50  ;;  %v7724_v50 = vld [vmem:[#allocation5 + $0x430] ss:$8 sps:$4 sm:$0xff]  }
 0x134   :  { %5773 = vmatpush1.bf16.msra.mxu0 %v7637_v51  ;;  %5282 = vmatprep.subr.bf16.mxu1 %v7642_v52  ;;  %v7727_v51 = vld [vmem:[#allocation5 + $0x1030] ss:$8 sps:$4 sm:$0xff]   ;;  %v7732_v52 = vld [vmem:[#allocation5 + $0x444] ss:$8 sps:$4 sm:$0xff]  }
 0x135   :  { %5774 = vmatprep.subr.bf16.mxu0 %v7645_v53  ;;  %v7735_v53 = vld [vmem:[#allocation5 + $0x1044] ss:$8 sps:$4 sm:$0xff]  }
 0x137   :  { %5283 = vmatpush1.bf16.msra.mxu1 %v7640_v54  ;;  %v7730_v54 = vld [vmem:[#allocation5 + $0x440] ss:$8 sps:$4 sm:$0xff]  }
 0x138   :  { %5775 = vmatpush1.bf16.msra.mxu0 %v7643_v55  ;;  %5284 = vmatprep.subr.bf16.mxu1 %v7648_v56  ;;  %v7733_v55 = vld [vmem:[#allocation5 + $0x1040] ss:$8 sps:$4 sm:$0xff]   ;;  %v7738_v56 = vld [vmem:[#allocation5 + $0x454] ss:$8 sps:$4 sm:$0xff]  }
 0x139   :  { %5776 = vmatprep.subr.bf16.mxu0 %v7651_v57  ;;  %v7741_v57 = vld [vmem:[#allocation5 + $0x1054] ss:$8 sps:$4 sm:$0xff]  }
 0x13b   :  { %5285 = vmatpush1.bf16.msra.mxu1 %v7646_v58  ;;  %v7736_v58 = vld [vmem:[#allocation5 + $0x450] ss:$8 sps:$4 sm:$0xff]  }
 0x13c   :  { %5777 = vmatpush1.bf16.msra.mxu0 %v7649_v59  ;;  %5286 = vmatprep.subr.bf16.mxu1 %v7654_v60  ;;  %v7739_v59 = vld [vmem:[#allocation5 + $0x1050] ss:$8 sps:$4 sm:$0xff]   ;;  %v7744_v60 = vld [vmem:[#allocation5 + $0x464] ss:$8 sps:$4 sm:$0xff]  }
 0x13d   :  { %5778 = vmatprep.subr.bf16.mxu0 %v7657_v61  ;;  %v7747_v61 = vld [vmem:[#allocation5 + $0x1064] ss:$8 sps:$4 sm:$0xff]  }
 0x13f   :  { %5287 = vmatpush1.bf16.msra.mxu1 %v7652_v62  ;;  %v7742_v62 = vld [vmem:[#allocation5 + $0x460] ss:$8 sps:$4 sm:$0xff]  }
 0x140   :  { %5779 = vmatpush1.bf16.msra.mxu0 %v7655_v63  ;;  %5288 = vmatprep.subr.bf16.mxu1 %v7660_v0  ;;  %v7745_v63 = vld [vmem:[#allocation5 + $0x1060] ss:$8 sps:$4 sm:$0xff]   ;;  %v7750_v0 = vld [vmem:[#allocation5 + $0x474] ss:$8 sps:$4 sm:$0xff]  }
 0x141   :  { %5780 = vmatprep.subr.bf16.mxu0 %v7663_v1  ;;  %v7753_v1 = vld [vmem:[#allocation5 + $0x1074] ss:$8 sps:$4 sm:$0xff]  }
 0x143   :  { %5289 = vmatpush1.bf16.msra.mxu1 %v7658_v2  ;;  %v7748_v2 = vld [vmem:[#allocation5 + $0x470] ss:$8 sps:$4 sm:$0xff]  }
 0x144   :  { %5781 = vmatpush1.bf16.msra.mxu0 %v7661_v3  ;;  %5290 = vmatprep.subr.bf16.mxu1 %v7666_v4  ;;  %v7751_v3 = vld [vmem:[#allocation5 + $0x1070] ss:$8 sps:$4 sm:$0xff]   ;;  %v7756_v4 = vld [vmem:[#allocation5 + $0x484] ss:$8 sps:$4 sm:$0xff]  }
 0x145   :  { %5782 = vmatprep.subr.bf16.mxu0 %v7669_v5  ;;  %v7759_v5 = vld [vmem:[#allocation5 + $0x1084] ss:$8 sps:$4 sm:$0xff]  }
 0x147   :  { %5291 = vmatpush1.bf16.msra.mxu1 %v7664_v6  ;;  %v7754_v6 = vld [vmem:[#allocation5 + $0x480] ss:$8 sps:$4 sm:$0xff]  }
 0x148   :  { %5783 = vmatpush1.bf16.msra.mxu0 %v7667_v7  ;;  %5292 = vmatprep.subr.bf16.mxu1 %v7672_v8  ;;  %v7757_v7 = vld [vmem:[#allocation5 + $0x1080] ss:$8 sps:$4 sm:$0xff]   ;;  %v7762_v8 = vld [vmem:[#allocation5 + $0x494] ss:$8 sps:$4 sm:$0xff]  }
 0x149   :  { %5784 = vmatprep.subr.bf16.mxu0 %v7675_v9  ;;  %v7765_v9 = vld [vmem:[#allocation5 + $0x1094] ss:$8 sps:$4 sm:$0xff]  }
 0x14b   :  { %5293 = vmatpush1.bf16.msra.mxu1 %v7670_v10  ;;  %v7760_v10 = vld [vmem:[#allocation5 + $0x490] ss:$8 sps:$4 sm:$0xff]  }
 0x14c   :  { %5785 = vmatpush1.bf16.msra.mxu0 %v7673_v11  ;;  %5294 = vmatprep.subr.bf16.mxu1 %v7678_v12  ;;  %v7763_v11 = vld [vmem:[#allocation5 + $0x1090] ss:$8 sps:$4 sm:$0xff]   ;;  %v7768_v12 = vld [vmem:[#allocation5 + $0x4a4] ss:$8 sps:$4 sm:$0xff]  }
 0x14d   :  { %5786 = vmatprep.subr.bf16.mxu0 %v7681_v13  ;;  %v7771_v13 = vld [vmem:[#allocation5 + $0x10a4] ss:$8 sps:$4 sm:$0xff]  }
 0x14f   :  { %5295 = vmatpush1.bf16.msra.mxu1 %v7676_v14  ;;  %v7766_v14 = vld [vmem:[#allocation5 + $0x4a0] ss:$8 sps:$4 sm:$0xff]  }
 0x150   :  { %5787 = vmatpush1.bf16.msra.mxu0 %v7679_v15  ;;  %5296 = vmatprep.subr.bf16.mxu1 %v7684_v16  ;;  %v7769_v15 = vld [vmem:[#allocation5 + $0x10a0] ss:$8 sps:$4 sm:$0xff]   ;;  %v7774_v16 = vld [vmem:[#allocation5 + $0x4b4] ss:$8 sps:$4 sm:$0xff]  }
 0x151   :  { %5788 = vmatprep.subr.bf16.mxu0 %v7687_v17  ;;  %v7777_v17 = vld [vmem:[#allocation5 + $0x10b4] ss:$8 sps:$4 sm:$0xff]  }
 0x153   :  { %5297 = vmatpush1.bf16.msra.mxu1 %v7682_v18  ;;  %v7772_v18 = vld [vmem:[#allocation5 + $0x4b0] ss:$8 sps:$4 sm:$0xff]  }
 0x154   :  { %5789 = vmatpush1.bf16.msra.mxu0 %v7685_v19  ;;  %5298 = vmatprep.subr.bf16.mxu1 %v7690_v20  ;;  %v7775_v19 = vld [vmem:[#allocation5 + $0x10b0] ss:$8 sps:$4 sm:$0xff]   ;;  %v7780_v20 = vld [vmem:[#allocation5 + $0x4c4] ss:$8 sps:$4 sm:$0xff]  }
 0x155   :  { %5790 = vmatprep.subr.bf16.mxu0 %v7693_v21  ;;  %v7783_v21 = vld [vmem:[#allocation5 + $0x10c4] ss:$8 sps:$4 sm:$0xff]  }
 0x157   :  { %5299 = vmatpush1.bf16.msra.mxu1 %v7688_v22  ;;  %v7778_v22 = vld [vmem:[#allocation5 + $0x4c0] ss:$8 sps:$4 sm:$0xff]  }
 0x158   :  { %5791 = vmatpush1.bf16.msra.mxu0 %v7691_v23  ;;  %5300 = vmatprep.subr.bf16.mxu1 %v7696_v24  ;;  %v7781_v23 = vld [vmem:[#allocation5 + $0x10c0] ss:$8 sps:$4 sm:$0xff]   ;;  %v7786_v24 = vld [vmem:[#allocation5 + $0x4d4] ss:$8 sps:$4 sm:$0xff]  }
 0x159   :  { %5792 = vmatprep.subr.bf16.mxu0 %v7699_v25  ;;  %v7789_v25 = vld [vmem:[#allocation5 + $0x10d4] ss:$8 sps:$4 sm:$0xff]  }
 0x15b   :  { %5301 = vmatpush1.bf16.msra.mxu1 %v7694_v26  ;;  %v7784_v26 = vld [vmem:[#allocation5 + $0x4d0] ss:$8 sps:$4 sm:$0xff]  }
 0x15c   :  { %5793 = vmatpush1.bf16.msra.mxu0 %v7697_v27  ;;  %5311 = vmatprep.subr.bf16.mxu1 %v7705_v30  ;;  %v7787_v27 = vld [vmem:[#allocation5 + $0x10d0] ss:$8 sps:$4 sm:$0xff]   ;;  %v7790_v30 = vld [vmem:[#allocation5 + $0x4e0] ss:$8 sps:$4 sm:$0xff]  }
 0x15d   :  { %5803 = vmatprep.subr.bf16.mxu0 %v7711_v31  ;;  %v7793_v31 = vld [vmem:[#allocation5 + $0x10e0] ss:$8 sps:$4 sm:$0xff]  }
 0x15e   :  { %5303 = vmatmul.mubr.bf16.vlgmr.msra.gmra.mrb[0].mxu1 %v291_v34  ;;  %v7802_v34 = vld [vmem:[#allocation2 + $0x20] ss:$200 sps:$4 sm:$0xff]  }
 0x15f   :  { %5795 = vmatmul.mubr.bf16.vlgmr.msra.gmra.mrb[0].mxu0 %v315_v36  ;;  %5312 = vmatpush1.bf16.msra.mxu1 %v7703_v35  ;;  %v7808_v35 = vld [vmem:[#allocation2 + $0x80] ss:$200 sps:$4 sm:$0xff]  }
 0x160   :  { %5804 = vmatpush1.bf16.msra.mxu0 %v7709_v37  ;;  %5313 = vmatprep.subr.bf16.mxu1 %v7714_v38  ;;  %v7796_v36 = vld [vmem:[#allocation5 + $0x4f0] ss:$8 sps:$4 sm:$0xff]   ;;  %v7807_v38 = vld [vmem:[#allocation5 + $0x504] ss:$8 sps:$4 sm:$0xff]  }
 0x161   :  { %5805 = vmatprep.subr.bf16.mxu0 %v7717_v39  ;;  %5343 = vmatprep.mubr.bf16.mxu1 %v294_v40  ;;  %v7799_v37 = vld [vmem:[#allocation5 + $0x10f0] ss:$8 sps:$4 sm:$0xff]   ;;  %v7813_v39 = vld [vmem:[#allocation5 + $0x1104] ss:$8 sps:$4 sm:$0xff]  }
 0x162   :  { %5835 = vmatprep.mubr.bf16.mxu0 %v318_v41  ;;  %v7906_v40 = vld [vmem:[#allocation2 + $0x2c] ss:$200 sps:$4 sm:$0xff]  }
 0x163   :  { %5314 = vmatpush1.bf16.msra.mxu1 %v7712_v42  ;;  %v7912_v41 = vld [vmem:[#allocation2 + $0x8c] ss:$200 sps:$4 sm:$0xff]   ;;  %v293_v42 = vpack.c.bf16 %v7802_v34, %v7802_v34  ;;  %v7886_v34 = vld [vmem:[#allocation5 + $0x5d0] ss:$8 sps:$4 sm:$0xff]  }
 0x164   :  { %5806 = vmatpush1.bf16.msra.mxu0 %v7715_v43  ;;  %5315 = vmatprep.subr.bf16.mxu1 %v7720_v44  ;;  %v317_v43 = vpack.c.bf16 %v7808_v35, %v7808_v35  ;;  %v7805_v44 = vld [vmem:[#allocation5 + $0x500] ss:$8 sps:$4 sm:$0xff]   ;;  %v7889_v35 = vld [vmem:[#allocation5 + $0x11d0] ss:$8 sps:$4 sm:$0xff]  }
 0x165   :  { %5807 = vmatprep.subr.bf16.mxu0 %v7723_v45  ;;  %v7811_v45 = vld [vmem:[#allocation5 + $0x1100] ss:$8 sps:$4 sm:$0xff]  }
 0x167   :  { %5316 = vmatpush1.bf16.msra.mxu1 %v7718_v46  ;;  %v7816_v46 = vld [vmem:[#allocation5 + $0x514] ss:$8 sps:$4 sm:$0xff]  }
 0x168   :  { %5808 = vmatpush1.bf16.msra.mxu0 %v7721_v47  ;;  %5317 = vmatprep.subr.bf16.mxu1 %v7726_v48  ;;  %v7819_v47 = vld [vmem:[#allocation5 + $0x1114] ss:$8 sps:$4 sm:$0xff]   ;;  %v296_v48 = vpack.c.bf16 %v7906_v40, %v7906_v40 }
 0x169   :  { %5809 = vmatprep.subr.bf16.mxu0 %v7729_v49  ;;  %v320_v49 = vpack.c.bf16 %v7912_v41, %v7912_v41  ;;  %v7900_v40 = vld [vmem:[#allocation5 + $0x5f4] ss:$8 sps:$4 sm:$0xff]  }
 0x16a   :  { %v7903_v41 = vld [vmem:[#allocation5 + $0x11f4] ss:$8 sps:$4 sm:$0xff]  }
 0x16b   :  { %5318 = vmatpush1.bf16.msra.mxu1 %v7724_v50  ;;  %v7814_v50 = vld [vmem:[#allocation5 + $0x510] ss:$8 sps:$4 sm:$0xff]  }
 0x16c   :  { %5810 = vmatpush1.bf16.msra.mxu0 %v7727_v51  ;;  %5319 = vmatprep.subr.bf16.mxu1 %v7732_v52  ;;  %v7817_v51 = vld [vmem:[#allocation5 + $0x1110] ss:$8 sps:$4 sm:$0xff]   ;;  %v7822_v52 = vld [vmem:[#allocation5 + $0x524] ss:$8 sps:$4 sm:$0xff]  }
 0x16d   :  { %5811 = vmatprep.subr.bf16.mxu0 %v7735_v53  ;;  %v7825_v53 = vld [vmem:[#allocation5 + $0x1124] ss:$8 sps:$4 sm:$0xff]  }
 0x16f   :  { %5320 = vmatpush1.bf16.msra.mxu1 %v7730_v54  ;;  %v7820_v54 = vld [vmem:[#allocation5 + $0x520] ss:$8 sps:$4 sm:$0xff]  }
 0x170   :  { %5812 = vmatpush1.bf16.msra.mxu0 %v7733_v55  ;;  %5321 = vmatprep.subr.bf16.mxu1 %v7738_v56  ;;  %v7823_v55 = vld [vmem:[#allocation5 + $0x1120] ss:$8 sps:$4 sm:$0xff]   ;;  %v7828_v56 = vld [vmem:[#allocation5 + $0x534] ss:$8 sps:$4 sm:$0xff]  }
 0x171   :  { %5813 = vmatprep.subr.bf16.mxu0 %v7741_v57  ;;  %v7831_v57 = vld [vmem:[#allocation5 + $0x1134] ss:$8 sps:$4 sm:$0xff]  }
 0x173   :  { %5322 = vmatpush1.bf16.msra.mxu1 %v7736_v58  ;;  %v7826_v58 = vld [vmem:[#allocation5 + $0x530] ss:$8 sps:$4 sm:$0xff]  }
 0x174   :  { %5814 = vmatpush1.bf16.msra.mxu0 %v7739_v59  ;;  %5323 = vmatprep.subr.bf16.mxu1 %v7744_v60  ;;  %v7829_v59 = vld [vmem:[#allocation5 + $0x1130] ss:$8 sps:$4 sm:$0xff]   ;;  %v7834_v60 = vld [vmem:[#allocation5 + $0x544] ss:$8 sps:$4 sm:$0xff]  }
 0x175   :  { %5815 = vmatprep.subr.bf16.mxu0 %v7747_v61  ;;  %v7837_v61 = vld [vmem:[#allocation5 + $0x1144] ss:$8 sps:$4 sm:$0xff]  }
 0x177   :  { %5324 = vmatpush1.bf16.msra.mxu1 %v7742_v62  ;;  %v7832_v62 = vld [vmem:[#allocation5 + $0x540] ss:$8 sps:$4 sm:$0xff]  }
 0x178   :  { %5816 = vmatpush1.bf16.msra.mxu0 %v7745_v63  ;;  %5325 = vmatprep.subr.bf16.mxu1 %v7750_v0  ;;  %v7835_v63 = vld [vmem:[#allocation5 + $0x1140] ss:$8 sps:$4 sm:$0xff]   ;;  %v7840_v0 = vld [vmem:[#allocation5 + $0x554] ss:$8 sps:$4 sm:$0xff]  }
 0x179   :  { %5817 = vmatprep.subr.bf16.mxu0 %v7753_v1  ;;  %v7843_v1 = vld [vmem:[#allocation5 + $0x1154] ss:$8 sps:$4 sm:$0xff]  }
 0x17b   :  { %5326 = vmatpush1.bf16.msra.mxu1 %v7748_v2  ;;  %v7838_v2 = vld [vmem:[#allocation5 + $0x550] ss:$8 sps:$4 sm:$0xff]  }
 0x17c   :  { %5818 = vmatpush1.bf16.msra.mxu0 %v7751_v3  ;;  %5327 = vmatprep.subr.bf16.mxu1 %v7756_v4  ;;  %v7841_v3 = vld [vmem:[#allocation5 + $0x1150] ss:$8 sps:$4 sm:$0xff]   ;;  %v7846_v4 = vld [vmem:[#allocation5 + $0x564] ss:$8 sps:$4 sm:$0xff]  }
 0x17d   :  { %5819 = vmatprep.subr.bf16.mxu0 %v7759_v5  ;;  %v7849_v5 = vld [vmem:[#allocation5 + $0x1164] ss:$8 sps:$4 sm:$0xff]  }
 0x17f   :  { %5328 = vmatpush1.bf16.msra.mxu1 %v7754_v6  ;;  %v7844_v6 = vld [vmem:[#allocation5 + $0x560] ss:$8 sps:$4 sm:$0xff]  }
 0x180   :  { %5820 = vmatpush1.bf16.msra.mxu0 %v7757_v7  ;;  %5329 = vmatprep.subr.bf16.mxu1 %v7762_v8  ;;  %v7847_v7 = vld [vmem:[#allocation5 + $0x1160] ss:$8 sps:$4 sm:$0xff]   ;;  %v7852_v8 = vld [vmem:[#allocation5 + $0x574] ss:$8 sps:$4 sm:$0xff]  }
 0x181   :  { %5821 = vmatprep.subr.bf16.mxu0 %v7765_v9  ;;  %v7855_v9 = vld [vmem:[#allocation5 + $0x1174] ss:$8 sps:$4 sm:$0xff]  }
 0x183   :  { %5330 = vmatpush1.bf16.msra.mxu1 %v7760_v10  ;;  %v7850_v10 = vld [vmem:[#allocation5 + $0x570] ss:$8 sps:$4 sm:$0xff]  }
 0x184   :  { %5822 = vmatpush1.bf16.msra.mxu0 %v7763_v11  ;;  %5331 = vmatprep.subr.bf16.mxu1 %v7768_v12  ;;  %v7853_v11 = vld [vmem:[#allocation5 + $0x1170] ss:$8 sps:$4 sm:$0xff]   ;;  %v7858_v12 = vld [vmem:[#allocation5 + $0x584] ss:$8 sps:$4 sm:$0xff]  }
 0x185   :  { %5823 = vmatprep.subr.bf16.mxu0 %v7771_v13  ;;  %v7861_v13 = vld [vmem:[#allocation5 + $0x1184] ss:$8 sps:$4 sm:$0xff]  }
 0x187   :  { %5332 = vmatpush1.bf16.msra.mxu1 %v7766_v14  ;;  %v7856_v14 = vld [vmem:[#allocation5 + $0x580] ss:$8 sps:$4 sm:$0xff]  }
 0x188   :  { %5824 = vmatpush1.bf16.msra.mxu0 %v7769_v15  ;;  %5333 = vmatprep.subr.bf16.mxu1 %v7774_v16  ;;  %v7859_v15 = vld [vmem:[#allocation5 + $0x1180] ss:$8 sps:$4 sm:$0xff]   ;;  %v7864_v16 = vld [vmem:[#allocation5 + $0x594] ss:$8 sps:$4 sm:$0xff]  }
 0x189   :  { %5825 = vmatprep.subr.bf16.mxu0 %v7777_v17  ;;  %v7867_v17 = vld [vmem:[#allocation5 + $0x1194] ss:$8 sps:$4 sm:$0xff]  }
 0x18b   :  { %5334 = vmatpush1.bf16.msra.mxu1 %v7772_v18  ;;  %v7862_v18 = vld [vmem:[#allocation5 + $0x590] ss:$8 sps:$4 sm:$0xff]  }
 0x18c   :  { %5826 = vmatpush1.bf16.msra.mxu0 %v7775_v19  ;;  %5335 = vmatprep.subr.bf16.mxu1 %v7780_v20  ;;  %v7865_v19 = vld [vmem:[#allocation5 + $0x1190] ss:$8 sps:$4 sm:$0xff]   ;;  %v7870_v20 = vld [vmem:[#allocation5 + $0x5a4] ss:$8 sps:$4 sm:$0xff]  }
 0x18d   :  { %5827 = vmatprep.subr.bf16.mxu0 %v7783_v21  ;;  %v7873_v21 = vld [vmem:[#allocation5 + $0x11a4] ss:$8 sps:$4 sm:$0xff]  }
 0x18f   :  { %5336 = vmatpush1.bf16.msra.mxu1 %v7778_v22  ;;  %v7868_v22 = vld [vmem:[#allocation5 + $0x5a0] ss:$8 sps:$4 sm:$0xff]  }
 0x190   :  { %5828 = vmatpush1.bf16.msra.mxu0 %v7781_v23  ;;  %5337 = vmatprep.subr.bf16.mxu1 %v7786_v24  ;;  %v7871_v23 = vld [vmem:[#allocation5 + $0x11a0] ss:$8 sps:$4 sm:$0xff]   ;;  %v7876_v24 = vld [vmem:[#allocation5 + $0x5b4] ss:$8 sps:$4 sm:$0xff]  }
 0x191   :  { %5829 = vmatprep.subr.bf16.mxu0 %v7789_v25  ;;  %v7879_v25 = vld [vmem:[#allocation5 + $0x11b4] ss:$8 sps:$4 sm:$0xff]  }
 0x193   :  { %5338 = vmatpush1.bf16.msra.mxu1 %v7784_v26  ;;  %v7874_v26 = vld [vmem:[#allocation5 + $0x5b0] ss:$8 sps:$4 sm:$0xff]  }
 0x194   :  { %5830 = vmatpush1.bf16.msra.mxu0 %v7787_v27  ;;  %5339 = vmatprep.subr.bf16.mxu1 %v7792_v28  ;;  %v7877_v27 = vld [vmem:[#allocation5 + $0x11b0] ss:$8 sps:$4 sm:$0xff]   ;;  %v7882_v28 = vld [vmem:[#allocation5 + $0x5c4] ss:$8 sps:$4 sm:$0xff]  }
 0x195   :  { %5831 = vmatprep.subr.bf16.mxu0 %v7795_v29  ;;  %v7885_v29 = vld [vmem:[#allocation5 + $0x11c4] ss:$8 sps:$4 sm:$0xff]  }
 0x197   :  { %5340 = vmatpush1.bf16.msra.mxu1 %v7790_v30  ;;  %v7880_v30 = vld [vmem:[#allocation5 + $0x5c0] ss:$8 sps:$4 sm:$0xff]  }
 0x198   :  { %5832 = vmatpush1.bf16.msra.mxu0 %v7793_v31  ;;  %5341 = vmatprep.subr.bf16.mxu1 %v7798_v32  ;;  %v7883_v31 = vld [vmem:[#allocation5 + $0x11c0] ss:$8 sps:$4 sm:$0xff]   ;;  %v7888_v32 = vld [vmem:[#allocation5 + $0x5d4] ss:$8 sps:$4 sm:$0xff]  }
 0x199   :  { %5833 = vmatprep.subr.bf16.mxu0 %v7801_v33  ;;  %v7891_v33 = vld [vmem:[#allocation5 + $0x11d4] ss:$8 sps:$4 sm:$0xff]  }
 0x19b   :  { %5342 = vmatpush1.bf16.msra.mxu1 %v7796_v36  ;;  %v7894_v36 = vld [vmem:[#allocation5 + $0x5e4] ss:$8 sps:$4 sm:$0xff]  }
 0x19c   :  { %5834 = vmatpush1.bf16.msra.mxu0 %v7799_v37  ;;  %5352 = vmatprep.subr.bf16.mxu1 %v7807_v38  ;;  %v7897_v37 = vld [vmem:[#allocation5 + $0x11e4] ss:$8 sps:$4 sm:$0xff]   ;;  %v7892_v38 = vld [vmem:[#allocation5 + $0x5e0] ss:$8 sps:$4 sm:$0xff]  }
 0x19d   :  { %5844 = vmatprep.subr.bf16.mxu0 %v7813_v39  ;;  %v7895_v39 = vld [vmem:[#allocation5 + $0x11e0] ss:$8 sps:$4 sm:$0xff]  }
 0x19e   :  { %5344 = vmatmul.mubr.bf16.vlgmr.msra.gmra.mrb[0].mxu1 %v293_v42  ;;  %v7904_v42 = vld [vmem:[#allocation2 + $0x28] ss:$200 sps:$4 sm:$0xff]  }
 0x19f   :  { %5836 = vmatmul.mubr.bf16.vlgmr.msra.gmra.mrb[0].mxu0 %v317_v43  ;;  %5353 = vmatpush1.bf16.msra.mxu1 %v7805_v44  ;;  %v7910_v43 = vld [vmem:[#allocation2 + $0x88] ss:$200 sps:$4 sm:$0xff]  }
 0x1a0   :  { %5845 = vmatpush1.bf16.msra.mxu0 %v7811_v45  ;;  %5354 = vmatprep.subr.bf16.mxu1 %v7816_v46  ;;  %v7898_v44 = vld [vmem:[#allocation5 + $0x5f0] ss:$8 sps:$4 sm:$0xff]   ;;  %v7909_v46 = vld [vmem:[#allocation5 + $0x604] ss:$8 sps:$4 sm:$0xff]  }
 0x1a1   :  { %5846 = vmatprep.subr.bf16.mxu0 %v7819_v47  ;;  %5384 = vmatprep.mubr.bf16.mxu1 %v296_v48  ;;  %v7901_v45 = vld [vmem:[#allocation5 + $0x11f0] ss:$8 sps:$4 sm:$0xff]   ;;  %v7915_v47 = vld [vmem:[#allocation5 + $0x1204] ss:$8 sps:$4 sm:$0xff]  }
 0x1a2   :  { %5876 = vmatprep.mubr.bf16.mxu0 %v320_v49  ;;  %v8008_v48 = vld [vmem:[#allocation2 + $0x34] ss:$200 sps:$4 sm:$0xff]  }
 0x1a3   :  { %5355 = vmatpush1.bf16.msra.mxu1 %v7814_v50  ;;  %v8014_v49 = vld [vmem:[#allocation2 + $0x94] ss:$200 sps:$4 sm:$0xff]   ;;  %v295_v50 = vpack.c.bf16 %v7904_v42, %v7904_v42  ;;  %v7988_v42 = vld [vmem:[#allocation5 + $0x6d0] ss:$8 sps:$4 sm:$0xff]  }
 0x1a4   :  { %5847 = vmatpush1.bf16.msra.mxu0 %v7817_v51  ;;  %5356 = vmatprep.subr.bf16.mxu1 %v7822_v52  ;;  %v319_v51 = vpack.c.bf16 %v7910_v43, %v7910_v43  ;;  %v7907_v52 = vld [vmem:[#allocation5 + $0x600] ss:$8 sps:$4 sm:$0xff]   ;;  %v7991_v43 = vld [vmem:[#allocation5 + $0x12d0] ss:$8 sps:$4 sm:$0xff]  }
 0x1a5   :  { %5848 = vmatprep.subr.bf16.mxu0 %v7825_v53  ;;  %v7913_v53 = vld [vmem:[#allocation5 + $0x1200] ss:$8 sps:$4 sm:$0xff]  }
 0x1a7   :  { %5357 = vmatpush1.bf16.msra.mxu1 %v7820_v54  ;;  %v7918_v54 = vld [vmem:[#allocation5 + $0x614] ss:$8 sps:$4 sm:$0xff]  }
 0x1a8   :  { %5849 = vmatpush1.bf16.msra.mxu0 %v7823_v55  ;;  %5358 = vmatprep.subr.bf16.mxu1 %v7828_v56  ;;  %v7921_v55 = vld [vmem:[#allocation5 + $0x1214] ss:$8 sps:$4 sm:$0xff]   ;;  %v298_v56 = vpack.c.bf16 %v8008_v48, %v8008_v48 }
 0x1a9   :  { %5850 = vmatprep.subr.bf16.mxu0 %v7831_v57  ;;  %v322_v57 = vpack.c.bf16 %v8014_v49, %v8014_v49  ;;  %v8002_v48 = vld [vmem:[#allocation5 + $0x6f4] ss:$8 sps:$4 sm:$0xff]  }
 0x1aa   :  { %v8005_v49 = vld [vmem:[#allocation5 + $0x12f4] ss:$8 sps:$4 sm:$0xff]  }
 0x1ab   :  { %5359 = vmatpush1.bf16.msra.mxu1 %v7826_v58  ;;  %v7916_v58 = vld [vmem:[#allocation5 + $0x610] ss:$8 sps:$4 sm:$0xff]  }
 0x1ac   :  { %5851 = vmatpush1.bf16.msra.mxu0 %v7829_v59  ;;  %5360 = vmatprep.subr.bf16.mxu1 %v7834_v60  ;;  %v7919_v59 = vld [vmem:[#allocation5 + $0x1210] ss:$8 sps:$4 sm:$0xff]   ;;  %v7924_v60 = vld [vmem:[#allocation5 + $0x624] ss:$8 sps:$4 sm:$0xff]  }
 0x1ad   :  { %5852 = vmatprep.subr.bf16.mxu0 %v7837_v61  ;;  %v7927_v61 = vld [vmem:[#allocation5 + $0x1224] ss:$8 sps:$4 sm:$0xff]  }
 0x1af   :  { %5361 = vmatpush1.bf16.msra.mxu1 %v7832_v62  ;;  %v7922_v62 = vld [vmem:[#allocation5 + $0x620] ss:$8 sps:$4 sm:$0xff]  }
 0x1b0   :  { %5853 = vmatpush1.bf16.msra.mxu0 %v7835_v63  ;;  %5362 = vmatprep.subr.bf16.mxu1 %v7840_v0  ;;  %v7925_v63 = vld [vmem:[#allocation5 + $0x1220] ss:$8 sps:$4 sm:$0xff]   ;;  %v7930_v0 = vld [vmem:[#allocation5 + $0x634] ss:$8 sps:$4 sm:$0xff]  }
 0x1b1   :  { %5854 = vmatprep.subr.bf16.mxu0 %v7843_v1  ;;  %v7933_v1 = vld [vmem:[#allocation5 + $0x1234] ss:$8 sps:$4 sm:$0xff]  }
 0x1b3   :  { %5363 = vmatpush1.bf16.msra.mxu1 %v7838_v2  ;;  %v7928_v2 = vld [vmem:[#allocation5 + $0x630] ss:$8 sps:$4 sm:$0xff]  }
 0x1b4   :  { %5855 = vmatpush1.bf16.msra.mxu0 %v7841_v3  ;;  %5364 = vmatprep.subr.bf16.mxu1 %v7846_v4  ;;  %v7931_v3 = vld [vmem:[#allocation5 + $0x1230] ss:$8 sps:$4 sm:$0xff]   ;;  %v7936_v4 = vld [vmem:[#allocation5 + $0x644] ss:$8 sps:$4 sm:$0xff]  }
 0x1b5   :  { %5856 = vmatprep.subr.bf16.mxu0 %v7849_v5  ;;  %v7939_v5 = vld [vmem:[#allocation5 + $0x1244] ss:$8 sps:$4 sm:$0xff]  }
 0x1b7   :  { %5365 = vmatpush1.bf16.msra.mxu1 %v7844_v6  ;;  %v7934_v6 = vld [vmem:[#allocation5 + $0x640] ss:$8 sps:$4 sm:$0xff]  }
 0x1b8   :  { %5857 = vmatpush1.bf16.msra.mxu0 %v7847_v7  ;;  %5366 = vmatprep.subr.bf16.mxu1 %v7852_v8  ;;  %v7937_v7 = vld [vmem:[#allocation5 + $0x1240] ss:$8 sps:$4 sm:$0xff]   ;;  %v7942_v8 = vld [vmem:[#allocation5 + $0x654] ss:$8 sps:$4 sm:$0xff]  }
 0x1b9   :  { %5858 = vmatprep.subr.bf16.mxu0 %v7855_v9  ;;  %v7945_v9 = vld [vmem:[#allocation5 + $0x1254] ss:$8 sps:$4 sm:$0xff]  }
 0x1bb   :  { %5367 = vmatpush1.bf16.msra.mxu1 %v7850_v10  ;;  %v7940_v10 = vld [vmem:[#allocation5 + $0x650] ss:$8 sps:$4 sm:$0xff]  }
 0x1bc   :  { %5859 = vmatpush1.bf16.msra.mxu0 %v7853_v11  ;;  %5368 = vmatprep.subr.bf16.mxu1 %v7858_v12  ;;  %v7943_v11 = vld [vmem:[#allocation5 + $0x1250] ss:$8 sps:$4 sm:$0xff]   ;;  %v7948_v12 = vld [vmem:[#allocation5 + $0x664] ss:$8 sps:$4 sm:$0xff]  }
 0x1bd   :  { %5860 = vmatprep.subr.bf16.mxu0 %v7861_v13  ;;  %v7951_v13 = vld [vmem:[#allocation5 + $0x1264] ss:$8 sps:$4 sm:$0xff]  }
 0x1bf   :  { %5369 = vmatpush1.bf16.msra.mxu1 %v7856_v14  ;;  %v7946_v14 = vld [vmem:[#allocation5 + $0x660] ss:$8 sps:$4 sm:$0xff]  }
 0x1c0   :  { %5861 = vmatpush1.bf16.msra.mxu0 %v7859_v15  ;;  %5370 = vmatprep.subr.bf16.mxu1 %v7864_v16  ;;  %v7949_v15 = vld [vmem:[#allocation5 + $0x1260] ss:$8 sps:$4 sm:$0xff]   ;;  %v7954_v16 = vld [vmem:[#allocation5 + $0x674] ss:$8 sps:$4 sm:$0xff]  }
 0x1c1   :  { %5862 = vmatprep.subr.bf16.mxu0 %v7867_v17  ;;  %v7957_v17 = vld [vmem:[#allocation5 + $0x1274] ss:$8 sps:$4 sm:$0xff]  }
 0x1c3   :  { %5371 = vmatpush1.bf16.msra.mxu1 %v7862_v18  ;;  %v7952_v18 = vld [vmem:[#allocation5 + $0x670] ss:$8 sps:$4 sm:$0xff]  }
 0x1c4   :  { %5863 = vmatpush1.bf16.msra.mxu0 %v7865_v19  ;;  %5372 = vmatprep.subr.bf16.mxu1 %v7870_v20  ;;  %v7955_v19 = vld [vmem:[#allocation5 + $0x1270] ss:$8 sps:$4 sm:$0xff]   ;;  %v7960_v20 = vld [vmem:[#allocation5 + $0x684] ss:$8 sps:$4 sm:$0xff]  }
 0x1c5   :  { %5864 = vmatprep.subr.bf16.mxu0 %v7873_v21  ;;  %v7963_v21 = vld [vmem:[#allocation5 + $0x1284] ss:$8 sps:$4 sm:$0xff]  }
 0x1c7   :  { %5373 = vmatpush1.bf16.msra.mxu1 %v7868_v22  ;;  %v7958_v22 = vld [vmem:[#allocation5 + $0x680] ss:$8 sps:$4 sm:$0xff]  }
 0x1c8   :  { %5865 = vmatpush1.bf16.msra.mxu0 %v7871_v23  ;;  %5374 = vmatprep.subr.bf16.mxu1 %v7876_v24  ;;  %v7961_v23 = vld [vmem:[#allocation5 + $0x1280] ss:$8 sps:$4 sm:$0xff]   ;;  %v7966_v24 = vld [vmem:[#allocation5 + $0x694] ss:$8 sps:$4 sm:$0xff]  }
 0x1c9   :  { %5866 = vmatprep.subr.bf16.mxu0 %v7879_v25  ;;  %v7969_v25 = vld [vmem:[#allocation5 + $0x1294] ss:$8 sps:$4 sm:$0xff]  }
 0x1cb   :  { %5375 = vmatpush1.bf16.msra.mxu1 %v7874_v26  ;;  %v7964_v26 = vld [vmem:[#allocation5 + $0x690] ss:$8 sps:$4 sm:$0xff]  }
 0x1cc   :  { %5867 = vmatpush1.bf16.msra.mxu0 %v7877_v27  ;;  %5376 = vmatprep.subr.bf16.mxu1 %v7882_v28  ;;  %v7967_v27 = vld [vmem:[#allocation5 + $0x1290] ss:$8 sps:$4 sm:$0xff]   ;;  %v7972_v28 = vld [vmem:[#allocation5 + $0x6a4] ss:$8 sps:$4 sm:$0xff]  }
 0x1cd   :  { %5868 = vmatprep.subr.bf16.mxu0 %v7885_v29  ;;  %v7975_v29 = vld [vmem:[#allocation5 + $0x12a4] ss:$8 sps:$4 sm:$0xff]  }
 0x1cf   :  { %5377 = vmatpush1.bf16.msra.mxu1 %v7880_v30  ;;  %v7970_v30 = vld [vmem:[#allocation5 + $0x6a0] ss:$8 sps:$4 sm:$0xff]  }
 0x1d0   :  { %5869 = vmatpush1.bf16.msra.mxu0 %v7883_v31  ;;  %5378 = vmatprep.subr.bf16.mxu1 %v7888_v32  ;;  %v7973_v31 = vld [vmem:[#allocation5 + $0x12a0] ss:$8 sps:$4 sm:$0xff]   ;;  %v7978_v32 = vld [vmem:[#allocation5 + $0x6b4] ss:$8 sps:$4 sm:$0xff]  }
 0x1d1   :  { %5870 = vmatprep.subr.bf16.mxu0 %v7891_v33  ;;  %v7981_v33 = vld [vmem:[#allocation5 + $0x12b4] ss:$8 sps:$4 sm:$0xff]  }
 0x1d3   :  { %5379 = vmatpush1.bf16.msra.mxu1 %v7886_v34  ;;  %v7976_v34 = vld [vmem:[#allocation5 + $0x6b0] ss:$8 sps:$4 sm:$0xff]  }
 0x1d4   :  { %5871 = vmatpush1.bf16.msra.mxu0 %v7889_v35  ;;  %5380 = vmatprep.subr.bf16.mxu1 %v7894_v36  ;;  %v7979_v35 = vld [vmem:[#allocation5 + $0x12b0] ss:$8 sps:$4 sm:$0xff]   ;;  %v7984_v36 = vld [vmem:[#allocation5 + $0x6c4] ss:$8 sps:$4 sm:$0xff]  }
 0x1d5   :  { %5872 = vmatprep.subr.bf16.mxu0 %v7897_v37  ;;  %v7987_v37 = vld [vmem:[#allocation5 + $0x12c4] ss:$8 sps:$4 sm:$0xff]  }
 0x1d7   :  { %5381 = vmatpush1.bf16.msra.mxu1 %v7892_v38  ;;  %v7982_v38 = vld [vmem:[#allocation5 + $0x6c0] ss:$8 sps:$4 sm:$0xff]  }
 0x1d8   :  { %5873 = vmatpush1.bf16.msra.mxu0 %v7895_v39  ;;  %5382 = vmatprep.subr.bf16.mxu1 %v7900_v40  ;;  %v7985_v39 = vld [vmem:[#allocation5 + $0x12c0] ss:$8 sps:$4 sm:$0xff]   ;;  %v7990_v40 = vld [vmem:[#allocation5 + $0x6d4] ss:$8 sps:$4 sm:$0xff]  }
 0x1d9   :  { %5874 = vmatprep.subr.bf16.mxu0 %v7903_v41  ;;  %v7993_v41 = vld [vmem:[#allocation5 + $0x12d4] ss:$8 sps:$4 sm:$0xff]  }
 0x1db   :  { %5383 = vmatpush1.bf16.msra.mxu1 %v7898_v44  ;;  %v7996_v44 = vld [vmem:[#allocation5 + $0x6e4] ss:$8 sps:$4 sm:$0xff]  }
 0x1dc   :  { %5875 = vmatpush1.bf16.msra.mxu0 %v7901_v45  ;;  %5393 = vmatprep.subr.bf16.mxu1 %v7909_v46  ;;  %v7999_v45 = vld [vmem:[#allocation5 + $0x12e4] ss:$8 sps:$4 sm:$0xff]   ;;  %v7994_v46 = vld [vmem:[#allocation5 + $0x6e0] ss:$8 sps:$4 sm:$0xff]  }
 0x1dd   :  { %5885 = vmatprep.subr.bf16.mxu0 %v7915_v47  ;;  %v7997_v47 = vld [vmem:[#allocation5 + $0x12e0] ss:$8 sps:$4 sm:$0xff]  }
 0x1de   :  { %5385 = vmatmul.mubr.bf16.vlgmr.msra.gmra.mrb[0].mxu1 %v295_v50  ;;  %v8006_v50 = vld [vmem:[#allocation2 + $0x30] ss:$200 sps:$4 sm:$0xff]  }
 0x1df   :  { %5877 = vmatmul.mubr.bf16.vlgmr.msra.gmra.mrb[0].mxu0 %v319_v51  ;;  %5394 = vmatpush1.bf16.msra.mxu1 %v7907_v52  ;;  %v8012_v51 = vld [vmem:[#allocation2 + $0x90] ss:$200 sps:$4 sm:$0xff]   ;;  %v8000_v52 = vld [vmem:[#allocation5 + $0x6f0] ss:$8 sps:$4 sm:$0xff]  }
 0x1e0   :  { %5886 = vmatpush1.bf16.msra.mxu0 %v7913_v53  ;;  %5395 = vmatprep.subr.bf16.mxu1 %v7918_v54  ;;  %v8003_v53 = vld [vmem:[#allocation5 + $0x12f0] ss:$8 sps:$4 sm:$0xff]   ;;  %v8011_v54 = vld [vmem:[#allocation5 + $0x704] ss:$8 sps:$4 sm:$0xff]  }
 0x1e1   :  { %5887 = vmatprep.subr.bf16.mxu0 %v7921_v55  ;;  %5425 = vmatprep.mubr.bf16.mxu1 %v298_v56  ;;  %v8017_v55 = vld [vmem:[#allocation5 + $0x1304] ss:$8 sps:$4 sm:$0xff]  }
 0x1e2   :  { %5917 = vmatprep.mubr.bf16.mxu0 %v322_v57  ;;  %v8110_v56 = vld [vmem:[#allocation2 + $0x3c] ss:$200 sps:$4 sm:$0xff]  }
 0x1e3   :  { %5396 = vmatpush1.bf16.msra.mxu1 %v7916_v58  ;;  %v8116_v57 = vld [vmem:[#allocation2 + $0x9c] ss:$200 sps:$4 sm:$0xff]   ;;  %v297_v58 = vpack.c.bf16 %v8006_v50, %v8006_v50  ;;  %v8090_v50 = vld [vmem:[#allocation5 + $0x7d0] ss:$8 sps:$4 sm:$0xff]  }
 0x1e4   :  { %5888 = vmatpush1.bf16.msra.mxu0 %v7919_v59  ;;  %5397 = vmatprep.subr.bf16.mxu1 %v7924_v60  ;;  %v321_v59 = vpack.c.bf16 %v8012_v51, %v8012_v51  ;;  %v8009_v60 = vld [vmem:[#allocation5 + $0x700] ss:$8 sps:$4 sm:$0xff]   ;;  %v8093_v51 = vld [vmem:[#allocation5 + $0x13d0] ss:$8 sps:$4 sm:$0xff]  }
 0x1e5   :  { %5889 = vmatprep.subr.bf16.mxu0 %v7927_v61  ;;  %v8015_v61 = vld [vmem:[#allocation5 + $0x1300] ss:$8 sps:$4 sm:$0xff]  }
 0x1e7   :  { %5398 = vmatpush1.bf16.msra.mxu1 %v7922_v62  ;;  %v8020_v62 = vld [vmem:[#allocation5 + $0x714] ss:$8 sps:$4 sm:$0xff]  }
 0x1e8   :  { %5890 = vmatpush1.bf16.msra.mxu0 %v7925_v63  ;;  %5399 = vmatprep.subr.bf16.mxu1 %v7930_v0  ;;  %v8023_v63 = vld [vmem:[#allocation5 + $0x1314] ss:$8 sps:$4 sm:$0xff]   ;;  %v300_v0 = vpack.c.bf16 %v8110_v56, %v8110_v56 }
 0x1e9   :  { %5891 = vmatprep.subr.bf16.mxu0 %v7933_v1  ;;  %v324_v1 = vpack.c.bf16 %v8116_v57, %v8116_v57  ;;  %v8104_v56 = vld [vmem:[#allocation5 + $0x7f4] ss:$8 sps:$4 sm:$0xff]  }
 0x1ea   :  { %v8107_v57 = vld [vmem:[#allocation5 + $0x13f4] ss:$8 sps:$4 sm:$0xff]  }
 0x1eb   :  { %5400 = vmatpush1.bf16.msra.mxu1 %v7928_v2  ;;  %v8018_v2 = vld [vmem:[#allocation5 + $0x710] ss:$8 sps:$4 sm:$0xff]  }
 0x1ec   :  { %5892 = vmatpush1.bf16.msra.mxu0 %v7931_v3  ;;  %5401 = vmatprep.subr.bf16.mxu1 %v7936_v4  ;;  %v8021_v3 = vld [vmem:[#allocation5 + $0x1310] ss:$8 sps:$4 sm:$0xff]   ;;  %v8026_v4 = vld [vmem:[#allocation5 + $0x724] ss:$8 sps:$4 sm:$0xff]  }
 0x1ed   :  { %5893 = vmatprep.subr.bf16.mxu0 %v7939_v5  ;;  %v8029_v5 = vld [vmem:[#allocation5 + $0x1324] ss:$8 sps:$4 sm:$0xff]  }
 0x1ef   :  { %5402 = vmatpush1.bf16.msra.mxu1 %v7934_v6  ;;  %v8024_v6 = vld [vmem:[#allocation5 + $0x720] ss:$8 sps:$4 sm:$0xff]  }
 0x1f0   :  { %5894 = vmatpush1.bf16.msra.mxu0 %v7937_v7  ;;  %5403 = vmatprep.subr.bf16.mxu1 %v7942_v8  ;;  %v8027_v7 = vld [vmem:[#allocation5 + $0x1320] ss:$8 sps:$4 sm:$0xff]   ;;  %v8032_v8 = vld [vmem:[#allocation5 + $0x734] ss:$8 sps:$4 sm:$0xff]  }
 0x1f1   :  { %5895 = vmatprep.subr.bf16.mxu0 %v7945_v9  ;;  %v8035_v9 = vld [vmem:[#allocation5 + $0x1334] ss:$8 sps:$4 sm:$0xff]  }
 0x1f3   :  { %5404 = vmatpush1.bf16.msra.mxu1 %v7940_v10  ;;  %v8030_v10 = vld [vmem:[#allocation5 + $0x730] ss:$8 sps:$4 sm:$0xff]  }
 0x1f4   :  { %5896 = vmatpush1.bf16.msra.mxu0 %v7943_v11  ;;  %5405 = vmatprep.subr.bf16.mxu1 %v7948_v12  ;;  %v8033_v11 = vld [vmem:[#allocation5 + $0x1330] ss:$8 sps:$4 sm:$0xff]   ;;  %v8038_v12 = vld [vmem:[#allocation5 + $0x744] ss:$8 sps:$4 sm:$0xff]  }
 0x1f5   :  { %5897 = vmatprep.subr.bf16.mxu0 %v7951_v13  ;;  %v8041_v13 = vld [vmem:[#allocation5 + $0x1344] ss:$8 sps:$4 sm:$0xff]  }
 0x1f7   :  { %5406 = vmatpush1.bf16.msra.mxu1 %v7946_v14  ;;  %v8036_v14 = vld [vmem:[#allocation5 + $0x740] ss:$8 sps:$4 sm:$0xff]  }
 0x1f8   :  { %5898 = vmatpush1.bf16.msra.mxu0 %v7949_v15  ;;  %5407 = vmatprep.subr.bf16.mxu1 %v7954_v16  ;;  %v8039_v15 = vld [vmem:[#allocation5 + $0x1340] ss:$8 sps:$4 sm:$0xff]   ;;  %v8044_v16 = vld [vmem:[#allocation5 + $0x754] ss:$8 sps:$4 sm:$0xff]  }
 0x1f9   :  { %5899 = vmatprep.subr.bf16.mxu0 %v7957_v17  ;;  %v8047_v17 = vld [vmem:[#allocation5 + $0x1354] ss:$8 sps:$4 sm:$0xff]  }
 0x1fb   :  { %5408 = vmatpush1.bf16.msra.mxu1 %v7952_v18  ;;  %v8042_v18 = vld [vmem:[#allocation5 + $0x750] ss:$8 sps:$4 sm:$0xff]  }
 0x1fc   :  { %5900 = vmatpush1.bf16.msra.mxu0 %v7955_v19  ;;  %5409 = vmatprep.subr.bf16.mxu1 %v7960_v20  ;;  %v8045_v19 = vld [vmem:[#allocation5 + $0x1350] ss:$8 sps:$4 sm:$0xff]   ;;  %v8050_v20 = vld [vmem:[#allocation5 + $0x764] ss:$8 sps:$4 sm:$0xff]  }
 0x1fd   :  { %5901 = vmatprep.subr.bf16.mxu0 %v7963_v21  ;;  %v8053_v21 = vld [vmem:[#allocation5 + $0x1364] ss:$8 sps:$4 sm:$0xff]  }
 0x1ff   :  { %5410 = vmatpush1.bf16.msra.mxu1 %v7958_v22  ;;  %v8048_v22 = vld [vmem:[#allocation5 + $0x760] ss:$8 sps:$4 sm:$0xff]  }
 0x200   :  { %5902 = vmatpush1.bf16.msra.mxu0 %v7961_v23  ;;  %5411 = vmatprep.subr.bf16.mxu1 %v7966_v24  ;;  %v8051_v23 = vld [vmem:[#allocation5 + $0x1360] ss:$8 sps:$4 sm:$0xff]   ;;  %v8056_v24 = vld [vmem:[#allocation5 + $0x774] ss:$8 sps:$4 sm:$0xff]  }
 0x201   :  { %5903 = vmatprep.subr.bf16.mxu0 %v7969_v25  ;;  %v8059_v25 = vld [vmem:[#allocation5 + $0x1374] ss:$8 sps:$4 sm:$0xff]  }
 0x203   :  { %5412 = vmatpush1.bf16.msra.mxu1 %v7964_v26  ;;  %v8054_v26 = vld [vmem:[#allocation5 + $0x770] ss:$8 sps:$4 sm:$0xff]  }
 0x204   :  { %5904 = vmatpush1.bf16.msra.mxu0 %v7967_v27  ;;  %5413 = vmatprep.subr.bf16.mxu1 %v7972_v28  ;;  %v8057_v27 = vld [vmem:[#allocation5 + $0x1370] ss:$8 sps:$4 sm:$0xff]   ;;  %v8062_v28 = vld [vmem:[#allocation5 + $0x784] ss:$8 sps:$4 sm:$0xff]  }
 0x205   :  { %5905 = vmatprep.subr.bf16.mxu0 %v7975_v29  ;;  %v8065_v29 = vld [vmem:[#allocation5 + $0x1384] ss:$8 sps:$4 sm:$0xff]  }
 0x207   :  { %5414 = vmatpush1.bf16.msra.mxu1 %v7970_v30  ;;  %v8060_v30 = vld [vmem:[#allocation5 + $0x780] ss:$8 sps:$4 sm:$0xff]  }
 0x208   :  { %5906 = vmatpush1.bf16.msra.mxu0 %v7973_v31  ;;  %5415 = vmatprep.subr.bf16.mxu1 %v7978_v32  ;;  %v8063_v31 = vld [vmem:[#allocation5 + $0x1380] ss:$8 sps:$4 sm:$0xff]   ;;  %v8068_v32 = vld [vmem:[#allocation5 + $0x794] ss:$8 sps:$4 sm:$0xff]  }
 0x209   :  { %5907 = vmatprep.subr.bf16.mxu0 %v7981_v33  ;;  %v8071_v33 = vld [vmem:[#allocation5 + $0x1394] ss:$8 sps:$4 sm:$0xff]  }
 0x20b   :  { %5416 = vmatpush1.bf16.msra.mxu1 %v7976_v34  ;;  %v8066_v34 = vld [vmem:[#allocation5 + $0x790] ss:$8 sps:$4 sm:$0xff]  }
 0x20c   :  { %5908 = vmatpush1.bf16.msra.mxu0 %v7979_v35  ;;  %5417 = vmatprep.subr.bf16.mxu1 %v7984_v36  ;;  %v8069_v35 = vld [vmem:[#allocation5 + $0x1390] ss:$8 sps:$4 sm:$0xff]   ;;  %v8074_v36 = vld [vmem:[#allocation5 + $0x7a4] ss:$8 sps:$4 sm:$0xff]  }
 0x20d   :  { %5909 = vmatprep.subr.bf16.mxu0 %v7987_v37  ;;  %v8077_v37 = vld [vmem:[#allocation5 + $0x13a4] ss:$8 sps:$4 sm:$0xff]  }
 0x20f   :  { %5418 = vmatpush1.bf16.msra.mxu1 %v7982_v38  ;;  %v8072_v38 = vld [vmem:[#allocation5 + $0x7a0] ss:$8 sps:$4 sm:$0xff]  }
 0x210   :  { %5910 = vmatpush1.bf16.msra.mxu0 %v7985_v39  ;;  %5419 = vmatprep.subr.bf16.mxu1 %v7990_v40  ;;  %v8075_v39 = vld [vmem:[#allocation5 + $0x13a0] ss:$8 sps:$4 sm:$0xff]   ;;  %v8080_v40 = vld [vmem:[#allocation5 + $0x7b4] ss:$8 sps:$4 sm:$0xff]  }
 0x211   :  { %5911 = vmatprep.subr.bf16.mxu0 %v7993_v41  ;;  %v8083_v41 = vld [vmem:[#allocation5 + $0x13b4] ss:$8 sps:$4 sm:$0xff]  }
 0x213   :  { %5420 = vmatpush1.bf16.msra.mxu1 %v7988_v42  ;;  %v8078_v42 = vld [vmem:[#allocation5 + $0x7b0] ss:$8 sps:$4 sm:$0xff]  }
 0x214   :  { %5912 = vmatpush1.bf16.msra.mxu0 %v7991_v43  ;;  %5421 = vmatprep.subr.bf16.mxu1 %v7996_v44  ;;  %v8081_v43 = vld [vmem:[#allocation5 + $0x13b0] ss:$8 sps:$4 sm:$0xff]   ;;  %v8086_v44 = vld [vmem:[#allocation5 + $0x7c4] ss:$8 sps:$4 sm:$0xff]  }
 0x215   :  { %5913 = vmatprep.subr.bf16.mxu0 %v7999_v45  ;;  %v8089_v45 = vld [vmem:[#allocation5 + $0x13c4] ss:$8 sps:$4 sm:$0xff]  }
 0x217   :  { %5422 = vmatpush1.bf16.msra.mxu1 %v7994_v46  ;;  %v8084_v46 = vld [vmem:[#allocation5 + $0x7c0] ss:$8 sps:$4 sm:$0xff]  }
 0x218   :  { %5914 = vmatpush1.bf16.msra.mxu0 %v7997_v47  ;;  %5423 = vmatprep.subr.bf16.mxu1 %v8002_v48  ;;  %v8087_v47 = vld [vmem:[#allocation5 + $0x13c0] ss:$8 sps:$4 sm:$0xff]   ;;  %v8092_v48 = vld [vmem:[#allocation5 + $0x7d4] ss:$8 sps:$4 sm:$0xff]  }
 0x219   :  { %5915 = vmatprep.subr.bf16.mxu0 %v8005_v49  ;;  %v8095_v49 = vld [vmem:[#allocation5 + $0x13d4] ss:$8 sps:$4 sm:$0xff]  }
 0x21b   :  { %5424 = vmatpush1.bf16.msra.mxu1 %v8000_v52  ;;  %v8098_v52 = vld [vmem:[#allocation5 + $0x7e4] ss:$8 sps:$4 sm:$0xff]  }
 0x21c   :  { %5916 = vmatpush1.bf16.msra.mxu0 %v8003_v53  ;;  %5434 = vmatprep.subr.bf16.mxu1 %v8011_v54  ;;  %v8101_v53 = vld [vmem:[#allocation5 + $0x13e4] ss:$8 sps:$4 sm:$0xff]   ;;  %v8096_v54 = vld [vmem:[#allocation5 + $0x7e0] ss:$8 sps:$4 sm:$0xff]  }
 0x21d   :  { %5926 = vmatprep.subr.bf16.mxu0 %v8017_v55  ;;  %v8099_v55 = vld [vmem:[#allocation5 + $0x13e0] ss:$8 sps:$4 sm:$0xff]  }
 0x21e   :  { %5426 = vmatmul.mubr.bf16.vlgmr.msra.gmra.mrb[0].mxu1 %v297_v58  ;;  %v8108_v58 = vld [vmem:[#allocation2 + $0x38] ss:$200 sps:$4 sm:$0xff]  }
 0x21f   :  { %5918 = vmatmul.mubr.bf16.vlgmr.msra.gmra.mrb[0].mxu0 %v321_v59  ;;  %5435 = vmatpush1.bf16.msra.mxu1 %v8009_v60  ;;  %v8114_v59 = vld [vmem:[#allocation2 + $0x98] ss:$200 sps:$4 sm:$0xff]  }
 0x220   :  { %5927 = vmatpush1.bf16.msra.mxu0 %v8015_v61  ;;  %5436 = vmatprep.subr.bf16.mxu1 %v8020_v62  ;;  %v8102_v60 = vld [vmem:[#allocation5 + $0x7f0] ss:$8 sps:$4 sm:$0xff]   ;;  %v8113_v62 = vld [vmem:[#allocation5 + $0x804] ss:$8 sps:$4 sm:$0xff]  }
 0x221   :  { %5928 = vmatprep.subr.bf16.mxu0 %v8023_v63  ;;  %5466 = vmatprep.mubr.bf16.mxu1 %v300_v0  ;;  %v8105_v61 = vld [vmem:[#allocation5 + $0x13f0] ss:$8 sps:$4 sm:$0xff]   ;;  %v8119_v63 = vld [vmem:[#allocation5 + $0x1404] ss:$8 sps:$4 sm:$0xff]   ;;  %v8212_v0 = vld [vmem:[#allocation2 + $0x44] ss:$200 sps:$4 sm:$0xff]  }
 0x222   :  { %5958 = vmatprep.mubr.bf16.mxu0 %v324_v1  ;;  %v8218_v1 = vld [vmem:[#allocation2 + $0xa4] ss:$200 sps:$4 sm:$0xff]  }
 0x223   :  { %5437 = vmatpush1.bf16.msra.mxu1 %v8018_v2  ;;  %v299_v2 = vpack.c.bf16 %v8108_v58, %v8108_v58  ;;  %v8192_v58 = vld [vmem:[#allocation5 + $0x8d0] ss:$8 sps:$4 sm:$0xff]  }
 0x224   :  { %5929 = vmatpush1.bf16.msra.mxu0 %v8021_v3  ;;  %5438 = vmatprep.subr.bf16.mxu1 %v8026_v4  ;;  %v323_v3 = vpack.c.bf16 %v8114_v59, %v8114_v59  ;;  %v8111_v4 = vld [vmem:[#allocation5 + $0x800] ss:$8 sps:$4 sm:$0xff]   ;;  %v8195_v59 = vld [vmem:[#allocation5 + $0x14d0] ss:$8 sps:$4 sm:$0xff]  }
 0x225   :  { %5930 = vmatprep.subr.bf16.mxu0 %v8029_v5  ;;  %v8117_v5 = vld [vmem:[#allocation5 + $0x1400] ss:$8 sps:$4 sm:$0xff]  }
 0x227   :  { %5439 = vmatpush1.bf16.msra.mxu1 %v8024_v6  ;;  %v8122_v6 = vld [vmem:[#allocation5 + $0x814] ss:$8 sps:$4 sm:$0xff]  }
 0x228   :  { %5931 = vmatpush1.bf16.msra.mxu0 %v8027_v7  ;;  %5440 = vmatprep.subr.bf16.mxu1 %v8032_v8  ;;  %v8125_v7 = vld [vmem:[#allocation5 + $0x1414] ss:$8 sps:$4 sm:$0xff]   ;;  %v302_v8 = vpack.c.bf16 %v8212_v0, %v8212_v0 }
 0x229   :  { %5932 = vmatprep.subr.bf16.mxu0 %v8035_v9  ;;  %v326_v9 = vpack.c.bf16 %v8218_v1, %v8218_v1  ;;  %v8206_v0 = vld [vmem:[#allocation5 + $0x8f4] ss:$8 sps:$4 sm:$0xff]  }
 0x22a   :  { %v8209_v1 = vld [vmem:[#allocation5 + $0x14f4] ss:$8 sps:$4 sm:$0xff]  }
 0x22b   :  { %5441 = vmatpush1.bf16.msra.mxu1 %v8030_v10  ;;  %v8120_v10 = vld [vmem:[#allocation5 + $0x810] ss:$8 sps:$4 sm:$0xff]  }
 0x22c   :  { %5933 = vmatpush1.bf16.msra.mxu0 %v8033_v11  ;;  %5442 = vmatprep.subr.bf16.mxu1 %v8038_v12  ;;  %v8123_v11 = vld [vmem:[#allocation5 + $0x1410] ss:$8 sps:$4 sm:$0xff]   ;;  %v8128_v12 = vld [vmem:[#allocation5 + $0x824] ss:$8 sps:$4 sm:$0xff]  }
 0x22d   :  { %5934 = vmatprep.subr.bf16.mxu0 %v8041_v13  ;;  %v8131_v13 = vld [vmem:[#allocation5 + $0x1424] ss:$8 sps:$4 sm:$0xff]  }
 0x22f   :  { %5443 = vmatpush1.bf16.msra.mxu1 %v8036_v14  ;;  %v8126_v14 = vld [vmem:[#allocation5 + $0x820] ss:$8 sps:$4 sm:$0xff]  }
 0x230   :  { %5935 = vmatpush1.bf16.msra.mxu0 %v8039_v15  ;;  %5444 = vmatprep.subr.bf16.mxu1 %v8044_v16  ;;  %v8129_v15 = vld [vmem:[#allocation5 + $0x1420] ss:$8 sps:$4 sm:$0xff]   ;;  %v8134_v16 = vld [vmem:[#allocation5 + $0x834] ss:$8 sps:$4 sm:$0xff]  }
 0x231   :  { %5936 = vmatprep.subr.bf16.mxu0 %v8047_v17  ;;  %v8137_v17 = vld [vmem:[#allocation5 + $0x1434] ss:$8 sps:$4 sm:$0xff]  }
 0x233   :  { %5445 = vmatpush1.bf16.msra.mxu1 %v8042_v18  ;;  %v8132_v18 = vld [vmem:[#allocation5 + $0x830] ss:$8 sps:$4 sm:$0xff]  }
 0x234   :  { %5937 = vmatpush1.bf16.msra.mxu0 %v8045_v19  ;;  %5446 = vmatprep.subr.bf16.mxu1 %v8050_v20  ;;  %v8135_v19 = vld [vmem:[#allocation5 + $0x1430] ss:$8 sps:$4 sm:$0xff]   ;;  %v8140_v20 = vld [vmem:[#allocation5 + $0x844] ss:$8 sps:$4 sm:$0xff]  }
 0x235   :  { %5938 = vmatprep.subr.bf16.mxu0 %v8053_v21  ;;  %v8143_v21 = vld [vmem:[#allocation5 + $0x1444] ss:$8 sps:$4 sm:$0xff]  }
 0x237   :  { %5447 = vmatpush1.bf16.msra.mxu1 %v8048_v22  ;;  %v8138_v22 = vld [vmem:[#allocation5 + $0x840] ss:$8 sps:$4 sm:$0xff]  }
 0x238   :  { %5939 = vmatpush1.bf16.msra.mxu0 %v8051_v23  ;;  %5448 = vmatprep.subr.bf16.mxu1 %v8056_v24  ;;  %v8141_v23 = vld [vmem:[#allocation5 + $0x1440] ss:$8 sps:$4 sm:$0xff]   ;;  %v8146_v24 = vld [vmem:[#allocation5 + $0x854] ss:$8 sps:$4 sm:$0xff]  }
 0x239   :  { %5940 = vmatprep.subr.bf16.mxu0 %v8059_v25  ;;  %v8149_v25 = vld [vmem:[#allocation5 + $0x1454] ss:$8 sps:$4 sm:$0xff]  }
 0x23b   :  { %5449 = vmatpush1.bf16.msra.mxu1 %v8054_v26  ;;  %v8144_v26 = vld [vmem:[#allocation5 + $0x850] ss:$8 sps:$4 sm:$0xff]  }
 0x23c   :  { %5941 = vmatpush1.bf16.msra.mxu0 %v8057_v27  ;;  %5450 = vmatprep.subr.bf16.mxu1 %v8062_v28  ;;  %v8147_v27 = vld [vmem:[#allocation5 + $0x1450] ss:$8 sps:$4 sm:$0xff]   ;;  %v8152_v28 = vld [vmem:[#allocation5 + $0x864] ss:$8 sps:$4 sm:$0xff]  }
 0x23d   :  { %5942 = vmatprep.subr.bf16.mxu0 %v8065_v29  ;;  %v8155_v29 = vld [vmem:[#allocation5 + $0x1464] ss:$8 sps:$4 sm:$0xff]  }
 0x23f   :  { %5451 = vmatpush1.bf16.msra.mxu1 %v8060_v30  ;;  %v8150_v30 = vld [vmem:[#allocation5 + $0x860] ss:$8 sps:$4 sm:$0xff]  }
 0x240   :  { %5943 = vmatpush1.bf16.msra.mxu0 %v8063_v31  ;;  %5452 = vmatprep.subr.bf16.mxu1 %v8068_v32  ;;  %v8153_v31 = vld [vmem:[#allocation5 + $0x1460] ss:$8 sps:$4 sm:$0xff]   ;;  %v8158_v32 = vld [vmem:[#allocation5 + $0x874] ss:$8 sps:$4 sm:$0xff]  }
 0x241   :  { %5944 = vmatprep.subr.bf16.mxu0 %v8071_v33  ;;  %v8161_v33 = vld [vmem:[#allocation5 + $0x1474] ss:$8 sps:$4 sm:$0xff]  }
 0x243   :  { %5453 = vmatpush1.bf16.msra.mxu1 %v8066_v34  ;;  %v8156_v34 = vld [vmem:[#allocation5 + $0x870] ss:$8 sps:$4 sm:$0xff]  }
 0x244   :  { %5945 = vmatpush1.bf16.msra.mxu0 %v8069_v35  ;;  %5454 = vmatprep.subr.bf16.mxu1 %v8074_v36  ;;  %v8159_v35 = vld [vmem:[#allocation5 + $0x1470] ss:$8 sps:$4 sm:$0xff]   ;;  %v8164_v36 = vld [vmem:[#allocation5 + $0x884] ss:$8 sps:$4 sm:$0xff]  }
 0x245   :  { %5946 = vmatprep.subr.bf16.mxu0 %v8077_v37  ;;  %v8167_v37 = vld [vmem:[#allocation5 + $0x1484] ss:$8 sps:$4 sm:$0xff]  }
 0x247   :  { %5455 = vmatpush1.bf16.msra.mxu1 %v8072_v38  ;;  %v8162_v38 = vld [vmem:[#allocation5 + $0x880] ss:$8 sps:$4 sm:$0xff]  }
 0x248   :  { %5947 = vmatpush1.bf16.msra.mxu0 %v8075_v39  ;;  %5456 = vmatprep.subr.bf16.mxu1 %v8080_v40  ;;  %v8165_v39 = vld [vmem:[#allocation5 + $0x1480] ss:$8 sps:$4 sm:$0xff]   ;;  %v8170_v40 = vld [vmem:[#allocation5 + $0x894] ss:$8 sps:$4 sm:$0xff]  }
 0x249   :  { %5948 = vmatprep.subr.bf16.mxu0 %v8083_v41  ;;  %v8173_v41 = vld [vmem:[#allocation5 + $0x1494] ss:$8 sps:$4 sm:$0xff]  }
 0x24b   :  { %5457 = vmatpush1.bf16.msra.mxu1 %v8078_v42  ;;  %v8168_v42 = vld [vmem:[#allocation5 + $0x890] ss:$8 sps:$4 sm:$0xff]  }
 0x24c   :  { %5949 = vmatpush1.bf16.msra.mxu0 %v8081_v43  ;;  %5458 = vmatprep.subr.bf16.mxu1 %v8086_v44  ;;  %v8171_v43 = vld [vmem:[#allocation5 + $0x1490] ss:$8 sps:$4 sm:$0xff]   ;;  %v8176_v44 = vld [vmem:[#allocation5 + $0x8a4] ss:$8 sps:$4 sm:$0xff]  }
 0x24d   :  { %5950 = vmatprep.subr.bf16.mxu0 %v8089_v45  ;;  %v8179_v45 = vld [vmem:[#allocation5 + $0x14a4] ss:$8 sps:$4 sm:$0xff]  }
 0x24f   :  { %5459 = vmatpush1.bf16.msra.mxu1 %v8084_v46  ;;  %v8174_v46 = vld [vmem:[#allocation5 + $0x8a0] ss:$8 sps:$4 sm:$0xff]  }
 0x250   :  { %5951 = vmatpush1.bf16.msra.mxu0 %v8087_v47  ;;  %5460 = vmatprep.subr.bf16.mxu1 %v8092_v48  ;;  %v8177_v47 = vld [vmem:[#allocation5 + $0x14a0] ss:$8 sps:$4 sm:$0xff]   ;;  %v8182_v48 = vld [vmem:[#allocation5 + $0x8b4] ss:$8 sps:$4 sm:$0xff]  }
 0x251   :  { %5952 = vmatprep.subr.bf16.mxu0 %v8095_v49  ;;  %v8185_v49 = vld [vmem:[#allocation5 + $0x14b4] ss:$8 sps:$4 sm:$0xff]  }
 0x253   :  { %5461 = vmatpush1.bf16.msra.mxu1 %v8090_v50  ;;  %v8180_v50 = vld [vmem:[#allocation5 + $0x8b0] ss:$8 sps:$4 sm:$0xff]  }
 0x254   :  { %5953 = vmatpush1.bf16.msra.mxu0 %v8093_v51  ;;  %5462 = vmatprep.subr.bf16.mxu1 %v8098_v52  ;;  %v8183_v51 = vld [vmem:[#allocation5 + $0x14b0] ss:$8 sps:$4 sm:$0xff]   ;;  %v8188_v52 = vld [vmem:[#allocation5 + $0x8c4] ss:$8 sps:$4 sm:$0xff]  }
 0x255   :  { %5954 = vmatprep.subr.bf16.mxu0 %v8101_v53  ;;  %v8191_v53 = vld [vmem:[#allocation5 + $0x14c4] ss:$8 sps:$4 sm:$0xff]  }
 0x257   :  { %5463 = vmatpush1.bf16.msra.mxu1 %v8096_v54  ;;  %v8186_v54 = vld [vmem:[#allocation5 + $0x8c0] ss:$8 sps:$4 sm:$0xff]  }
 0x258   :  { %5955 = vmatpush1.bf16.msra.mxu0 %v8099_v55  ;;  %5464 = vmatprep.subr.bf16.mxu1 %v8104_v56  ;;  %v8189_v55 = vld [vmem:[#allocation5 + $0x14c0] ss:$8 sps:$4 sm:$0xff]   ;;  %v8194_v56 = vld [vmem:[#allocation5 + $0x8d4] ss:$8 sps:$4 sm:$0xff]  }
 0x259   :  { %5956 = vmatprep.subr.bf16.mxu0 %v8107_v57  ;;  %v8197_v57 = vld [vmem:[#allocation5 + $0x14d4] ss:$8 sps:$4 sm:$0xff]  }
 0x25b   :  { %5465 = vmatpush1.bf16.msra.mxu1 %v8102_v60  ;;  %v8200_v60 = vld [vmem:[#allocation5 + $0x8e4] ss:$8 sps:$4 sm:$0xff]  }
 0x25c   :  { %5957 = vmatpush1.bf16.msra.mxu0 %v8105_v61  ;;  %5475 = vmatprep.subr.bf16.mxu1 %v8113_v62  ;;  %v8203_v61 = vld [vmem:[#allocation5 + $0x14e4] ss:$8 sps:$4 sm:$0xff]   ;;  %v8198_v62 = vld [vmem:[#allocation5 + $0x8e0] ss:$8 sps:$4 sm:$0xff]  }
 0x25d   :  { %5967 = vmatprep.subr.bf16.mxu0 %v8119_v63  ;;  %v8201_v63 = vld [vmem:[#allocation5 + $0x14e0] ss:$8 sps:$4 sm:$0xff]  }
 0x25e   :  { %5467 = vmatmul.mubr.bf16.vlgmr.msra.gmra.mrb[0].mxu1 %v299_v2  ;;  %v8210_v2 = vld [vmem:[#allocation2 + $0x40] ss:$200 sps:$4 sm:$0xff]  }
 0x25f   :  { %5959 = vmatmul.mubr.bf16.vlgmr.msra.gmra.mrb[0].mxu0 %v323_v3  ;;  %5476 = vmatpush1.bf16.msra.mxu1 %v8111_v4  ;;  %v8216_v3 = vld [vmem:[#allocation2 + $0xa0] ss:$200 sps:$4 sm:$0xff]  }
 0x260   :  { %5968 = vmatpush1.bf16.msra.mxu0 %v8117_v5  ;;  %5477 = vmatprep.subr.bf16.mxu1 %v8122_v6  ;;  %v8204_v4 = vld [vmem:[#allocation5 + $0x8f0] ss:$8 sps:$4 sm:$0xff]   ;;  %v8215_v6 = vld [vmem:[#allocation5 + $0x904] ss:$8 sps:$4 sm:$0xff]  }
 0x261   :  { %5969 = vmatprep.subr.bf16.mxu0 %v8125_v7  ;;  %5507 = vmatprep.mubr.bf16.mxu1 %v302_v8  ;;  %v8207_v5 = vld [vmem:[#allocation5 + $0x14f0] ss:$8 sps:$4 sm:$0xff]   ;;  %v8221_v7 = vld [vmem:[#allocation5 + $0x1504] ss:$8 sps:$4 sm:$0xff]  }
 0x262   :  { %5999 = vmatprep.mubr.bf16.mxu0 %v326_v9  ;;  %v8314_v8 = vld [vmem:[#allocation2 + $0x4c] ss:$200 sps:$4 sm:$0xff]  }
 0x263   :  { %5478 = vmatpush1.bf16.msra.mxu1 %v8120_v10  ;;  %v8320_v9 = vld [vmem:[#allocation2 + $0xac] ss:$200 sps:$4 sm:$0xff]   ;;  %v301_v10 = vpack.c.bf16 %v8210_v2, %v8210_v2  ;;  %v8294_v2 = vld [vmem:[#allocation5 + $0x9d0] ss:$8 sps:$4 sm:$0xff]  }
 0x264   :  { %5970 = vmatpush1.bf16.msra.mxu0 %v8123_v11  ;;  %5479 = vmatprep.subr.bf16.mxu1 %v8128_v12  ;;  %v325_v11 = vpack.c.bf16 %v8216_v3, %v8216_v3  ;;  %v8213_v12 = vld [vmem:[#allocation5 + $0x900] ss:$8 sps:$4 sm:$0xff]   ;;  %v8297_v3 = vld [vmem:[#allocation5 + $0x15d0] ss:$8 sps:$4 sm:$0xff]  }
 0x265   :  { %5971 = vmatprep.subr.bf16.mxu0 %v8131_v13  ;;  %v8219_v13 = vld [vmem:[#allocation5 + $0x1500] ss:$8 sps:$4 sm:$0xff]  }
 0x267   :  { %5480 = vmatpush1.bf16.msra.mxu1 %v8126_v14  ;;  %v8224_v14 = vld [vmem:[#allocation5 + $0x914] ss:$8 sps:$4 sm:$0xff]  }
 0x268   :  { %5972 = vmatpush1.bf16.msra.mxu0 %v8129_v15  ;;  %5481 = vmatprep.subr.bf16.mxu1 %v8134_v16  ;;  %v8227_v15 = vld [vmem:[#allocation5 + $0x1514] ss:$8 sps:$4 sm:$0xff]   ;;  %v304_v16 = vpack.c.bf16 %v8314_v8, %v8314_v8 }
 0x269   :  { %5973 = vmatprep.subr.bf16.mxu0 %v8137_v17  ;;  %v328_v17 = vpack.c.bf16 %v8320_v9, %v8320_v9  ;;  %v8308_v8 = vld [vmem:[#allocation5 + $0x9f4] ss:$8 sps:$4 sm:$0xff]  }
 0x26a   :  { %v8311_v9 = vld [vmem:[#allocation5 + $0x15f4] ss:$8 sps:$4 sm:$0xff]  }
 0x26b   :  { %5482 = vmatpush1.bf16.msra.mxu1 %v8132_v18  ;;  %v8222_v18 = vld [vmem:[#allocation5 + $0x910] ss:$8 sps:$4 sm:$0xff]  }
 0x26c   :  { %5974 = vmatpush1.bf16.msra.mxu0 %v8135_v19  ;;  %5483 = vmatprep.subr.bf16.mxu1 %v8140_v20  ;;  %v8225_v19 = vld [vmem:[#allocation5 + $0x1510] ss:$8 sps:$4 sm:$0xff]   ;;  %v8230_v20 = vld [vmem:[#allocation5 + $0x924] ss:$8 sps:$4 sm:$0xff]  }
 0x26d   :  { %5975 = vmatprep.subr.bf16.mxu0 %v8143_v21  ;;  %v8233_v21 = vld [vmem:[#allocation5 + $0x1524] ss:$8 sps:$4 sm:$0xff]  }
 0x26f   :  { %5484 = vmatpush1.bf16.msra.mxu1 %v8138_v22  ;;  %v8228_v22 = vld [vmem:[#allocation5 + $0x920] ss:$8 sps:$4 sm:$0xff]  }
 0x270   :  { %5976 = vmatpush1.bf16.msra.mxu0 %v8141_v23  ;;  %5485 = vmatprep.subr.bf16.mxu1 %v8146_v24  ;;  %v8231_v23 = vld [vmem:[#allocation5 + $0x1520] ss:$8 sps:$4 sm:$0xff]   ;;  %v8236_v24 = vld [vmem:[#allocation5 + $0x934] ss:$8 sps:$4 sm:$0xff]  }
 0x271   :  { %5977 = vmatprep.subr.bf16.mxu0 %v8149_v25  ;;  %v8239_v25 = vld [vmem:[#allocation5 + $0x1534] ss:$8 sps:$4 sm:$0xff]  }
 0x273   :  { %5486 = vmatpush1.bf16.msra.mxu1 %v8144_v26  ;;  %v8234_v26 = vld [vmem:[#allocation5 + $0x930] ss:$8 sps:$4 sm:$0xff]  }
 0x274   :  { %5978 = vmatpush1.bf16.msra.mxu0 %v8147_v27  ;;  %5487 = vmatprep.subr.bf16.mxu1 %v8152_v28  ;;  %v8237_v27 = vld [vmem:[#allocation5 + $0x1530] ss:$8 sps:$4 sm:$0xff]   ;;  %v8242_v28 = vld [vmem:[#allocation5 + $0x944] ss:$8 sps:$4 sm:$0xff]  }
 0x275   :  { %5979 = vmatprep.subr.bf16.mxu0 %v8155_v29  ;;  %v8245_v29 = vld [vmem:[#allocation5 + $0x1544] ss:$8 sps:$4 sm:$0xff]  }
 0x277   :  { %5488 = vmatpush1.bf16.msra.mxu1 %v8150_v30  ;;  %v8240_v30 = vld [vmem:[#allocation5 + $0x940] ss:$8 sps:$4 sm:$0xff]  }
 0x278   :  { %5980 = vmatpush1.bf16.msra.mxu0 %v8153_v31  ;;  %5489 = vmatprep.subr.bf16.mxu1 %v8158_v32  ;;  %v8243_v31 = vld [vmem:[#allocation5 + $0x1540] ss:$8 sps:$4 sm:$0xff]   ;;  %v8248_v32 = vld [vmem:[#allocation5 + $0x954] ss:$8 sps:$4 sm:$0xff]  }
 0x279   :  { %5981 = vmatprep.subr.bf16.mxu0 %v8161_v33  ;;  %v8251_v33 = vld [vmem:[#allocation5 + $0x1554] ss:$8 sps:$4 sm:$0xff]  }
 0x27b   :  { %5490 = vmatpush1.bf16.msra.mxu1 %v8156_v34  ;;  %v8246_v34 = vld [vmem:[#allocation5 + $0x950] ss:$8 sps:$4 sm:$0xff]  }
 0x27c   :  { %5982 = vmatpush1.bf16.msra.mxu0 %v8159_v35  ;;  %5491 = vmatprep.subr.bf16.mxu1 %v8164_v36  ;;  %v8249_v35 = vld [vmem:[#allocation5 + $0x1550] ss:$8 sps:$4 sm:$0xff]   ;;  %v8254_v36 = vld [vmem:[#allocation5 + $0x964] ss:$8 sps:$4 sm:$0xff]  }
 0x27d   :  { %5983 = vmatprep.subr.bf16.mxu0 %v8167_v37  ;;  %v8257_v37 = vld [vmem:[#allocation5 + $0x1564] ss:$8 sps:$4 sm:$0xff]  }
 0x27f   :  { %5492 = vmatpush1.bf16.msra.mxu1 %v8162_v38  ;;  %v8252_v38 = vld [vmem:[#allocation5 + $0x960] ss:$8 sps:$4 sm:$0xff]  }
 0x280   :  { %5984 = vmatpush1.bf16.msra.mxu0 %v8165_v39  ;;  %5493 = vmatprep.subr.bf16.mxu1 %v8170_v40  ;;  %v8255_v39 = vld [vmem:[#allocation5 + $0x1560] ss:$8 sps:$4 sm:$0xff]   ;;  %v8260_v40 = vld [vmem:[#allocation5 + $0x974] ss:$8 sps:$4 sm:$0xff]  }
 0x281   :  { %5985 = vmatprep.subr.bf16.mxu0 %v8173_v41  ;;  %v8263_v41 = vld [vmem:[#allocation5 + $0x1574] ss:$8 sps:$4 sm:$0xff]  }
 0x283   :  { %5494 = vmatpush1.bf16.msra.mxu1 %v8168_v42  ;;  %v8258_v42 = vld [vmem:[#allocation5 + $0x970] ss:$8 sps:$4 sm:$0xff]  }
 0x284   :  { %5986 = vmatpush1.bf16.msra.mxu0 %v8171_v43  ;;  %5495 = vmatprep.subr.bf16.mxu1 %v8176_v44  ;;  %v8261_v43 = vld [vmem:[#allocation5 + $0x1570] ss:$8 sps:$4 sm:$0xff]   ;;  %v8266_v44 = vld [vmem:[#allocation5 + $0x984] ss:$8 sps:$4 sm:$0xff]  }
 0x285   :  { %5987 = vmatprep.subr.bf16.mxu0 %v8179_v45  ;;  %v8269_v45 = vld [vmem:[#allocation5 + $0x1584] ss:$8 sps:$4 sm:$0xff]  }
 0x287   :  { %5496 = vmatpush1.bf16.msra.mxu1 %v8174_v46  ;;  %v8264_v46 = vld [vmem:[#allocation5 + $0x980] ss:$8 sps:$4 sm:$0xff]  }
 0x288   :  { %5988 = vmatpush1.bf16.msra.mxu0 %v8177_v47  ;;  %5497 = vmatprep.subr.bf16.mxu1 %v8182_v48  ;;  %v8267_v47 = vld [vmem:[#allocation5 + $0x1580] ss:$8 sps:$4 sm:$0xff]   ;;  %v8272_v48 = vld [vmem:[#allocation5 + $0x994] ss:$8 sps:$4 sm:$0xff]  }
 0x289   :  { %5989 = vmatprep.subr.bf16.mxu0 %v8185_v49  ;;  %v8275_v49 = vld [vmem:[#allocation5 + $0x1594] ss:$8 sps:$4 sm:$0xff]  }
 0x28b   :  { %5498 = vmatpush1.bf16.msra.mxu1 %v8180_v50  ;;  %v8270_v50 = vld [vmem:[#allocation5 + $0x990] ss:$8 sps:$4 sm:$0xff]  }
 0x28c   :  { %5990 = vmatpush1.bf16.msra.mxu0 %v8183_v51  ;;  %5499 = vmatprep.subr.bf16.mxu1 %v8188_v52  ;;  %v8273_v51 = vld [vmem:[#allocation5 + $0x1590] ss:$8 sps:$4 sm:$0xff]   ;;  %v8278_v52 = vld [vmem:[#allocation5 + $0x9a4] ss:$8 sps:$4 sm:$0xff]  }
 0x28d   :  { %5991 = vmatprep.subr.bf16.mxu0 %v8191_v53  ;;  %v8281_v53 = vld [vmem:[#allocation5 + $0x15a4] ss:$8 sps:$4 sm:$0xff]  }
 0x28f   :  { %5500 = vmatpush1.bf16.msra.mxu1 %v8186_v54  ;;  %v8276_v54 = vld [vmem:[#allocation5 + $0x9a0] ss:$8 sps:$4 sm:$0xff]  }
 0x290   :  { %5992 = vmatpush1.bf16.msra.mxu0 %v8189_v55  ;;  %5501 = vmatprep.subr.bf16.mxu1 %v8194_v56  ;;  %v8279_v55 = vld [vmem:[#allocation5 + $0x15a0] ss:$8 sps:$4 sm:$0xff]   ;;  %v8284_v56 = vld [vmem:[#allocation5 + $0x9b4] ss:$8 sps:$4 sm:$0xff]  }
 0x291   :  { %5993 = vmatprep.subr.bf16.mxu0 %v8197_v57  ;;  %v8287_v57 = vld [vmem:[#allocation5 + $0x15b4] ss:$8 sps:$4 sm:$0xff]  }
 0x293   :  { %5502 = vmatpush1.bf16.msra.mxu1 %v8192_v58  ;;  %v8282_v58 = vld [vmem:[#allocation5 + $0x9b0] ss:$8 sps:$4 sm:$0xff]  }
 0x294   :  { %5994 = vmatpush1.bf16.msra.mxu0 %v8195_v59  ;;  %5503 = vmatprep.subr.bf16.mxu1 %v8200_v60  ;;  %v8285_v59 = vld [vmem:[#allocation5 + $0x15b0] ss:$8 sps:$4 sm:$0xff]   ;;  %v8290_v60 = vld [vmem:[#allocation5 + $0x9c4] ss:$8 sps:$4 sm:$0xff]  }
 0x295   :  { %5995 = vmatprep.subr.bf16.mxu0 %v8203_v61  ;;  %v8293_v61 = vld [vmem:[#allocation5 + $0x15c4] ss:$8 sps:$4 sm:$0xff]  }
 0x297   :  { %5504 = vmatpush1.bf16.msra.mxu1 %v8198_v62  ;;  %v8288_v62 = vld [vmem:[#allocation5 + $0x9c0] ss:$8 sps:$4 sm:$0xff]  }
 0x298   :  { %5996 = vmatpush1.bf16.msra.mxu0 %v8201_v63  ;;  %5505 = vmatprep.subr.bf16.mxu1 %v8206_v0  ;;  %v8291_v63 = vld [vmem:[#allocation5 + $0x15c0] ss:$8 sps:$4 sm:$0xff]   ;;  %v8296_v0 = vld [vmem:[#allocation5 + $0x9d4] ss:$8 sps:$4 sm:$0xff]  }
 0x299   :  { %5997 = vmatprep.subr.bf16.mxu0 %v8209_v1  ;;  %v8299_v1 = vld [vmem:[#allocation5 + $0x15d4] ss:$8 sps:$4 sm:$0xff]  }
 0x29b   :  { %5506 = vmatpush1.bf16.msra.mxu1 %v8204_v4  ;;  %v8302_v4 = vld [vmem:[#allocation5 + $0x9e4] ss:$8 sps:$4 sm:$0xff]  }
 0x29c   :  { %5998 = vmatpush1.bf16.msra.mxu0 %v8207_v5  ;;  %5516 = vmatprep.subr.bf16.mxu1 %v8215_v6  ;;  %v8305_v5 = vld [vmem:[#allocation5 + $0x15e4] ss:$8 sps:$4 sm:$0xff]   ;;  %v8300_v6 = vld [vmem:[#allocation5 + $0x9e0] ss:$8 sps:$4 sm:$0xff]  }
 0x29d   :  { %6008 = vmatprep.subr.bf16.mxu0 %v8221_v7  ;;  %v8303_v7 = vld [vmem:[#allocation5 + $0x15e0] ss:$8 sps:$4 sm:$0xff]  }
 0x29e   :  { %5508 = vmatmul.mubr.bf16.vlgmr.msra.gmra.mrb[0].mxu1 %v301_v10  ;;  %v8312_v10 = vld [vmem:[#allocation2 + $0x48] ss:$200 sps:$4 sm:$0xff]  }
 0x29f   :  { %6000 = vmatmul.mubr.bf16.vlgmr.msra.gmra.mrb[0].mxu0 %v325_v11  ;;  %5517 = vmatpush1.bf16.msra.mxu1 %v8213_v12  ;;  %v8318_v11 = vld [vmem:[#allocation2 + $0xa8] ss:$200 sps:$4 sm:$0xff]  }
 0x2a0   :  { %6009 = vmatpush1.bf16.msra.mxu0 %v8219_v13  ;;  %5518 = vmatprep.subr.bf16.mxu1 %v8224_v14  ;;  %v8306_v12 = vld [vmem:[#allocation5 + $0x9f0] ss:$8 sps:$4 sm:$0xff]   ;;  %v8317_v14 = vld [vmem:[#allocation5 + $0xa04] ss:$8 sps:$4 sm:$0xff]  }
 0x2a1   :  { %6010 = vmatprep.subr.bf16.mxu0 %v8227_v15  ;;  %5548 = vmatprep.mubr.bf16.mxu1 %v304_v16  ;;  %v8309_v13 = vld [vmem:[#allocation5 + $0x15f0] ss:$8 sps:$4 sm:$0xff]   ;;  %v8323_v15 = vld [vmem:[#allocation5 + $0x1604] ss:$8 sps:$4 sm:$0xff]  }
 0x2a2   :  { %6040 = vmatprep.mubr.bf16.mxu0 %v328_v17  ;;  %v8416_v16 = vld [vmem:[#allocation2 + $0x54] ss:$200 sps:$4 sm:$0xff]  }
 0x2a3   :  { %5519 = vmatpush1.bf16.msra.mxu1 %v8222_v18  ;;  %v8422_v17 = vld [vmem:[#allocation2 + $0xb4] ss:$200 sps:$4 sm:$0xff]   ;;  %v303_v18 = vpack.c.bf16 %v8312_v10, %v8312_v10  ;;  %v8396_v10 = vld [vmem:[#allocation5 + $0xad0] ss:$8 sps:$4 sm:$0xff]  }
 0x2a4   :  { %6011 = vmatpush1.bf16.msra.mxu0 %v8225_v19  ;;  %5520 = vmatprep.subr.bf16.mxu1 %v8230_v20  ;;  %v327_v19 = vpack.c.bf16 %v8318_v11, %v8318_v11  ;;  %v8315_v20 = vld [vmem:[#allocation5 + $0xa00] ss:$8 sps:$4 sm:$0xff]   ;;  %v8399_v11 = vld [vmem:[#allocation5 + $0x16d0] ss:$8 sps:$4 sm:$0xff]  }
 0x2a5   :  { %6012 = vmatprep.subr.bf16.mxu0 %v8233_v21  ;;  %v8321_v21 = vld [vmem:[#allocation5 + $0x1600] ss:$8 sps:$4 sm:$0xff]  }
 0x2a7   :  { %5521 = vmatpush1.bf16.msra.mxu1 %v8228_v22  ;;  %v8326_v22 = vld [vmem:[#allocation5 + $0xa14] ss:$8 sps:$4 sm:$0xff]  }
 0x2a8   :  { %6013 = vmatpush1.bf16.msra.mxu0 %v8231_v23  ;;  %5522 = vmatprep.subr.bf16.mxu1 %v8236_v24  ;;  %v8329_v23 = vld [vmem:[#allocation5 + $0x1614] ss:$8 sps:$4 sm:$0xff]   ;;  %v306_v24 = vpack.c.bf16 %v8416_v16, %v8416_v16 }
 0x2a9   :  { %6014 = vmatprep.subr.bf16.mxu0 %v8239_v25  ;;  %v330_v25 = vpack.c.bf16 %v8422_v17, %v8422_v17  ;;  %v8410_v16 = vld [vmem:[#allocation5 + $0xaf4] ss:$8 sps:$4 sm:$0xff]  }
 0x2aa   :  { %v8413_v17 = vld [vmem:[#allocation5 + $0x16f4] ss:$8 sps:$4 sm:$0xff]  }
 0x2ab   :  { %5523 = vmatpush1.bf16.msra.mxu1 %v8234_v26  ;;  %v8324_v26 = vld [vmem:[#allocation5 + $0xa10] ss:$8 sps:$4 sm:$0xff]  }
 0x2ac   :  { %6015 = vmatpush1.bf16.msra.mxu0 %v8237_v27  ;;  %5524 = vmatprep.subr.bf16.mxu1 %v8242_v28  ;;  %v8327_v27 = vld [vmem:[#allocation5 + $0x1610] ss:$8 sps:$4 sm:$0xff]   ;;  %v8332_v28 = vld [vmem:[#allocation5 + $0xa24] ss:$8 sps:$4 sm:$0xff]  }
 0x2ad   :  { %6016 = vmatprep.subr.bf16.mxu0 %v8245_v29  ;;  %v8335_v29 = vld [vmem:[#allocation5 + $0x1624] ss:$8 sps:$4 sm:$0xff]  }
 0x2af   :  { %5525 = vmatpush1.bf16.msra.mxu1 %v8240_v30  ;;  %v8330_v30 = vld [vmem:[#allocation5 + $0xa20] ss:$8 sps:$4 sm:$0xff]  }
 0x2b0   :  { %6017 = vmatpush1.bf16.msra.mxu0 %v8243_v31  ;;  %5526 = vmatprep.subr.bf16.mxu1 %v8248_v32  ;;  %v8333_v31 = vld [vmem:[#allocation5 + $0x1620] ss:$8 sps:$4 sm:$0xff]   ;;  %v8338_v32 = vld [vmem:[#allocation5 + $0xa34] ss:$8 sps:$4 sm:$0xff]  }
 0x2b1   :  { %6018 = vmatprep.subr.bf16.mxu0 %v8251_v33  ;;  %v8341_v33 = vld [vmem:[#allocation5 + $0x1634] ss:$8 sps:$4 sm:$0xff]  }
 0x2b3   :  { %5527 = vmatpush1.bf16.msra.mxu1 %v8246_v34  ;;  %v8336_v34 = vld [vmem:[#allocation5 + $0xa30] ss:$8 sps:$4 sm:$0xff]  }
 0x2b4   :  { %6019 = vmatpush1.bf16.msra.mxu0 %v8249_v35  ;;  %5528 = vmatprep.subr.bf16.mxu1 %v8254_v36  ;;  %v8339_v35 = vld [vmem:[#allocation5 + $0x1630] ss:$8 sps:$4 sm:$0xff]   ;;  %v8344_v36 = vld [vmem:[#allocation5 + $0xa44] ss:$8 sps:$4 sm:$0xff]  }
 0x2b5   :  { %6020 = vmatprep.subr.bf16.mxu0 %v8257_v37  ;;  %v8347_v37 = vld [vmem:[#allocation5 + $0x1644] ss:$8 sps:$4 sm:$0xff]  }
 0x2b7   :  { %5529 = vmatpush1.bf16.msra.mxu1 %v8252_v38  ;;  %v8342_v38 = vld [vmem:[#allocation5 + $0xa40] ss:$8 sps:$4 sm:$0xff]  }
 0x2b8   :  { %6021 = vmatpush1.bf16.msra.mxu0 %v8255_v39  ;;  %5530 = vmatprep.subr.bf16.mxu1 %v8260_v40  ;;  %v8345_v39 = vld [vmem:[#allocation5 + $0x1640] ss:$8 sps:$4 sm:$0xff]   ;;  %v8350_v40 = vld [vmem:[#allocation5 + $0xa54] ss:$8 sps:$4 sm:$0xff]  }
 0x2b9   :  { %6022 = vmatprep.subr.bf16.mxu0 %v8263_v41  ;;  %v8353_v41 = vld [vmem:[#allocation5 + $0x1654] ss:$8 sps:$4 sm:$0xff]  }
 0x2bb   :  { %5531 = vmatpush1.bf16.msra.mxu1 %v8258_v42  ;;  %v8348_v42 = vld [vmem:[#allocation5 + $0xa50] ss:$8 sps:$4 sm:$0xff]  }
 0x2bc   :  { %6023 = vmatpush1.bf16.msra.mxu0 %v8261_v43  ;;  %5532 = vmatprep.subr.bf16.mxu1 %v8266_v44  ;;  %v8351_v43 = vld [vmem:[#allocation5 + $0x1650] ss:$8 sps:$4 sm:$0xff]   ;;  %v8356_v44 = vld [vmem:[#allocation5 + $0xa64] ss:$8 sps:$4 sm:$0xff]  }
 0x2bd   :  { %6024 = vmatprep.subr.bf16.mxu0 %v8269_v45  ;;  %v8359_v45 = vld [vmem:[#allocation5 + $0x1664] ss:$8 sps:$4 sm:$0xff]  }
 0x2bf   :  { %5533 = vmatpush1.bf16.msra.mxu1 %v8264_v46  ;;  %v8354_v46 = vld [vmem:[#allocation5 + $0xa60] ss:$8 sps:$4 sm:$0xff]  }
 0x2c0   :  { %6025 = vmatpush1.bf16.msra.mxu0 %v8267_v47  ;;  %5534 = vmatprep.subr.bf16.mxu1 %v8272_v48  ;;  %v8357_v47 = vld [vmem:[#allocation5 + $0x1660] ss:$8 sps:$4 sm:$0xff]   ;;  %v8362_v48 = vld [vmem:[#allocation5 + $0xa74] ss:$8 sps:$4 sm:$0xff]  }
 0x2c1   :  { %6026 = vmatprep.subr.bf16.mxu0 %v8275_v49  ;;  %v8365_v49 = vld [vmem:[#allocation5 + $0x1674] ss:$8 sps:$4 sm:$0xff]  }
 0x2c3   :  { %5535 = vmatpush1.bf16.msra.mxu1 %v8270_v50  ;;  %v8360_v50 = vld [vmem:[#allocation5 + $0xa70] ss:$8 sps:$4 sm:$0xff]  }
 0x2c4   :  { %6027 = vmatpush1.bf16.msra.mxu0 %v8273_v51  ;;  %5536 = vmatprep.subr.bf16.mxu1 %v8278_v52  ;;  %v8363_v51 = vld [vmem:[#allocation5 + $0x1670] ss:$8 sps:$4 sm:$0xff]   ;;  %v8368_v52 = vld [vmem:[#allocation5 + $0xa84] ss:$8 sps:$4 sm:$0xff]  }
 0x2c5   :  { %6028 = vmatprep.subr.bf16.mxu0 %v8281_v53  ;;  %v8371_v53 = vld [vmem:[#allocation5 + $0x1684] ss:$8 sps:$4 sm:$0xff]  }
 0x2c7   :  { %5537 = vmatpush1.bf16.msra.mxu1 %v8276_v54  ;;  %v8366_v54 = vld [vmem:[#allocation5 + $0xa80] ss:$8 sps:$4 sm:$0xff]  }
 0x2c8   :  { %6029 = vmatpush1.bf16.msra.mxu0 %v8279_v55  ;;  %5538 = vmatprep.subr.bf16.mxu1 %v8284_v56  ;;  %v8369_v55 = vld [vmem:[#allocation5 + $0x1680] ss:$8 sps:$4 sm:$0xff]   ;;  %v8374_v56 = vld [vmem:[#allocation5 + $0xa94] ss:$8 sps:$4 sm:$0xff]  }
 0x2c9   :  { %6030 = vmatprep.subr.bf16.mxu0 %v8287_v57  ;;  %v8377_v57 = vld [vmem:[#allocation5 + $0x1694] ss:$8 sps:$4 sm:$0xff]  }
 0x2cb   :  { %5539 = vmatpush1.bf16.msra.mxu1 %v8282_v58  ;;  %v8372_v58 = vld [vmem:[#allocation5 + $0xa90] ss:$8 sps:$4 sm:$0xff]  }
 0x2cc   :  { %6031 = vmatpush1.bf16.msra.mxu0 %v8285_v59  ;;  %5540 = vmatprep.subr.bf16.mxu1 %v8290_v60  ;;  %v8375_v59 = vld [vmem:[#allocation5 + $0x1690] ss:$8 sps:$4 sm:$0xff]   ;;  %v8380_v60 = vld [vmem:[#allocation5 + $0xaa4] ss:$8 sps:$4 sm:$0xff]  }
 0x2cd   :  { %6032 = vmatprep.subr.bf16.mxu0 %v8293_v61  ;;  %v8383_v61 = vld [vmem:[#allocation5 + $0x16a4] ss:$8 sps:$4 sm:$0xff]  }
 0x2cf   :  { %5541 = vmatpush1.bf16.msra.mxu1 %v8288_v62  ;;  %v8378_v62 = vld [vmem:[#allocation5 + $0xaa0] ss:$8 sps:$4 sm:$0xff]  }
 0x2d0   :  { %6033 = vmatpush1.bf16.msra.mxu0 %v8291_v63  ;;  %5542 = vmatprep.subr.bf16.mxu1 %v8296_v0  ;;  %v8381_v63 = vld [vmem:[#allocation5 + $0x16a0] ss:$8 sps:$4 sm:$0xff]   ;;  %v8386_v0 = vld [vmem:[#allocation5 + $0xab4] ss:$8 sps:$4 sm:$0xff]  }
 0x2d1   :  { %6034 = vmatprep.subr.bf16.mxu0 %v8299_v1  ;;  %v8389_v1 = vld [vmem:[#allocation5 + $0x16b4] ss:$8 sps:$4 sm:$0xff]  }
 0x2d3   :  { %5543 = vmatpush1.bf16.msra.mxu1 %v8294_v2  ;;  %v8384_v2 = vld [vmem:[#allocation5 + $0xab0] ss:$8 sps:$4 sm:$0xff]  }
 0x2d4   :  { %6035 = vmatpush1.bf16.msra.mxu0 %v8297_v3  ;;  %5544 = vmatprep.subr.bf16.mxu1 %v8302_v4  ;;  %v8387_v3 = vld [vmem:[#allocation5 + $0x16b0] ss:$8 sps:$4 sm:$0xff]   ;;  %v8392_v4 = vld [vmem:[#allocation5 + $0xac4] ss:$8 sps:$4 sm:$0xff]  }
 0x2d5   :  { %6036 = vmatprep.subr.bf16.mxu0 %v8305_v5  ;;  %v8395_v5 = vld [vmem:[#allocation5 + $0x16c4] ss:$8 sps:$4 sm:$0xff]  }
 0x2d7   :  { %5545 = vmatpush1.bf16.msra.mxu1 %v8300_v6  ;;  %v8390_v6 = vld [vmem:[#allocation5 + $0xac0] ss:$8 sps:$4 sm:$0xff]  }
 0x2d8   :  { %6037 = vmatpush1.bf16.msra.mxu0 %v8303_v7  ;;  %5546 = vmatprep.subr.bf16.mxu1 %v8308_v8  ;;  %v8393_v7 = vld [vmem:[#allocation5 + $0x16c0] ss:$8 sps:$4 sm:$0xff]   ;;  %v8398_v8 = vld [vmem:[#allocation5 + $0xad4] ss:$8 sps:$4 sm:$0xff]  }
 0x2d9   :  { %6038 = vmatprep.subr.bf16.mxu0 %v8311_v9  ;;  %v8401_v9 = vld [vmem:[#allocation5 + $0x16d4] ss:$8 sps:$4 sm:$0xff]  }
 0x2db   :  { %5547 = vmatpush1.bf16.msra.mxu1 %v8306_v12  ;;  %v8404_v12 = vld [vmem:[#allocation5 + $0xae4] ss:$8 sps:$4 sm:$0xff]  }
 0x2dc   :  { %6039 = vmatpush1.bf16.msra.mxu0 %v8309_v13  ;;  %5557 = vmatprep.subr.bf16.mxu1 %v8317_v14  ;;  %v8407_v13 = vld [vmem:[#allocation5 + $0x16e4] ss:$8 sps:$4 sm:$0xff]   ;;  %v8402_v14 = vld [vmem:[#allocation5 + $0xae0] ss:$8 sps:$4 sm:$0xff]  }
 0x2dd   :  { %6049 = vmatprep.subr.bf16.mxu0 %v8323_v15  ;;  %v8405_v15 = vld [vmem:[#allocation5 + $0x16e0] ss:$8 sps:$4 sm:$0xff]  }
 0x2de   :  { %5549 = vmatmul.mubr.bf16.vlgmr.msra.gmra.mrb[0].mxu1 %v303_v18  ;;  %v8414_v18 = vld [vmem:[#allocation2 + $0x50] ss:$200 sps:$4 sm:$0xff]  }
 0x2df   :  { %6041 = vmatmul.mubr.bf16.vlgmr.msra.gmra.mrb[0].mxu0 %v327_v19  ;;  %5558 = vmatpush1.bf16.msra.mxu1 %v8315_v20  ;;  %v8420_v19 = vld [vmem:[#allocation2 + $0xb0] ss:$200 sps:$4 sm:$0xff]   ;;  %v8408_v20 = vld [vmem:[#allocation5 + $0xaf0] ss:$8 sps:$4 sm:$0xff]  }
 0x2e0   :  { %6050 = vmatpush1.bf16.msra.mxu0 %v8321_v21  ;;  %5559 = vmatprep.subr.bf16.mxu1 %v8326_v22  ;;  %v8411_v21 = vld [vmem:[#allocation5 + $0x16f0] ss:$8 sps:$4 sm:$0xff]   ;;  %v8419_v22 = vld [vmem:[#allocation5 + $0xb04] ss:$8 sps:$4 sm:$0xff]  }
 0x2e1   :  { %6051 = vmatprep.subr.bf16.mxu0 %v8329_v23  ;;  %5589 = vmatprep.mubr.bf16.mxu1 %v306_v24  ;;  %v8425_v23 = vld [vmem:[#allocation5 + $0x1704] ss:$8 sps:$4 sm:$0xff]  }
 0x2e2   :  { %6081 = vmatprep.mubr.bf16.mxu0 %v330_v25  ;;  %v8518_v24 = vld [vmem:[#allocation2 + $0x5c] ss:$200 sps:$4 sm:$0xff]  }
 0x2e3   :  { %5560 = vmatpush1.bf16.msra.mxu1 %v8324_v26  ;;  %v8521_v25 = vld [vmem:[#allocation2 + $0xbc] ss:$200 sps:$4 sm:$0xff]   ;;  %v305_v26 = vpack.c.bf16 %v8414_v18, %v8414_v18  ;;  %v8498_v18 = vld [vmem:[#allocation5 + $0xbd0] ss:$8 sps:$4 sm:$0xff]  }
 0x2e4   :  { %6052 = vmatpush1.bf16.msra.mxu0 %v8327_v27  ;;  %5561 = vmatprep.subr.bf16.mxu1 %v8332_v28  ;;  %v329_v27 = vpack.c.bf16 %v8420_v19, %v8420_v19  ;;  %v8417_v28 = vld [vmem:[#allocation5 + $0xb00] ss:$8 sps:$4 sm:$0xff]   ;;  %v8501_v19 = vld [vmem:[#allocation5 + $0x17d0] ss:$8 sps:$4 sm:$0xff]  }
 0x2e5   :  { %6053 = vmatprep.subr.bf16.mxu0 %v8335_v29  ;;  %v8423_v29 = vld [vmem:[#allocation5 + $0x1700] ss:$8 sps:$4 sm:$0xff]  }
 0x2e7   :  { %5562 = vmatpush1.bf16.msra.mxu1 %v8330_v30  ;;  %v8428_v30 = vld [vmem:[#allocation5 + $0xb14] ss:$8 sps:$4 sm:$0xff]  }
 0x2e8   :  { %6054 = vmatpush1.bf16.msra.mxu0 %v8333_v31  ;;  %5563 = vmatprep.subr.bf16.mxu1 %v8338_v32  ;;  %v8431_v31 = vld [vmem:[#allocation5 + $0x1714] ss:$8 sps:$4 sm:$0xff]   ;;  %v308_v32 = vpack.c.bf16 %v8518_v24, %v8518_v24 }
 0x2e9   :  { %6055 = vmatprep.subr.bf16.mxu0 %v8341_v33  ;;  %v332_v33 = vpack.c.bf16 %v8521_v25, %v8521_v25  ;;  %v8512_v24 = vld [vmem:[#allocation5 + $0xbf4] ss:$8 sps:$4 sm:$0xff]  }
 0x2ea   :  { %v8515_v25 = vld [vmem:[#allocation5 + $0x17f4] ss:$8 sps:$4 sm:$0xff]  }
 0x2eb   :  { %5564 = vmatpush1.bf16.msra.mxu1 %v8336_v34  ;;  %v8426_v34 = vld [vmem:[#allocation5 + $0xb10] ss:$8 sps:$4 sm:$0xff]  }
 0x2ec   :  { %6056 = vmatpush1.bf16.msra.mxu0 %v8339_v35  ;;  %5565 = vmatprep.subr.bf16.mxu1 %v8344_v36  ;;  %v8429_v35 = vld [vmem:[#allocation5 + $0x1710] ss:$8 sps:$4 sm:$0xff]   ;;  %v8434_v36 = vld [vmem:[#allocation5 + $0xb24] ss:$8 sps:$4 sm:$0xff]  }
 0x2ed   :  { %6057 = vmatprep.subr.bf16.mxu0 %v8347_v37  ;;  %v8437_v37 = vld [vmem:[#allocation5 + $0x1724] ss:$8 sps:$4 sm:$0xff]  }
 0x2ef   :  { %5566 = vmatpush1.bf16.msra.mxu1 %v8342_v38  ;;  %v8432_v38 = vld [vmem:[#allocation5 + $0xb20] ss:$8 sps:$4 sm:$0xff]  }
 0x2f0   :  { %6058 = vmatpush1.bf16.msra.mxu0 %v8345_v39  ;;  %5567 = vmatprep.subr.bf16.mxu1 %v8350_v40  ;;  %v8435_v39 = vld [vmem:[#allocation5 + $0x1720] ss:$8 sps:$4 sm:$0xff]   ;;  %v8440_v40 = vld [vmem:[#allocation5 + $0xb34] ss:$8 sps:$4 sm:$0xff]  }
 0x2f1   :  { %6059 = vmatprep.subr.bf16.mxu0 %v8353_v41  ;;  %v8443_v41 = vld [vmem:[#allocation5 + $0x1734] ss:$8 sps:$4 sm:$0xff]  }
 0x2f3   :  { %5568 = vmatpush1.bf16.msra.mxu1 %v8348_v42  ;;  %v8438_v42 = vld [vmem:[#allocation5 + $0xb30] ss:$8 sps:$4 sm:$0xff]  }
 0x2f4   :  { %6060 = vmatpush1.bf16.msra.mxu0 %v8351_v43  ;;  %5569 = vmatprep.subr.bf16.mxu1 %v8356_v44  ;;  %v8441_v43 = vld [vmem:[#allocation5 + $0x1730] ss:$8 sps:$4 sm:$0xff]   ;;  %v8446_v44 = vld [vmem:[#allocation5 + $0xb44] ss:$8 sps:$4 sm:$0xff]  }
 0x2f5   :  { %6061 = vmatprep.subr.bf16.mxu0 %v8359_v45  ;;  %v8449_v45 = vld [vmem:[#allocation5 + $0x1744] ss:$8 sps:$4 sm:$0xff]  }
 0x2f7   :  { %5570 = vmatpush1.bf16.msra.mxu1 %v8354_v46  ;;  %v8444_v46 = vld [vmem:[#allocation5 + $0xb40] ss:$8 sps:$4 sm:$0xff]  }
 0x2f8   :  { %6062 = vmatpush1.bf16.msra.mxu0 %v8357_v47  ;;  %5571 = vmatprep.subr.bf16.mxu1 %v8362_v48  ;;  %v8447_v47 = vld [vmem:[#allocation5 + $0x1740] ss:$8 sps:$4 sm:$0xff]   ;;  %v8452_v48 = vld [vmem:[#allocation5 + $0xb54] ss:$8 sps:$4 sm:$0xff]  }
 0x2f9   :  { %6063 = vmatprep.subr.bf16.mxu0 %v8365_v49  ;;  %v8455_v49 = vld [vmem:[#allocation5 + $0x1754] ss:$8 sps:$4 sm:$0xff]  }
 0x2fb   :  { %5572 = vmatpush1.bf16.msra.mxu1 %v8360_v50  ;;  %v8450_v50 = vld [vmem:[#allocation5 + $0xb50] ss:$8 sps:$4 sm:$0xff]  }
 0x2fc   :  { %6064 = vmatpush1.bf16.msra.mxu0 %v8363_v51  ;;  %5573 = vmatprep.subr.bf16.mxu1 %v8368_v52  ;;  %v8453_v51 = vld [vmem:[#allocation5 + $0x1750] ss:$8 sps:$4 sm:$0xff]   ;;  %v8458_v52 = vld [vmem:[#allocation5 + $0xb64] ss:$8 sps:$4 sm:$0xff]  }
 0x2fd   :  { %6065 = vmatprep.subr.bf16.mxu0 %v8371_v53  ;;  %v8461_v53 = vld [vmem:[#allocation5 + $0x1764] ss:$8 sps:$4 sm:$0xff]  }
 0x2ff   :  { %5574 = vmatpush1.bf16.msra.mxu1 %v8366_v54  ;;  %v8456_v54 = vld [vmem:[#allocation5 + $0xb60] ss:$8 sps:$4 sm:$0xff]  }
 0x300   :  { %6066 = vmatpush1.bf16.msra.mxu0 %v8369_v55  ;;  %5575 = vmatprep.subr.bf16.mxu1 %v8374_v56  ;;  %v8459_v55 = vld [vmem:[#allocation5 + $0x1760] ss:$8 sps:$4 sm:$0xff]   ;;  %v8464_v56 = vld [vmem:[#allocation5 + $0xb74] ss:$8 sps:$4 sm:$0xff]  }
 0x301   :  { %6067 = vmatprep.subr.bf16.mxu0 %v8377_v57  ;;  %v8467_v57 = vld [vmem:[#allocation5 + $0x1774] ss:$8 sps:$4 sm:$0xff]  }
 0x303   :  { %5576 = vmatpush1.bf16.msra.mxu1 %v8372_v58  ;;  %v8462_v58 = vld [vmem:[#allocation5 + $0xb70] ss:$8 sps:$4 sm:$0xff]  }
 0x304   :  { %6068 = vmatpush1.bf16.msra.mxu0 %v8375_v59  ;;  %5577 = vmatprep.subr.bf16.mxu1 %v8380_v60  ;;  %v8465_v59 = vld [vmem:[#allocation5 + $0x1770] ss:$8 sps:$4 sm:$0xff]   ;;  %v8470_v60 = vld [vmem:[#allocation5 + $0xb84] ss:$8 sps:$4 sm:$0xff]  }
 0x305   :  { %6069 = vmatprep.subr.bf16.mxu0 %v8383_v61  ;;  %v8473_v61 = vld [vmem:[#allocation5 + $0x1784] ss:$8 sps:$4 sm:$0xff]  }
 0x307   :  { %5578 = vmatpush1.bf16.msra.mxu1 %v8378_v62  ;;  %v8468_v62 = vld [vmem:[#allocation5 + $0xb80] ss:$8 sps:$4 sm:$0xff]  }
 0x308   :  { %6070 = vmatpush1.bf16.msra.mxu0 %v8381_v63  ;;  %5579 = vmatprep.subr.bf16.mxu1 %v8386_v0  ;;  %v8471_v63 = vld [vmem:[#allocation5 + $0x1780] ss:$8 sps:$4 sm:$0xff]   ;;  %v8476_v0 = vld [vmem:[#allocation5 + $0xb94] ss:$8 sps:$4 sm:$0xff]  }
 0x309   :  { %6071 = vmatprep.subr.bf16.mxu0 %v8389_v1  ;;  %v8479_v1 = vld [vmem:[#allocation5 + $0x1794] ss:$8 sps:$4 sm:$0xff]  }
 0x30b   :  { %5580 = vmatpush1.bf16.msra.mxu1 %v8384_v2  ;;  %v8474_v2 = vld [vmem:[#allocation5 + $0xb90] ss:$8 sps:$4 sm:$0xff]  }
 0x30c   :  { %6072 = vmatpush1.bf16.msra.mxu0 %v8387_v3  ;;  %5581 = vmatprep.subr.bf16.mxu1 %v8392_v4  ;;  %v8477_v3 = vld [vmem:[#allocation5 + $0x1790] ss:$8 sps:$4 sm:$0xff]   ;;  %v8482_v4 = vld [vmem:[#allocation5 + $0xba4] ss:$8 sps:$4 sm:$0xff]  }
 0x30d   :  { %6073 = vmatprep.subr.bf16.mxu0 %v8395_v5  ;;  %v8485_v5 = vld [vmem:[#allocation5 + $0x17a4] ss:$8 sps:$4 sm:$0xff]  }
 0x30f   :  { %5582 = vmatpush1.bf16.msra.mxu1 %v8390_v6  ;;  %v8480_v6 = vld [vmem:[#allocation5 + $0xba0] ss:$8 sps:$4 sm:$0xff]  }
 0x310   :  { %6074 = vmatpush1.bf16.msra.mxu0 %v8393_v7  ;;  %5583 = vmatprep.subr.bf16.mxu1 %v8398_v8  ;;  %v8483_v7 = vld [vmem:[#allocation5 + $0x17a0] ss:$8 sps:$4 sm:$0xff]   ;;  %v8488_v8 = vld [vmem:[#allocation5 + $0xbb4] ss:$8 sps:$4 sm:$0xff]  }
 0x311   :  { %6075 = vmatprep.subr.bf16.mxu0 %v8401_v9  ;;  %v8491_v9 = vld [vmem:[#allocation5 + $0x17b4] ss:$8 sps:$4 sm:$0xff]  }
 0x313   :  { %5584 = vmatpush1.bf16.msra.mxu1 %v8396_v10  ;;  %v8486_v10 = vld [vmem:[#allocation5 + $0xbb0] ss:$8 sps:$4 sm:$0xff]  }
 0x314   :  { %6076 = vmatpush1.bf16.msra.mxu0 %v8399_v11  ;;  %5585 = vmatprep.subr.bf16.mxu1 %v8404_v12  ;;  %v8489_v11 = vld [vmem:[#allocation5 + $0x17b0] ss:$8 sps:$4 sm:$0xff]   ;;  %v8494_v12 = vld [vmem:[#allocation5 + $0xbc4] ss:$8 sps:$4 sm:$0xff]  }
 0x315   :  { %6077 = vmatprep.subr.bf16.mxu0 %v8407_v13  ;;  %v8497_v13 = vld [vmem:[#allocation5 + $0x17c4] ss:$8 sps:$4 sm:$0xff]  }
 0x317   :  { %5586 = vmatpush1.bf16.msra.mxu1 %v8402_v14  ;;  %v8492_v14 = vld [vmem:[#allocation5 + $0xbc0] ss:$8 sps:$4 sm:$0xff]  }
 0x318   :  { %6078 = vmatpush1.bf16.msra.mxu0 %v8405_v15  ;;  %5587 = vmatprep.subr.bf16.mxu1 %v8410_v16  ;;  %v8495_v15 = vld [vmem:[#allocation5 + $0x17c0] ss:$8 sps:$4 sm:$0xff]   ;;  %v8500_v16 = vld [vmem:[#allocation5 + $0xbd4] ss:$8 sps:$4 sm:$0xff]  }
 0x319   :  { %6079 = vmatprep.subr.bf16.mxu0 %v8413_v17  ;;  %v8503_v17 = vld [vmem:[#allocation5 + $0x17d4] ss:$8 sps:$4 sm:$0xff]  }
 0x31b   :  { %5588 = vmatpush1.bf16.msra.mxu1 %v8408_v20  ;;  %v8506_v20 = vld [vmem:[#allocation5 + $0xbe4] ss:$8 sps:$4 sm:$0xff]  }
 0x31c   :  { %6080 = vmatpush1.bf16.msra.mxu0 %v8411_v21  ;;  %5598 = vmatprep.subr.bf16.mxu1 %v8419_v22  ;;  %v8509_v21 = vld [vmem:[#allocation5 + $0x17e4] ss:$8 sps:$4 sm:$0xff]   ;;  %v8504_v22 = vld [vmem:[#allocation5 + $0xbe0] ss:$8 sps:$4 sm:$0xff]  }
 0x31d   :  { %6090 = vmatprep.subr.bf16.mxu0 %v8425_v23  ;;  %v8507_v23 = vld [vmem:[#allocation5 + $0x17e0] ss:$8 sps:$4 sm:$0xff]  }
 0x31e   :  { %5590 = vmatmul.mubr.bf16.vlgmr.msra.gmra.mrb[0].mxu1 %v305_v26  ;;  %v8516_v26 = vld [vmem:[#allocation2 + $0x58] ss:$200 sps:$4 sm:$0xff]  }
 0x31f   :  { %6082 = vmatmul.mubr.bf16.vlgmr.msra.gmra.mrb[0].mxu0 %v329_v27  ;;  %5599 = vmatpush1.bf16.msra.mxu1 %v8417_v28  ;;  %v8519_v27 = vld [vmem:[#allocation2 + $0xb8] ss:$200 sps:$4 sm:$0xff]  }
 0x320   :  { %6091 = vmatpush1.bf16.msra.mxu0 %v8423_v29  ;;  %5600 = vmatprep.subr.bf16.mxu1 %v8428_v30  ;;  %v8510_v28 = vld [vmem:[#allocation5 + $0xbf0] ss:$8 sps:$4 sm:$0xff]   ;;  %v8572_v30 = vld [vmem:[#allocation2 + $0xc4] ss:$200 sps:$4 sm:$0xff]  }
 0x321   :  { %6092 = vmatprep.subr.bf16.mxu0 %v8431_v31  ;;  %5630 = vmatprep.mubr.bf16.mxu1 %v308_v32  ;;  %v8513_v29 = vld [vmem:[#allocation5 + $0x17f0] ss:$8 sps:$4 sm:$0xff]   ;;  %v8524_v31 = vld [vmem:[#allocation5 + $0x1804] ss:$8 sps:$4 sm:$0xff]   ;;  %v307_v32 = vpack.c.bf16 %v8516_v26, %v8516_v26 }
 0x322   :  { %6122 = vmatprep.mubr.bf16.mxu0 %v332_v33  ;;  %v331_v33 = vpack.c.bf16 %v8519_v27, %v8519_v27  ;;  %v6181_v26 = vld [vmem:[#allocation8 + $0x38] sm:$0xff]  ;;  %v6198_v27 = vld [vmem:[#allocation8 + $0xc0] sm:$0xff] }
 0x323   :  { %5601 = vmatpush1.bf16.msra.mxu1 %v8426_v34  ;;  %v8522_v34 = vld [vmem:[#allocation5 + $0x1800] ss:$8 sps:$4 sm:$0xff]  }
 0x324   :  { %6093 = vmatpush1.bf16.msra.mxu0 %v8429_v35  ;;  %5602 = vmatprep.subr.bf16.mxu1 %v8434_v36  ;;  %v334_v35 = vpack.c.bf16 %v8572_v30, %v8572_v30  ;;  %v8527_v36 = vld [vmem:[#allocation5 + $0x1814] ss:$8 sps:$4 sm:$0xff]  }
 0x325   :  { %6094 = vmatprep.subr.bf16.mxu0 %v8437_v37  ;;  %v8525_v37 = vld [vmem:[#allocation5 + $0x1810] ss:$8 sps:$4 sm:$0xff]  }
 0x327   :  { %5603 = vmatpush1.bf16.msra.mxu1 %v8432_v38  ;;  %v8530_v38 = vld [vmem:[#allocation5 + $0x1824] ss:$8 sps:$4 sm:$0xff]  }
 0x328   :  { %6095 = vmatpush1.bf16.msra.mxu0 %v8435_v39  ;;  %5604 = vmatprep.subr.bf16.mxu1 %v8440_v40  ;;  %v8528_v39 = vld [vmem:[#allocation5 + $0x1820] ss:$8 sps:$4 sm:$0xff]   ;;  %v8533_v40 = vld [vmem:[#allocation5 + $0x1834] ss:$8 sps:$4 sm:$0xff]  }
 0x329   :  { %6096 = vmatprep.subr.bf16.mxu0 %v8443_v41  ;;  %v8531_v41 = vld [vmem:[#allocation5 + $0x1830] ss:$8 sps:$4 sm:$0xff]  }
 0x32b   :  { %5605 = vmatpush1.bf16.msra.mxu1 %v8438_v42  ;;  %v8536_v42 = vld [vmem:[#allocation5 + $0x1844] ss:$8 sps:$4 sm:$0xff]  }
 0x32c   :  { %6097 = vmatpush1.bf16.msra.mxu0 %v8441_v43  ;;  %5606 = vmatprep.subr.bf16.mxu1 %v8446_v44  ;;  %v8534_v43 = vld [vmem:[#allocation5 + $0x1840] ss:$8 sps:$4 sm:$0xff]   ;;  %v8539_v44 = vld [vmem:[#allocation5 + $0x1854] ss:$8 sps:$4 sm:$0xff]  }
 0x32d   :  { %6098 = vmatprep.subr.bf16.mxu0 %v8449_v45  ;;  %v8537_v45 = vld [vmem:[#allocation5 + $0x1850] ss:$8 sps:$4 sm:$0xff]  }
 0x32f   :  { %5607 = vmatpush1.bf16.msra.mxu1 %v8444_v46  ;;  %v8542_v46 = vld [vmem:[#allocation5 + $0x1864] ss:$8 sps:$4 sm:$0xff]  }
 0x330   :  { %6099 = vmatpush1.bf16.msra.mxu0 %v8447_v47  ;;  %5608 = vmatprep.subr.bf16.mxu1 %v8452_v48  ;;  %v8540_v47 = vld [vmem:[#allocation5 + $0x1860] ss:$8 sps:$4 sm:$0xff]   ;;  %v8545_v48 = vld [vmem:[#allocation5 + $0x1874] ss:$8 sps:$4 sm:$0xff]  }
 0x331   :  { %6100 = vmatprep.subr.bf16.mxu0 %v8455_v49  ;;  %v8543_v49 = vld [vmem:[#allocation5 + $0x1870] ss:$8 sps:$4 sm:$0xff]  }
 0x333   :  { %5609 = vmatpush1.bf16.msra.mxu1 %v8450_v50  ;;  %v8548_v50 = vld [vmem:[#allocation5 + $0x1884] ss:$8 sps:$4 sm:$0xff]  }
 0x334   :  { %6101 = vmatpush1.bf16.msra.mxu0 %v8453_v51  ;;  %5610 = vmatprep.subr.bf16.mxu1 %v8458_v52  ;;  %v8546_v51 = vld [vmem:[#allocation5 + $0x1880] ss:$8 sps:$4 sm:$0xff]   ;;  %v8551_v52 = vld [vmem:[#allocation5 + $0x1894] ss:$8 sps:$4 sm:$0xff]  }
 0x335   :  { %6102 = vmatprep.subr.bf16.mxu0 %v8461_v53  ;;  %v8549_v53 = vld [vmem:[#allocation5 + $0x1890] ss:$8 sps:$4 sm:$0xff]  }
 0x337   :  { %5611 = vmatpush1.bf16.msra.mxu1 %v8456_v54  ;;  %v8554_v54 = vld [vmem:[#allocation5 + $0x18a4] ss:$8 sps:$4 sm:$0xff]  }
 0x338   :  { %6103 = vmatpush1.bf16.msra.mxu0 %v8459_v55  ;;  %5612 = vmatprep.subr.bf16.mxu1 %v8464_v56  ;;  %v8552_v55 = vld [vmem:[#allocation5 + $0x18a0] ss:$8 sps:$4 sm:$0xff]   ;;  %v8557_v56 = vld [vmem:[#allocation5 + $0x18b4] ss:$8 sps:$4 sm:$0xff]  }
 0x339   :  { %6104 = vmatprep.subr.bf16.mxu0 %v8467_v57  ;;  %v8555_v57 = vld [vmem:[#allocation5 + $0x18b0] ss:$8 sps:$4 sm:$0xff]  }
 0x33b   :  { %5613 = vmatpush1.bf16.msra.mxu1 %v8462_v58  ;;  %v8560_v58 = vld [vmem:[#allocation5 + $0x18c4] ss:$8 sps:$4 sm:$0xff]  }
 0x33c   :  { %6105 = vmatpush1.bf16.msra.mxu0 %v8465_v59  ;;  %5614 = vmatprep.subr.bf16.mxu1 %v8470_v60  ;;  %v8558_v59 = vld [vmem:[#allocation5 + $0x18c0] ss:$8 sps:$4 sm:$0xff]   ;;  %v8563_v60 = vld [vmem:[#allocation5 + $0x18d4] ss:$8 sps:$4 sm:$0xff]  }
 0x33d   :  { %6106 = vmatprep.subr.bf16.mxu0 %v8473_v61  ;;  %v8561_v61 = vld [vmem:[#allocation5 + $0x18d0] ss:$8 sps:$4 sm:$0xff]  }
 0x33f   :  { %5615 = vmatpush1.bf16.msra.mxu1 %v8468_v62  ;;  %v8566_v62 = vld [vmem:[#allocation5 + $0x18e4] ss:$8 sps:$4 sm:$0xff]  }
 0x340   :  { %6107 = vmatpush1.bf16.msra.mxu0 %v8471_v63  ;;  %5616 = vmatprep.subr.bf16.mxu1 %v8476_v0  ;;  %v8564_v63 = vld [vmem:[#allocation5 + $0x18e0] ss:$8 sps:$4 sm:$0xff]   ;;  %v8569_v0 = vld [vmem:[#allocation5 + $0x18f4] ss:$8 sps:$4 sm:$0xff]  }
 0x341   :  { %6108 = vmatprep.subr.bf16.mxu0 %v8479_v1  ;;  %v8570_v1 = vld [vmem:[#allocation2 + $0xc0] ss:$200 sps:$4 sm:$0xff]  }
 0x343   :  { %5617 = vmatpush1.bf16.msra.mxu1 %v8474_v2  ;;  %v8567_v2 = vld [vmem:[#allocation5 + $0x18f0] ss:$8 sps:$4 sm:$0xff]  }
 0x344   :  { %6109 = vmatpush1.bf16.msra.mxu0 %v8477_v3  ;;  %5618 = vmatprep.subr.bf16.mxu1 %v8482_v4  ;;  %v333_v3 = vpack.c.bf16 %v8570_v1, %v8570_v1  ;;  %v6190_v4 = vld [vmem:[#allocation8 + $0x80] sm:$0xff] }
 0x345   :  { %6110 = vmatprep.subr.bf16.mxu0 %v8485_v5  ;;  %v6191_v5 = vld [vmem:[#allocation8 + $0x88] sm:$0xff] }
 0x347   :  { %5619 = vmatpush1.bf16.msra.mxu1 %v8480_v6  ;;  %v6174_v6 = vld [vmem:[#allocation8] sm:$0xff] }
 0x348   :  { %6111 = vmatpush1.bf16.msra.mxu0 %v8483_v7  ;;  %5620 = vmatprep.subr.bf16.mxu1 %v8488_v8  ;;  %v7158_v7 = vpack.c.bf16 %v6191_v5, %v6190_v4  ;;  %v6175_v8 = vld [vmem:[#allocation8 + $0x8] sm:$0xff] }
 0x349   :  { %6112 = vmatprep.subr.bf16.mxu0 %v8491_v9  ;;  %v6192_v9 = vld [vmem:[#allocation8 + $0x90] sm:$0xff] }
 0x34b   :  { %5621 = vmatpush1.bf16.msra.mxu1 %v8486_v10  ;;  %v6193_v10 = vld [vmem:[#allocation8 + $0x98] sm:$0xff] }
 0x34c   :  { %6113 = vmatpush1.bf16.msra.mxu0 %v8489_v11  ;;  %5622 = vmatprep.subr.bf16.mxu1 %v8494_v12  ;;  %v7160_v11 = vpack.c.bf16 %v6175_v8, %v6174_v6  ;;  %v7162_v12 = vpack.c.bf16 %v6193_v10, %v6192_v9 }
 0x34d   :  { %6114 = vmatprep.subr.bf16.mxu0 %v8497_v13  ;;  %v6176_v13 = vld [vmem:[#allocation8 + $0x10] sm:$0xff] }
 0x34f   :  { %5623 = vmatpush1.bf16.msra.mxu1 %v8492_v14  ;;  %v6177_v14 = vld [vmem:[#allocation8 + $0x18] sm:$0xff] }
 0x350   :  { %6115 = vmatpush1.bf16.msra.mxu0 %v8495_v15  ;;  %5624 = vmatprep.subr.bf16.mxu1 %v8500_v16  ;;  %v6194_v15 = vld [vmem:[#allocation8 + $0xa0] sm:$0xff]  ;;  %v6195_v16 = vld [vmem:[#allocation8 + $0xa8] sm:$0xff] }
 0x351   :  { %6116 = vmatprep.subr.bf16.mxu0 %v8503_v17  ;;  %v7164_v17 = vpack.c.bf16 %v6177_v14, %v6176_v13 }
 0x353   :  { %5625 = vmatpush1.bf16.msra.mxu1 %v8498_v18  ;;  %v7166_v18 = vpack.c.bf16 %v6195_v16, %v6194_v15 }
 0x354   :  { %6117 = vmatpush1.bf16.msra.mxu0 %v8501_v19  ;;  %5626 = vmatprep.subr.bf16.mxu1 %v8506_v20  ;;  %v6178_v19 = vld [vmem:[#allocation8 + $0x20] sm:$0xff]  ;;  %v6179_v20 = vld [vmem:[#allocation8 + $0x28] sm:$0xff] }
 0x355   :  { %6118 = vmatprep.subr.bf16.mxu0 %v8509_v21  ;;  %v6196_v21 = vld [vmem:[#allocation8 + $0xb0] sm:$0xff] }
 0x357   :  { %5627 = vmatpush1.bf16.msra.mxu1 %v8504_v22  ;;  %v6197_v22 = vld [vmem:[#allocation8 + $0xb8] sm:$0xff] }
 0x358   :  { %6119 = vmatpush1.bf16.msra.mxu0 %v8507_v23  ;;  %5628 = vmatprep.subr.bf16.mxu1 %v8512_v24  ;;  %v7168_v23 = vpack.c.bf16 %v6179_v20, %v6178_v19  ;;  %v7170_v24 = vpack.c.bf16 %v6197_v22, %v6196_v21 }
 0x359   :  { %6120 = vmatprep.subr.bf16.mxu0 %v8515_v25  ;;  %v6180_v25 = vld [vmem:[#allocation8 + $0x30] sm:$0xff] }
 0x35b   :  { %5629 = vmatpush1.bf16.msra.mxu1 %v8510_v28  ;;  %v6199_v28 = vld [vmem:[#allocation8 + $0xc8] sm:$0xff] }
 0x35c   :  { %6121 = vmatpush1.bf16.msra.mxu0 %v8513_v29  ;;  %7159 = vmatprep.subr.bf16.mxu1 %v7158_v7  ;;  %v7172_v29 = vpack.c.bf16 %v6181_v26, %v6180_v25  ;;  %v7174_v30 = vpack.c.bf16 %v6199_v28, %v6198_v27 }
 0x35d   :  { %6131 = vmatprep.subr.bf16.mxu0 %v8524_v31  ;;  %v6182_v31 = vld [vmem:[#allocation8 + $0x40] sm:$0xff] }
 0x35e   :  { %5631 = vmatmul.mubr.bf16.vlgmr.msra.gmra.mrb[0].mxu1 %v307_v32  ;;  %v6183_v32 = vld [vmem:[#allocation8 + $0x48] sm:$0xff] }
 0x35f   :  { %6123 = vmatmul.mubr.bf16.vlgmr.msra.gmra.mrb[0].mxu0 %v331_v33  ;;  %7161 = vmatpush3.bf16.msra.mxu1 %v7160_v11  ;;  %v6200_v33 = vld [vmem:[#allocation8 + $0xd0] sm:$0xff] }
 0x360   :  { %6132 = vmatpush1.bf16.msra.mxu0 %v8522_v34  ;;  %6163 = vmatprep.mubr.bf16.mxu0 %v334_v35  ;;  %v6201_v34 = vld [vmem:[#allocation8 + $0xd8] sm:$0xff]  ;;  %v7176_v35 = vpack.c.bf16 %v6183_v32, %v6182_v31 }
 0x361   :  { %6133 = vmatprep.subr.bf16.mxu0 %v8527_v36  ;;  %7163 = vmatprep.subr.bf16.mxu1 %v7162_v12  ;;  %v7178_v36 = vpack.c.bf16 %v6201_v34, %v6200_v33  ;;  %v7122_v12 = vld [vmem:[#allocation10] ss:$0 sm:$0xff] }
 0x363   :  { %7165 = vmatpush3.bf16.msra.mxu1 %v7164_v17 }
 0x364   :  { %6134 = vmatpush1.bf16.msra.mxu0 %v8525_v37  ;;  %7167 = vmatprep.subr.bf16.mxu1 %v7166_v18  ;;  %v6184_v37 = vld [vmem:[#allocation8 + $0x50] sm:$0xff] }
 0x365   :  { %6135 = vmatprep.subr.bf16.mxu0 %v8530_v38  ;;  %v6185_v38 = vld [vmem:[#allocation8 + $0x58] sm:$0xff] }
 0x367   :  { %7169 = vmatpush3.bf16.msra.mxu1 %v7168_v23 }
 0x368   :  { %6136 = vmatpush1.bf16.msra.mxu0 %v8528_v39  ;;  %7171 = vmatprep.subr.bf16.mxu1 %v7170_v24  ;;  %v6202_v39 = vld [vmem:[#allocation8 + $0xe0] sm:$0xff] }
 0x369   :  { %6137 = vmatprep.subr.bf16.mxu0 %v8533_v40  ;;  %v6203_v40 = vld [vmem:[#allocation8 + $0xe8] sm:$0xff] }
 0x36b   :  { %7173 = vmatpush3.bf16.msra.mxu1 %v7172_v29 }
 0x36c   :  { %6138 = vmatpush1.bf16.msra.mxu0 %v8531_v41  ;;  %7175 = vmatprep.subr.bf16.mxu1 %v7174_v30  ;;  %v7180_v41 = vpack.c.bf16 %v6185_v38, %v6184_v37 }
 0x36d   :  { %6139 = vmatprep.subr.bf16.mxu0 %v8536_v42  ;;  %v7182_v42 = vpack.c.bf16 %v6203_v40, %v6202_v39 }
 0x36f   :  { %7177 = vmatpush3.bf16.msra.mxu1 %v7176_v35 }
 0x370   :  { %6140 = vmatpush1.bf16.msra.mxu0 %v8534_v43  ;;  %7179 = vmatprep.subr.bf16.mxu1 %v7178_v36  ;;  %v6186_v43 = vld [vmem:[#allocation8 + $0x60] sm:$0xff] }
 0x371   :  { %6141 = vmatprep.subr.bf16.mxu0 %v8539_v44  ;;  %v6187_v44 = vld [vmem:[#allocation8 + $0x68] sm:$0xff] }
 0x373   :  { %7181 = vmatpush3.bf16.msra.mxu1 %v7180_v41 }
 0x374   :  { %6142 = vmatpush1.bf16.msra.mxu0 %v8537_v45  ;;  %7183 = vmatprep.subr.bf16.mxu1 %v7182_v42  ;;  %v7184_v45 = vpack.c.bf16 %v6187_v44, %v6186_v43 }
 0x375   :  { %6143 = vmatprep.subr.bf16.mxu0 %v8542_v46  ;;  %v6204_v46 = vld [vmem:[#allocation8 + $0xf0] sm:$0xff] }
 0x377   :  { %7185 = vmatpush3.bf16.msra.mxu1 %v7184_v45 }
 0x378   :  { %6144 = vmatpush1.bf16.msra.mxu0 %v8540_v47  ;;  %v6205_v47 = vld [vmem:[#allocation8 + $0xf8] sm:$0xff] }
 0x379   :  { %6145 = vmatprep.subr.bf16.mxu0 %v8545_v48  ;;  %v7186_v48 = vpack.c.bf16 %v6205_v47, %v6204_v46 }
 0x37b   :  { %7187 = vmatprep.subr.bf16.mxu1 %v7186_v48 }
 0x37c   :  { %6146 = vmatpush1.bf16.msra.mxu0 %v8543_v49  ;;  %v6188_v49 = vld [vmem:[#allocation8 + $0x70] sm:$0xff] }
 0x37d   :  { %6147 = vmatprep.subr.bf16.mxu0 %v8548_v50  ;;  %v6189_v50 = vld [vmem:[#allocation8 + $0x78] sm:$0xff] }
 0x380   :  { %6148 = vmatpush1.bf16.msra.mxu0 %v8546_v51  ;;  %v7188_v51 = vpack.c.bf16 %v6189_v50, %v6188_v49 }
 0x381   :  { %6149 = vmatprep.subr.bf16.mxu0 %v8551_v52 }
 0x382   :  { %7189 = vmatpush3.bf16.msra.mxu1 %v7188_v51 }
 0x384   :  { %6150 = vmatpush1.bf16.msra.mxu0 %v8549_v53 }
 0x385   :  { %6151 = vmatprep.subr.bf16.mxu0 %v8554_v54 }
 0x388   :  { %6152 = vmatpush1.bf16.msra.mxu0 %v8552_v55 }
 0x389   :  { %6153 = vmatprep.subr.bf16.mxu0 %v8557_v56  ;;  %v1137_v56 = vlaneseq }
 0x38b   :  { %v6284_v9 = vand.u32 127, %v1137_v56 }
 0x38c   :  { %6154 = vmatpush1.bf16.msra.mxu0 %v8555_v57  ;;  %v1138_v57 = vshrl.u32 %v1137_v56, 7 }
 0x38d   :  { %6155 = vmatprep.subr.bf16.mxu0 %v8560_v58  ;;  %vm6285_vm0 = vcmp.eq.s32.totalorder %v6284_v9, 0  ;;  %vm6289_vm1 = vcmp.eq.s32.totalorder %v6284_v9, 1 }
 0x38e   :  { %v1139_v58 = vsub.s32 0, %v1138_v57 }
 0x390   :  { %6156 = vmatpush1.bf16.msra.mxu0 %v8558_v59  ;;  %v1135_v59 = vld [vmem:[#allocation7] sm:$0x3] }
 0x391   :  { %6157 = vmatprep.subr.bf16.mxu0 %v8563_v60  ;;  %v1143_v60 = vsub.s32 1, %v1138_v57 }
 0x394   :  { %6158 = vmatpush1.bf16.msra.mxu0 %v8561_v61  ;;  %v1140_v61 = vrot.slane %v1135_v59, %v1139_v58 }
 0x395   :  { %6159 = vmatprep.subr.bf16.mxu0 %v8566_v62  ;;  %v1144_v62 = vrot.slane %v1135_v59, %v1143_v60 }
 0x398   :  { %6160 = vmatpush1.bf16.msra.mxu0 %v8564_v63 }
 0x399   :  { %6161 = vmatprep.subr.bf16.mxu0 %v8569_v0 }
 0x39c   :  { %6162 = vmatpush1.bf16.msra.mxu0 %v8567_v2 }
 0x39f   :  { %6164 = vmatmul.mubr.bf16.vlgmr.msra.gmra.mrb[0].mxu0 %v333_v3 }
 0x431   :  { %v5632_v52 = vpop.f32.mrb[0].mxu1 }
 0x432   :  { %v5634_v53 = vpop.f32.mrb[1].mxu1  ;;  %v7190_v63 = vadd.f32 %v5632_v52, %v1140_v61 }
 0x433   :  { %v5636_v54 = vpop.f32.mrb[2].mxu1  ;;  %v7192_v0 = vadd.f32 %v5634_v53, %v1144_v62 }
 0x434   :  { %v5637_v55 = vpop.f32.mrb[3].mxu1 }
 0x472   :  { %v6165_v1 = vpop.f32.mrb[0].mxu0 }
 0x473   :  { %v7191_v2 = vadd.f32 %v7190_v63, %v6165_v1  ;;  %v6167_v3 = vpop.f32.mrb[1].mxu0 }
 0x474   :  { %v7193_v4 = vadd.f32 %v7192_v0, %v6167_v3  ;;  %v6169_v5 = vpop.f32.mrb[2].mxu0 }
 0x475   :  { %v6170_v6 = vpop.f32.mrb[3].mxu0  ;;  %v6172_v8 = vmax.f32 %v7191_v2, 0.0 }
 0x476   :  { %v6173_v7 = vmax.f32 %v7193_v4, 0.0 }
 0x478   :  { %6277 = vmatprep.mubr.f32.mxu1 %v6173_v7 }
 0x479   :  { %6278 = vmatmul.mubr.f32.vlgmr.msra.gmra.mrb[4].mxu1 %v6172_v8 }
 0x54c   :  { %v7155_v10 = vpop.f32.mrb[4].mxu1 }
 0x54d   :  { %v7156_v11 = vpop.f32.mrb[5].mxu1 }
 0x54e   :  { %v7157_v13 = vadd.f32 %v7156_v11, %v7155_v10 }
 0x550   :  { %v6280_v14 = vadd.f32 %v7157_v13, %v7122_v12 }
 0x552   :  { %v6286_v15 = vsel %vm6285_vm0, %v6280_v14, 0.0  ;;  %v6290_v16 = vsel %vm6289_vm1, %v6280_v14, 0.0 }
 0x553   :  { %6287 = vadd.xlane.f32.xlu0 %v6286_v15 }
 0x557   :  { %6291 = vadd.xlane.f32.xlu0 %v6290_v16 }
 0x5e0   :  { %v6288_v17 = vpop.xlane.xlu0 %6287 }
 0x5e4   :  { %v6292_v18 = vpop.xlane.xlu0 %6291 }
 0x5e5   :  { %v6293_v19 = vsub.f32 %v6288_v17, %v6292_v18 }
 0x5e7   :  { %v6294_v20 = vmul.f32 1.442695, %v6293_v19 }
 0x5e9   :  { %8573 = vpow2.f32 %v6294_v20 }
 0x5f3   :  { %v8574_v21 = vpop.eup %8573 }
 0x5f4   :  { %v6296_v22 = vadd.f32 1.0, %v8574_v21 }
 0x5f6   :  { %8575 = vrcp.f32 %v6296_v22 }
 0x600   :  { %v8576_v23 = vpop.eup %8575 }
 0x601   :  { %v6299_v24 = vsub.f32 1.0, %v8576_v23  ;;  %v6300_v25 = vsel %vm6289_vm1, %v8576_v23, 0.0 }
 0x603   :  { %v6301_v26 = vsel %vm6285_vm0, %v6299_v24, %v6300_v25 }
 0x604   :  { %6302 = vst [vmem:[#allocation11] sm:$0xff] %v6301_v26 }
 0x605   :  { %6307 = vsyncadd [#allocation4], 64  ;;  %s8726_s4 = smov [#allocation11]  }
 0x606   :  { %s6308_s3 = sshll.u32 %s8726_s4, 4  ;;  %s6309_s3 = int_to_ptr.vmem [resolvable:$true] %s6308_s3 }
 0x607   :  { %s8687_s28 = scalar_lea.vmem %s6309_s3, 64  ;;  %s8691_s29 = scalar_lea.vmem %s6309_s3, 128 }
 0x608   :  { %p8688_p12 = scmp.ne.s32.totalorder %s6309_s3, %s8687_s28  ;;  %p8692_p13 = scmp.lt.s32.totalorder %s6309_s3, %s6309_s3 }
 0x609   :  { %p8693_p0 = scmp.lt.s32.totalorder %s8691_s29, %s8687_s28 }
 0x60b   :  { %p8694_p1 = por %p8693_p0, %p8692_p13 }
 0x60d   :  { %p8695_p2 = pnand %p8694_p1, %p8688_p12 }
 0x60f   :  { %8698 = shalt.err (!%p8695_p2)
}
 0x610   :  { %s8699_s8 = scalar_lea.hbm %s8838_s5, 64 }
 0x611   :  { %p8700_p3 = scmp.ne.s32.totalorder %s8838_s5, %s8699_s8  ;;  %p8703_p4 = scmp.lt.u32.totalorder %s8699_s8, %s8838_s5 }
 0x613   :  { %p8705_p5 = pnand %p8703_p4, %p8700_p3 }
 0x615   :  { %8708 = shalt.err (!%p8705_p5)
}
 0x616   :  { %s8727_s14 = smov 64   ;;  %s8728_s15 = smov 4  }
 0x617   :  { %6314 = dma.vmem_to_hbm [thread:$0]  %s6309_s3, 64, %s8838_s5, [#allocation4], %s8727_s14, %s8727_s14, %s8728_s15  }
 0x618   :  { %8715 = dma.done.wait [#allocation4], 128  }
 0x619   :  { %8716 = vsyncadd [#allocation4], 4294967168 }
 0x61a   :  { %6318 = vsyncpa [#allocation3], 1 }
 0x61b   :  { %6319 = vsyncpa [#allocation6], 1 }
 0x61c   :  { %6320 = vsyncpa [#allocation9], 1 }
 0x61d   :  { %6321 = vsyncpa [#allocation4], 1 }

</bundles_post_ra>
